<compile_context>
chip_gen: v7x
topology: tpu7x:2x2x1
jax: 0.10.0
libtpu: 0.0.40
codegen_flags: <defaults>
</compile_context>

<pallas_src>
import functools
import math

import jax
import jax.numpy as jnp
from jax import lax
from jax.experimental import pallas as pl
from jax.experimental.pallas import tpu as pltpu


def _gelu(x, approximate):
    if approximate:
        # tanh-form GELU (jax.nn.gelu(approximate=True)): tanh goes to the EUP.
        c = math.sqrt(2.0 / math.pi)
        return 0.5 * x * (1.0 + jnp.tanh(c * (x + 0.044715 * (x * x * x))))
    # erf-form GELU: matches PyTorch nn.GELU() default exactly.
    return 0.5 * x * (1.0 + lax.erf(x * (1.0 / math.sqrt(2.0))))


def temporal_mix_kernel(w1_ref, b1_ref, w2_ref, b2_ref, x_ref, o_ref, *,
                        hidden, ksize, n_frames, approximate):
    """Fused 2-layer temporal conv mixer on a lane-dense (rows, features) tile.

    Row layout: r = b * T + t (time on the sublane axis), features on lanes.
    The block always covers whole frames, so local row index mod T equals t.
      w1_ref : SMEM (hidden*ksize,)  Conv2d(1 -> hidden) taps
      b1_ref : SMEM (hidden,)
      w2_ref : SMEM (hidden*ksize,)  Conv2d(hidden -> 1) taps
      b2_ref : SMEM (1,)
      x_ref  : VMEM (rows_tile, f_tile)
      o_ref  : VMEM (rows_tile, f_tile)
    """
    pad = ksize // 2
    rows, feats = x_ref.shape

    x = x_ref[...]

    # ---- frame-boundary tap masks, computed in-kernel (no HBM mask stream) --
    # t = local_row mod T, computed in f32 (exact: rows << 2**24) using only
    # guaranteed-lowering VPU ops (iota, convert, divide, floor, compare, select).
    masks = {}
    if ksize > 1:
        r_f = lax.broadcasted_iota(jnp.int32, (rows, feats), 0).astype(jnp.float32)
        t_f = r_f - jnp.floor(r_f / float(n_frames)) * float(n_frames)
        for k in range(ksize):
            d = k - pad
            if d == 0:
                continue
            if d < 0:
                cond = t_f >= float(-d)                  # tap stays inside the frame
            else:
                cond = t_f <= float(n_frames - 1 - d)
            masks[d] = jnp.where(cond, 1.0, 0.0).astype(x.dtype)

    def shift_rows(v, d):
        # result[r] = v[r + d] within the frame, 0 across frame boundaries.
        # Circular roll on the sublane axis (XLU) + mask; the wrap-around rows
        # are exactly the masked-out ones because blocks hold whole frames.
        if d == 0:
            return v
        shift = (-d) % rows
        rolled = pltpu.roll(v, shift, axis=0) if shift else v
        return rolled * masks[d]

    # Time-shifted views of x: shifted_x[k][r, f] = x[r + (k - pad), f] (0 outside frame).
    shifted_x = [shift_rows(x, k - pad) for k in range(ksize)]

    # ---- fused layers: single pass over hidden channels ---------------------
    # For each h: h_act = GELU(conv1_h(x)); immediately fold w2[h, k] * h_act
    # into the ksize layer-2 partial sums s_k (keeps live tiles ~ksize+3).
    s_k = [None] * ksize
    for h in range(hidden):
        acc = w1_ref[h * ksize] * shifted_x[0]
        for k in range(1, ksize):
            acc = acc + w1_ref[h * ksize + k] * shifted_x[k]
        h_act = _gelu(acc + b1_ref[h], approximate)
        for k in range(ksize):
            term = w2_ref[h * ksize + k] * h_act
            s_k[k] = term if s_k[k] is None else s_k[k] + term

    # ---- layer-2 temporal shift of the per-tap partial sums, bias, GELU -----
    # out[r] = b2 + sum_k s_k[k][r + k - pad]   (zero outside the frame)
    out = s_k[pad]
    for k in range(ksize):
        if k == pad:
            continue
        out = out + shift_rows(s_k[k], k - pad)

    o_ref[...] = _gelu(out + b2_ref[0], approximate).astype(o_ref.dtype)


def _pick_f_tile(F):
    if F % 128 != 0:
        return F            # full feature dim: block dim == array dim is layout-legal
    if F <= 512:
        return F
    for cand in (512, 384, 256, 128):
        if F % cand == 0:
            return cand
    return F


def _pick_b_tile(B, T, f_tile, *, itemsize=4, target_bytes=1 << 20,
                 f_steps=1, min_steps=4):
    """Pick b_tile so r_block = b_tile*T is 8-row aligned, the input block stays
    ~<= target_bytes (the fused body keeps ~12 block-sized temporaries live ->
    fits v7x's 64 MiB VMEM with double-buffered I/O), and the grid has >=
    min_steps steps so both v7x TensorCores get balanced, pipelined work."""
    m = 8 // math.gcd(T, 8)                     # smallest b with (b*T) % 8 == 0
    valid = [b for b in range(1, B + 1) if B % b == 0 and b % m == 0]
    if not valid:
        return B                                # full-rows block (block == array dim)

    budget_b = max(1, target_bytes // (T * f_tile * itemsize))
    within = [b for b in valid if b <= budget_b]
    b_tile = max(within) if within else min(valid)

    def steps(bt):
        return (B // bt) * f_steps

    while steps(b_tile) < min_steps:
        smaller = [b for b in valid if b < b_tile]
        if not smaller:
            break
        b_tile = max(smaller)
    return b_tile


def temporal_mix_cnn(x, w1, b1, w2, b2, *, hidden, ksize, approximate_gelu=True,
                     f_tile=None, b_tile=None):
    """x: (B, n_frames, n_features) float32 -> same shape."""
    B, T, F = x.shape
    assert ksize % 2 == 1

    # ---- tile selection ------------------------------------------------------
    if f_tile is None:
        f_tile = _pick_f_tile(F)
    assert F % f_tile == 0
    assert f_tile == F or f_tile % 128 == 0

    if b_tile is None:
        b_tile = _pick_b_tile(B, T, f_tile, f_steps=F // f_tile)
    assert B % b_tile == 0
    rows = B * T
    r_block = b_tile * T
    assert r_block % 8 == 0 or r_block == rows

    # ---- host-side prep (metadata-only reshapes, no transposes) --------------
    xr = x.reshape(rows, F)
    w1f = w1.reshape(hidden * ksize).astype(jnp.float32)   # (H, 1, 1, K) -> (H*K,)
    b1f = b1.reshape(hidden).astype(jnp.float32)
    w2f = w2.reshape(hidden * ksize).astype(jnp.float32)   # (1, H, 1, K) -> (H*K,)
    b2f = b2.reshape(1).astype(jnp.float32)

    kernel = functools.partial(temporal_mix_kernel, hidden=hidden, ksize=ksize,
                               n_frames=T, approximate=approximate_gelu)
    grid = (rows // r_block, F // f_tile)

    block_bytes = r_block * f_tile * 4
    # ~12 live block-sized temporaries + double-buffered in/out; cap below v7x's
    # 64 MiB physical VMEM.
    vmem_limit = int(min(56 * 2**20, max(32 * 2**20, 20 * block_bytes)))

    yr = pl.pallas_call(
        kernel,
        out_shape=jax.ShapeDtypeStruct((rows, F), x.dtype),
        grid=grid,
        in_specs=[
            pl.BlockSpec(memory_space=pltpu.MemorySpace.SMEM),     # w1 taps
            pl.BlockSpec(memory_space=pltpu.MemorySpace.SMEM),     # b1
            pl.BlockSpec(memory_space=pltpu.MemorySpace.SMEM),     # w2 taps
            pl.BlockSpec(memory_space=pltpu.MemorySpace.SMEM),     # b2
            pl.BlockSpec((r_block, f_tile), lambda i, j: (i, j)),  # x tile
        ],
        out_specs=pl.BlockSpec((r_block, f_tile), lambda i, j: (i, j)),
        compiler_params=pltpu.CompilerParams(
            dimension_semantics=("parallel", "parallel"),
            vmem_limit_bytes=vmem_limit,
        ),
    )(w1f, b1f, w2f, b2f, xr)

    return yr.reshape(B, T, F)


def reference_forward(x, w1, b1, w2, b2, *, approximate_gelu):
    """Pure-JAX reference mirroring the PyTorch forward (NCHW conv)."""
    y = jnp.transpose(x, (0, 2, 1))[:, None, :, :]  # (B, 1, F, T)
    pad = ((0, 0), (w1.shape[-1] // 2, w1.shape[-1] // 2))
    dn = ("NCHW", "OIHW", "NCHW")
    y = lax.conv_general_dilated(y, w1, (1, 1), pad, dimension_numbers=dn,
                                 precision=lax.Precision.HIGHEST)
    y = _gelu(y + b1[None, :, None, None], approximate_gelu)
    y = lax.conv_general_dilated(y, w2, (1, 1), pad, dimension_numbers=dn,
                                 precision=lax.Precision.HIGHEST)
    y = _gelu(y + b2[None, :, None, None], approximate_gelu)
    y = y[:, 0]  # (B, F, T)
    return jnp.transpose(y, (0, 2, 1))


if __name__ == "__main__":
    # Shapes consistent with module defaults: n_features=128, hidden_size=32, k=3.
    B, T, F = 2, 8, 128
    H, K = 32, 3

    key = jax.random.PRNGKey(0)
    kx, kw1, kb1, kw2, kb2 = jax.random.split(key, 5)

    x = jax.random.normal(kx, (B, T, F), dtype=jnp.float32)

    # Deterministic Conv2d-shaped params: (out_ch, in_ch, 1, K), uniform scaled by fan-in.
    fan1 = 1 * 1 * K
    w1 = jax.random.uniform(kw1, (H, 1, 1, K), jnp.float32, -1.0, 1.0) / math.sqrt(fan1)
    b1 = jax.random.uniform(kb1, (H,), jnp.float32, -1.0, 1.0) / math.sqrt(fan1)
    fan2 = H * 1 * K
    w2 = jax.random.uniform(kw2, (1, H, 1, K), jnp.float32, -1.0, 1.0) / math.sqrt(fan2)
    b2 = jax.random.uniform(kb2, (1,), jnp.float32, -1.0, 1.0) / math.sqrt(fan2)

    # Default (performance) path: tanh-approximate GELU on the EUP.
    out_approx = jax.block_until_ready(
        temporal_mix_cnn(x, w1, b1, w2, b2, hidden=H, ksize=K))
    ref_approx = reference_forward(x, w1, b1, w2, b2, approximate_gelu=True)
    assert out_approx.shape == (B, T, F), out_approx.shape
    assert jnp.allclose(out_approx, ref_approx, atol=1e-4, rtol=1e-4), \
        float(jnp.max(jnp.abs(out_approx - ref_approx)))

    # Exact-parity path: erf GELU (PyTorch nn.GELU() default semantics).
    out_exact = jax.block_until_ready(
        temporal_mix_cnn(x, w1, b1, w2, b2, hidden=H, ksize=K,
                         approximate_gelu=False))
    ref_exact = reference_forward(x, w1, b1, w2, b2, approximate_gelu=False)
    assert jnp.allclose(out_exact, ref_exact, atol=1e-4, rtol=1e-4), \
        float(jnp.max(jnp.abs(out_exact - ref_exact)))

    print("KERNEL_OK")
</pallas_src>

<mosaic_0001>
module attributes {stable_mosaic.version = 11 : i64} {
  func.func @temporal_mix_kernel(%arg0: i32, %arg1: i32, %arg2: memref<96xf32, #tpu.memory_space<smem>>, %arg3: memref<32xf32, #tpu.memory_space<smem>>, %arg4: memref<96xf32, #tpu.memory_space<smem>>, %arg5: memref<1xf32, #tpu.memory_space<smem>>, %arg6: memref<8x128xf32, #tpu.memory_space<vmem>>, %arg7: memref<8x128xf32, #tpu.memory_space<vmem>>) attributes {dimension_semantics = [#tpu.dimension_semantics<parallel>, #tpu.dimension_semantics<parallel>], iteration_bounds = array<i64: 2, 1>, scalar_prefetch = 0 : i64, scratch_operands = 0 : i64, tpu.core_type = #tpu.core_type<tc>, window_params = [{transform_indices = @transform_0, window_bounds = array<i64: 96>}, {transform_indices = @transform_1, window_bounds = array<i64: 32>}, {transform_indices = @transform_2, window_bounds = array<i64: 96>}, {transform_indices = @transform_3, window_bounds = array<i64: 1>}, {transform_indices = @transform_4, window_bounds = array<i64: 8, 128>}, {transform_indices = @transform_5, window_bounds = array<i64: 8, 128>}]} {
    %c0 = arith.constant 0 : index
    %c0_0 = arith.constant 0 : index
    %0 = vector.load %arg6[%c0, %c0_0] : memref<8x128xf32, #tpu.memory_space<vmem>>, vector<8x128xf32>
    %1 = tpu.iota {dimensions = array<i32: 0>} : vector<8x128xi32>
    %2 = arith.sitofp %1 : vector<8x128xi32> to vector<8x128xf32>
    %cst = arith.constant 8.000000e+00 : f32
    %3 = vector.broadcast %cst : f32 to vector<8x128xf32>
    %4 = arith.divf %2, %3 : vector<8x128xf32>
    %5 = math.floor %4 : vector<8x128xf32>
    %cst_1 = arith.constant 8.000000e+00 : f32
    %6 = vector.broadcast %cst_1 : f32 to vector<8x128xf32>
    %7 = arith.mulf %5, %6 : vector<8x128xf32>
    %8 = arith.subf %2, %7 : vector<8x128xf32>
    %cst_2 = arith.constant 1.000000e+00 : f32
    %9 = vector.broadcast %cst_2 : f32 to vector<8x128xf32>
    %10 = arith.cmpf oge, %8, %9 : vector<8x128xf32>
    %cst_3 = arith.constant 1.000000e+00 : f32
    %cst_4 = arith.constant 0.000000e+00 : f32
    %11 = vector.broadcast %cst_3 : f32 to vector<8x128xf32>
    %12 = vector.broadcast %cst_4 : f32 to vector<8x128xf32>
    %13 = arith.select %10, %11, %12 : vector<8x128xi1>, vector<8x128xf32>
    %cst_5 = arith.constant 6.000000e+00 : f32
    %14 = vector.broadcast %cst_5 : f32 to vector<8x128xf32>
    %15 = arith.cmpf ole, %8, %14 : vector<8x128xf32>
    %cst_6 = arith.constant 1.000000e+00 : f32
    %cst_7 = arith.constant 0.000000e+00 : f32
    %16 = vector.broadcast %cst_6 : f32 to vector<8x128xf32>
    %17 = vector.broadcast %cst_7 : f32 to vector<8x128xf32>
    %18 = arith.select %15, %16, %17 : vector<8x128xi1>, vector<8x128xf32>
    %c1_i32 = arith.constant 1 : i32
    %19 = tpu.dynamic_rotate %0 by %c1_i32 dim 0 : vector<8x128xf32>, i32 -> vector<8x128xf32>
    %20 = arith.mulf %19, %13 : vector<8x128xf32>
    %c7_i32 = arith.constant 7 : i32
    %21 = tpu.dynamic_rotate %0 by %c7_i32 dim 0 : vector<8x128xf32>, i32 -> vector<8x128xf32>
    %22 = arith.mulf %21, %18 : vector<8x128xf32>
    %c0_8 = arith.constant 0 : index
    %23 = memref.load %arg2[%c0_8] : memref<96xf32, #tpu.memory_space<smem>>
    %24 = vector.broadcast %23 : f32 to vector<8x128xf32>
    %25 = arith.mulf %24, %20 : vector<8x128xf32>
    %c1 = arith.constant 1 : index
    %26 = memref.load %arg2[%c1] : memref<96xf32, #tpu.memory_space<smem>>
    %27 = vector.broadcast %26 : f32 to vector<8x128xf32>
    %28 = arith.mulf %27, %0 : vector<8x128xf32>
    %29 = arith.addf %25, %28 : vector<8x128xf32>
    %c2 = arith.constant 2 : index
    %30 = memref.load %arg2[%c2] : memref<96xf32, #tpu.memory_space<smem>>
    %31 = vector.broadcast %30 : f32 to vector<8x128xf32>
    %32 = arith.mulf %31, %22 : vector<8x128xf32>
    %33 = arith.addf %29, %32 : vector<8x128xf32>
    %c0_9 = arith.constant 0 : index
    %34 = memref.load %arg3[%c0_9] : memref<32xf32, #tpu.memory_space<smem>>
    %35 = vector.broadcast %34 : f32 to vector<8x128xf32>
    %36 = arith.addf %33, %35 : vector<8x128xf32>
    %cst_10 = arith.constant 5.000000e-01 : f32
    %37 = vector.broadcast %cst_10 : f32 to vector<8x128xf32>
    %38 = arith.mulf %37, %36 : vector<8x128xf32>
    %39 = arith.mulf %36, %36 : vector<8x128xf32>
    %40 = arith.mulf %39, %36 : vector<8x128xf32>
    %cst_11 = arith.constant 4.471500e-02 : f32
    %41 = vector.broadcast %cst_11 : f32 to vector<8x128xf32>
    %42 = arith.mulf %41, %40 : vector<8x128xf32>
    %43 = arith.addf %36, %42 : vector<8x128xf32>
    %cst_12 = arith.constant 0.797884583 : f32
    %44 = vector.broadcast %cst_12 : f32 to vector<8x128xf32>
    %45 = arith.mulf %44, %43 : vector<8x128xf32>
    %46 = math.tanh %45 : vector<8x128xf32>
    %cst_13 = arith.constant 1.000000e+00 : f32
    %47 = vector.broadcast %cst_13 : f32 to vector<8x128xf32>
    %48 = arith.addf %47, %46 : vector<8x128xf32>
    %49 = arith.mulf %38, %48 : vector<8x128xf32>
    %c0_14 = arith.constant 0 : index
    %50 = memref.load %arg4[%c0_14] : memref<96xf32, #tpu.memory_space<smem>>
    %51 = vector.broadcast %50 : f32 to vector<8x128xf32>
    %52 = arith.mulf %51, %49 : vector<8x128xf32>
    %c1_15 = arith.constant 1 : index
    %53 = memref.load %arg4[%c1_15] : memref<96xf32, #tpu.memory_space<smem>>
    %54 = vector.broadcast %53 : f32 to vector<8x128xf32>
    %55 = arith.mulf %54, %49 : vector<8x128xf32>
    %c2_16 = arith.constant 2 : index
    %56 = memref.load %arg4[%c2_16] : memref<96xf32, #tpu.memory_space<smem>>
    %57 = vector.broadcast %56 : f32 to vector<8x128xf32>
    %58 = arith.mulf %57, %49 : vector<8x128xf32>
    %c3 = arith.constant 3 : index
    %59 = memref.load %arg2[%c3] : memref<96xf32, #tpu.memory_space<smem>>
    %60 = vector.broadcast %59 : f32 to vector<8x128xf32>
    %61 = arith.mulf %60, %20 : vector<8x128xf32>
    %c4 = arith.constant 4 : index
    %62 = memref.load %arg2[%c4] : memref<96xf32, #tpu.memory_space<smem>>
    %63 = vector.broadcast %62 : f32 to vector<8x128xf32>
    %64 = arith.mulf %63, %0 : vector<8x128xf32>
    %65 = arith.addf %61, %64 : vector<8x128xf32>
    %c5 = arith.constant 5 : index
    %66 = memref.load %arg2[%c5] : memref<96xf32, #tpu.memory_space<smem>>
    %67 = vector.broadcast %66 : f32 to vector<8x128xf32>
    %68 = arith.mulf %67, %22 : vector<8x128xf32>
    %69 = arith.addf %65, %68 : vector<8x128xf32>
    %c1_17 = arith.constant 1 : index
    %70 = memref.load %arg3[%c1_17] : memref<32xf32, #tpu.memory_space<smem>>
    %71 = vector.broadcast %70 : f32 to vector<8x128xf32>
    %72 = arith.addf %69, %71 : vector<8x128xf32>
    %cst_18 = arith.constant 5.000000e-01 : f32
    %73 = vector.broadcast %cst_18 : f32 to vector<8x128xf32>
    %74 = arith.mulf %73, %72 : vector<8x128xf32>
    %75 = arith.mulf %72, %72 : vector<8x128xf32>
    %76 = arith.mulf %75, %72 : vector<8x128xf32>
    %cst_19 = arith.constant 4.471500e-02 : f32
    %77 = vector.broadcast %cst_19 : f32 to vector<8x128xf32>
    %78 = arith.mulf %77, %76 : vector<8x128xf32>
    %79 = arith.addf %72, %78 : vector<8x128xf32>
    %cst_20 = arith.constant 0.797884583 : f32
    %80 = vector.broadcast %cst_20 : f32 to vector<8x128xf32>
    %81 = arith.mulf %80, %79 : vector<8x128xf32>
    %82 = math.tanh %81 : vector<8x128xf32>
    %cst_21 = arith.constant 1.000000e+00 : f32
    %83 = vector.broadcast %cst_21 : f32 to vector<8x128xf32>
    %84 = arith.addf %83, %82 : vector<8x128xf32>
    %85 = arith.mulf %74, %84 : vector<8x128xf32>
    %c3_22 = arith.constant 3 : index
    %86 = memref.load %arg4[%c3_22] : memref<96xf32, #tpu.memory_space<smem>>
    %87 = vector.broadcast %86 : f32 to vector<8x128xf32>
    %88 = arith.mulf %87, %85 : vector<8x128xf32>
    %89 = arith.addf %52, %88 : vector<8x128xf32>
    %c4_23 = arith.constant 4 : index
    %90 = memref.load %arg4[%c4_23] : memref<96xf32, #tpu.memory_space<smem>>
    %91 = vector.broadcast %90 : f32 to vector<8x128xf32>
    %92 = arith.mulf %91, %85 : vector<8x128xf32>
    %93 = arith.addf %55, %92 : vector<8x128xf32>
    %c5_24 = arith.constant 5 : index
    %94 = memref.load %arg4[%c5_24] : memref<96xf32, #tpu.memory_space<smem>>
    %95 = vector.broadcast %94 : f32 to vector<8x128xf32>
    %96 = arith.mulf %95, %85 : vector<8x128xf32>
    %97 = arith.addf %58, %96 : vector<8x128xf32>
    %c6 = arith.constant 6 : index
    %98 = memref.load %arg2[%c6] : memref<96xf32, #tpu.memory_space<smem>>
    %99 = vector.broadcast %98 : f32 to vector<8x128xf32>
    %100 = arith.mulf %99, %20 : vector<8x128xf32>
    %c7 = arith.constant 7 : index
    %101 = memref.load %arg2[%c7] : memref<96xf32, #tpu.memory_space<smem>>
    %102 = vector.broadcast %101 : f32 to vector<8x128xf32>
    %103 = arith.mulf %102, %0 : vector<8x128xf32>
    %104 = arith.addf %100, %103 : vector<8x128xf32>
    %c8 = arith.constant 8 : index
    %105 = memref.load %arg2[%c8] : memref<96xf32, #tpu.memory_space<smem>>
    %106 = vector.broadcast %105 : f32 to vector<8x128xf32>
    %107 = arith.mulf %106, %22 : vector<8x128xf32>
    %108 = arith.addf %104, %107 : vector<8x128xf32>
    %c2_25 = arith.constant 2 : index
    %109 = memref.load %arg3[%c2_25] : memref<32xf32, #tpu.memory_space<smem>>
    %110 = vector.broadcast %109 : f32 to vector<8x128xf32>
    %111 = arith.addf %108, %110 : vector<8x128xf32>
    %cst_26 = arith.constant 5.000000e-01 : f32
    %112 = vector.broadcast %cst_26 : f32 to vector<8x128xf32>
    %113 = arith.mulf %112, %111 : vector<8x128xf32>
    %114 = arith.mulf %111, %111 : vector<8x128xf32>
    %115 = arith.mulf %114, %111 : vector<8x128xf32>
    %cst_27 = arith.constant 4.471500e-02 : f32
    %116 = vector.broadcast %cst_27 : f32 to vector<8x128xf32>
    %117 = arith.mulf %116, %115 : vector<8x128xf32>
    %118 = arith.addf %111, %117 : vector<8x128xf32>
    %cst_28 = arith.constant 0.797884583 : f32
    %119 = vector.broadcast %cst_28 : f32 to vector<8x128xf32>
    %120 = arith.mulf %119, %118 : vector<8x128xf32>
    %121 = math.tanh %120 : vector<8x128xf32>
    %cst_29 = arith.constant 1.000000e+00 : f32
    %122 = vector.broadcast %cst_29 : f32 to vector<8x128xf32>
    %123 = arith.addf %122, %121 : vector<8x128xf32>
    %124 = arith.mulf %113, %123 : vector<8x128xf32>
    %c6_30 = arith.constant 6 : index
    %125 = memref.load %arg4[%c6_30] : memref<96xf32, #tpu.memory_space<smem>>
    %126 = vector.broadcast %125 : f32 to vector<8x128xf32>
    %127 = arith.mulf %126, %124 : vector<8x128xf32>
    %128 = arith.addf %89, %127 : vector<8x128xf32>
    %c7_31 = arith.constant 7 : index
    %129 = memref.load %arg4[%c7_31] : memref<96xf32, #tpu.memory_space<smem>>
    %130 = vector.broadcast %129 : f32 to vector<8x128xf32>
    %131 = arith.mulf %130, %124 : vector<8x128xf32>
    %132 = arith.addf %93, %131 : vector<8x128xf32>
    %c8_32 = arith.constant 8 : index
    %133 = memref.load %arg4[%c8_32] : memref<96xf32, #tpu.memory_space<smem>>
    %134 = vector.broadcast %133 : f32 to vector<8x128xf32>
    %135 = arith.mulf %134, %124 : vector<8x128xf32>
    %136 = arith.addf %97, %135 : vector<8x128xf32>
    %c9 = arith.constant 9 : index
    %137 = memref.load %arg2[%c9] : memref<96xf32, #tpu.memory_space<smem>>
    %138 = vector.broadcast %137 : f32 to vector<8x128xf32>
    %139 = arith.mulf %138, %20 : vector<8x128xf32>
    %c10 = arith.constant 10 : index
    %140 = memref.load %arg2[%c10] : memref<96xf32, #tpu.memory_space<smem>>
    %141 = vector.broadcast %140 : f32 to vector<8x128xf32>
    %142 = arith.mulf %141, %0 : vector<8x128xf32>
    %143 = arith.addf %139, %142 : vector<8x128xf32>
    %c11 = arith.constant 11 : index
    %144 = memref.load %arg2[%c11] : memref<96xf32, #tpu.memory_space<smem>>
    %145 = vector.broadcast %144 : f32 to vector<8x128xf32>
    %146 = arith.mulf %145, %22 : vector<8x128xf32>
    %147 = arith.addf %143, %146 : vector<8x128xf32>
    %c3_33 = arith.constant 3 : index
    %148 = memref.load %arg3[%c3_33] : memref<32xf32, #tpu.memory_space<smem>>
    %149 = vector.broadcast %148 : f32 to vector<8x128xf32>
    %150 = arith.addf %147, %149 : vector<8x128xf32>
    %cst_34 = arith.constant 5.000000e-01 : f32
    %151 = vector.broadcast %cst_34 : f32 to vector<8x128xf32>
    %152 = arith.mulf %151, %150 : vector<8x128xf32>
    %153 = arith.mulf %150, %150 : vector<8x128xf32>
    %154 = arith.mulf %153, %150 : vector<8x128xf32>
    %cst_35 = arith.constant 4.471500e-02 : f32
    %155 = vector.broadcast %cst_35 : f32 to vector<8x128xf32>
    %156 = arith.mulf %155, %154 : vector<8x128xf32>
    %157 = arith.addf %150, %156 : vector<8x128xf32>
    %cst_36 = arith.constant 0.797884583 : f32
    %158 = vector.broadcast %cst_36 : f32 to vector<8x128xf32>
    %159 = arith.mulf %158, %157 : vector<8x128xf32>
    %160 = math.tanh %159 : vector<8x128xf32>
    %cst_37 = arith.constant 1.000000e+00 : f32
    %161 = vector.broadcast %cst_37 : f32 to vector<8x128xf32>
    %162 = arith.addf %161, %160 : vector<8x128xf32>
    %163 = arith.mulf %152, %162 : vector<8x128xf32>
    %c9_38 = arith.constant 9 : index
    %164 = memref.load %arg4[%c9_38] : memref<96xf32, #tpu.memory_space<smem>>
    %165 = vector.broadcast %164 : f32 to vector<8x128xf32>
    %166 = arith.mulf %165, %163 : vector<8x128xf32>
    %167 = arith.addf %128, %166 : vector<8x128xf32>
    %c10_39 = arith.constant 10 : index
    %168 = memref.load %arg4[%c10_39] : memref<96xf32, #tpu.memory_space<smem>>
    %169 = vector.broadcast %168 : f32 to vector<8x128xf32>
    %170 = arith.mulf %169, %163 : vector<8x128xf32>
    %171 = arith.addf %132, %170 : vector<8x128xf32>
    %c11_40 = arith.constant 11 : index
    %172 = memref.load %arg4[%c11_40] : memref<96xf32, #tpu.memory_space<smem>>
    %173 = vector.broadcast %172 : f32 to vector<8x128xf32>
    %174 = arith.mulf %173, %163 : vector<8x128xf32>
    %175 = arith.addf %136, %174 : vector<8x128xf32>
    %c12 = arith.constant 12 : index
    %176 = memref.load %arg2[%c12] : memref<96xf32, #tpu.memory_space<smem>>
    %177 = vector.broadcast %176 : f32 to vector<8x128xf32>
    %178 = arith.mulf %177, %20 : vector<8x128xf32>
    %c13 = arith.constant 13 : index
    %179 = memref.load %arg2[%c13] : memref<96xf32, #tpu.memory_space<smem>>
    %180 = vector.broadcast %179 : f32 to vector<8x128xf32>
    %181 = arith.mulf %180, %0 : vector<8x128xf32>
    %182 = arith.addf %178, %181 : vector<8x128xf32>
    %c14 = arith.constant 14 : index
    %183 = memref.load %arg2[%c14] : memref<96xf32, #tpu.memory_space<smem>>
    %184 = vector.broadcast %183 : f32 to vector<8x128xf32>
    %185 = arith.mulf %184, %22 : vector<8x128xf32>
    %186 = arith.addf %182, %185 : vector<8x128xf32>
    %c4_41 = arith.constant 4 : index
    %187 = memref.load %arg3[%c4_41] : memref<32xf32, #tpu.memory_space<smem>>
    %188 = vector.broadcast %187 : f32 to vector<8x128xf32>
    %189 = arith.addf %186, %188 : vector<8x128xf32>
    %cst_42 = arith.constant 5.000000e-01 : f32
    %190 = vector.broadcast %cst_42 : f32 to vector<8x128xf32>
    %191 = arith.mulf %190, %189 : vector<8x128xf32>
    %192 = arith.mulf %189, %189 : vector<8x128xf32>
    %193 = arith.mulf %192, %189 : vector<8x128xf32>
    %cst_43 = arith.constant 4.471500e-02 : f32
    %194 = vector.broadcast %cst_43 : f32 to vector<8x128xf32>
    %195 = arith.mulf %194, %193 : vector<8x128xf32>
    %196 = arith.addf %189, %195 : vector<8x128xf32>
    %cst_44 = arith.constant 0.797884583 : f32
    %197 = vector.broadcast %cst_44 : f32 to vector<8x128xf32>
    %198 = arith.mulf %197, %196 : vector<8x128xf32>
    %199 = math.tanh %198 : vector<8x128xf32>
    %cst_45 = arith.constant 1.000000e+00 : f32
    %200 = vector.broadcast %cst_45 : f32 to vector<8x128xf32>
    %201 = arith.addf %200, %199 : vector<8x128xf32>
    %202 = arith.mulf %191, %201 : vector<8x128xf32>
    %c12_46 = arith.constant 12 : index
    %203 = memref.load %arg4[%c12_46] : memref<96xf32, #tpu.memory_space<smem>>
    %204 = vector.broadcast %203 : f32 to vector<8x128xf32>
    %205 = arith.mulf %204, %202 : vector<8x128xf32>
    %206 = arith.addf %167, %205 : vector<8x128xf32>
    %c13_47 = arith.constant 13 : index
    %207 = memref.load %arg4[%c13_47] : memref<96xf32, #tpu.memory_space<smem>>
    %208 = vector.broadcast %207 : f32 to vector<8x128xf32>
    %209 = arith.mulf %208, %202 : vector<8x128xf32>
    %210 = arith.addf %171, %209 : vector<8x128xf32>
    %c14_48 = arith.constant 14 : index
    %211 = memref.load %arg4[%c14_48] : memref<96xf32, #tpu.memory_space<smem>>
    %212 = vector.broadcast %211 : f32 to vector<8x128xf32>
    %213 = arith.mulf %212, %202 : vector<8x128xf32>
    %214 = arith.addf %175, %213 : vector<8x128xf32>
    %c15 = arith.constant 15 : index
    %215 = memref.load %arg2[%c15] : memref<96xf32, #tpu.memory_space<smem>>
    %216 = vector.broadcast %215 : f32 to vector<8x128xf32>
    %217 = arith.mulf %216, %20 : vector<8x128xf32>
    %c16 = arith.constant 16 : index
    %218 = memref.load %arg2[%c16] : memref<96xf32, #tpu.memory_space<smem>>
    %219 = vector.broadcast %218 : f32 to vector<8x128xf32>
    %220 = arith.mulf %219, %0 : vector<8x128xf32>
    %221 = arith.addf %217, %220 : vector<8x128xf32>
    %c17 = arith.constant 17 : index
    %222 = memref.load %arg2[%c17] : memref<96xf32, #tpu.memory_space<smem>>
    %223 = vector.broadcast %222 : f32 to vector<8x128xf32>
    %224 = arith.mulf %223, %22 : vector<8x128xf32>
    %225 = arith.addf %221, %224 : vector<8x128xf32>
    %c5_49 = arith.constant 5 : index
    %226 = memref.load %arg3[%c5_49] : memref<32xf32, #tpu.memory_space<smem>>
    %227 = vector.broadcast %226 : f32 to vector<8x128xf32>
    %228 = arith.addf %225, %227 : vector<8x128xf32>
    %cst_50 = arith.constant 5.000000e-01 : f32
    %229 = vector.broadcast %cst_50 : f32 to vector<8x128xf32>
    %230 = arith.mulf %229, %228 : vector<8x128xf32>
    %231 = arith.mulf %228, %228 : vector<8x128xf32>
    %232 = arith.mulf %231, %228 : vector<8x128xf32>
    %cst_51 = arith.constant 4.471500e-02 : f32
    %233 = vector.broadcast %cst_51 : f32 to vector<8x128xf32>
    %234 = arith.mulf %233, %232 : vector<8x128xf32>
    %235 = arith.addf %228, %234 : vector<8x128xf32>
    %cst_52 = arith.constant 0.797884583 : f32
    %236 = vector.broadcast %cst_52 : f32 to vector<8x128xf32>
    %237 = arith.mulf %236, %235 : vector<8x128xf32>
    %238 = math.tanh %237 : vector<8x128xf32>
    %cst_53 = arith.constant 1.000000e+00 : f32
    %239 = vector.broadcast %cst_53 : f32 to vector<8x128xf32>
    %240 = arith.addf %239, %238 : vector<8x128xf32>
    %241 = arith.mulf %230, %240 : vector<8x128xf32>
    %c15_54 = arith.constant 15 : index
    %242 = memref.load %arg4[%c15_54] : memref<96xf32, #tpu.memory_space<smem>>
    %243 = vector.broadcast %242 : f32 to vector<8x128xf32>
    %244 = arith.mulf %243, %241 : vector<8x128xf32>
    %245 = arith.addf %206, %244 : vector<8x128xf32>
    %c16_55 = arith.constant 16 : index
    %246 = memref.load %arg4[%c16_55] : memref<96xf32, #tpu.memory_space<smem>>
    %247 = vector.broadcast %246 : f32 to vector<8x128xf32>
    %248 = arith.mulf %247, %241 : vector<8x128xf32>
    %249 = arith.addf %210, %248 : vector<8x128xf32>
    %c17_56 = arith.constant 17 : index
    %250 = memref.load %arg4[%c17_56] : memref<96xf32, #tpu.memory_space<smem>>
    %251 = vector.broadcast %250 : f32 to vector<8x128xf32>
    %252 = arith.mulf %251, %241 : vector<8x128xf32>
    %253 = arith.addf %214, %252 : vector<8x128xf32>
    %c18 = arith.constant 18 : index
    %254 = memref.load %arg2[%c18] : memref<96xf32, #tpu.memory_space<smem>>
    %255 = vector.broadcast %254 : f32 to vector<8x128xf32>
    %256 = arith.mulf %255, %20 : vector<8x128xf32>
    %c19 = arith.constant 19 : index
    %257 = memref.load %arg2[%c19] : memref<96xf32, #tpu.memory_space<smem>>
    %258 = vector.broadcast %257 : f32 to vector<8x128xf32>
    %259 = arith.mulf %258, %0 : vector<8x128xf32>
    %260 = arith.addf %256, %259 : vector<8x128xf32>
    %c20 = arith.constant 20 : index
    %261 = memref.load %arg2[%c20] : memref<96xf32, #tpu.memory_space<smem>>
    %262 = vector.broadcast %261 : f32 to vector<8x128xf32>
    %263 = arith.mulf %262, %22 : vector<8x128xf32>
    %264 = arith.addf %260, %263 : vector<8x128xf32>
    %c6_57 = arith.constant 6 : index
    %265 = memref.load %arg3[%c6_57] : memref<32xf32, #tpu.memory_space<smem>>
    %266 = vector.broadcast %265 : f32 to vector<8x128xf32>
    %267 = arith.addf %264, %266 : vector<8x128xf32>
    %cst_58 = arith.constant 5.000000e-01 : f32
    %268 = vector.broadcast %cst_58 : f32 to vector<8x128xf32>
    %269 = arith.mulf %268, %267 : vector<8x128xf32>
    %270 = arith.mulf %267, %267 : vector<8x128xf32>
    %271 = arith.mulf %270, %267 : vector<8x128xf32>
    %cst_59 = arith.constant 4.471500e-02 : f32
    %272 = vector.broadcast %cst_59 : f32 to vector<8x128xf32>
    %273 = arith.mulf %272, %271 : vector<8x128xf32>
    %274 = arith.addf %267, %273 : vector<8x128xf32>
    %cst_60 = arith.constant 0.797884583 : f32
    %275 = vector.broadcast %cst_60 : f32 to vector<8x128xf32>
    %276 = arith.mulf %275, %274 : vector<8x128xf32>
    %277 = math.tanh %276 : vector<8x128xf32>
    %cst_61 = arith.constant 1.000000e+00 : f32
    %278 = vector.broadcast %cst_61 : f32 to vector<8x128xf32>
    %279 = arith.addf %278, %277 : vector<8x128xf32>
    %280 = arith.mulf %269, %279 : vector<8x128xf32>
    %c18_62 = arith.constant 18 : index
    %281 = memref.load %arg4[%c18_62] : memref<96xf32, #tpu.memory_space<smem>>
    %282 = vector.broadcast %281 : f32 to vector<8x128xf32>
    %283 = arith.mulf %282, %280 : vector<8x128xf32>
    %284 = arith.addf %245, %283 : vector<8x128xf32>
    %c19_63 = arith.constant 19 : index
    %285 = memref.load %arg4[%c19_63] : memref<96xf32, #tpu.memory_space<smem>>
    %286 = vector.broadcast %285 : f32 to vector<8x128xf32>
    %287 = arith.mulf %286, %280 : vector<8x128xf32>
    %288 = arith.addf %249, %287 : vector<8x128xf32>
    %c20_64 = arith.constant 20 : index
    %289 = memref.load %arg4[%c20_64] : memref<96xf32, #tpu.memory_space<smem>>
    %290 = vector.broadcast %289 : f32 to vector<8x128xf32>
    %291 = arith.mulf %290, %280 : vector<8x128xf32>
    %292 = arith.addf %253, %291 : vector<8x128xf32>
    %c21 = arith.constant 21 : index
    %293 = memref.load %arg2[%c21] : memref<96xf32, #tpu.memory_space<smem>>
    %294 = vector.broadcast %293 : f32 to vector<8x128xf32>
    %295 = arith.mulf %294, %20 : vector<8x128xf32>
    %c22 = arith.constant 22 : index
    %296 = memref.load %arg2[%c22] : memref<96xf32, #tpu.memory_space<smem>>
    %297 = vector.broadcast %296 : f32 to vector<8x128xf32>
    %298 = arith.mulf %297, %0 : vector<8x128xf32>
    %299 = arith.addf %295, %298 : vector<8x128xf32>
    %c23 = arith.constant 23 : index
    %300 = memref.load %arg2[%c23] : memref<96xf32, #tpu.memory_space<smem>>
    %301 = vector.broadcast %300 : f32 to vector<8x128xf32>
    %302 = arith.mulf %301, %22 : vector<8x128xf32>
    %303 = arith.addf %299, %302 : vector<8x128xf32>
    %c7_65 = arith.constant 7 : index
    %304 = memref.load %arg3[%c7_65] : memref<32xf32, #tpu.memory_space<smem>>
    %305 = vector.broadcast %304 : f32 to vector<8x128xf32>
    %306 = arith.addf %303, %305 : vector<8x128xf32>
    %cst_66 = arith.constant 5.000000e-01 : f32
    %307 = vector.broadcast %cst_66 : f32 to vector<8x128xf32>
    %308 = arith.mulf %307, %306 : vector<8x128xf32>
    %309 = arith.mulf %306, %306 : vector<8x128xf32>
    %310 = arith.mulf %309, %306 : vector<8x128xf32>
    %cst_67 = arith.constant 4.471500e-02 : f32
    %311 = vector.broadcast %cst_67 : f32 to vector<8x128xf32>
    %312 = arith.mulf %311, %310 : vector<8x128xf32>
    %313 = arith.addf %306, %312 : vector<8x128xf32>
    %cst_68 = arith.constant 0.797884583 : f32
    %314 = vector.broadcast %cst_68 : f32 to vector<8x128xf32>
    %315 = arith.mulf %314, %313 : vector<8x128xf32>
    %316 = math.tanh %315 : vector<8x128xf32>
    %cst_69 = arith.constant 1.000000e+00 : f32
    %317 = vector.broadcast %cst_69 : f32 to vector<8x128xf32>
    %318 = arith.addf %317, %316 : vector<8x128xf32>
    %319 = arith.mulf %308, %318 : vector<8x128xf32>
    %c21_70 = arith.constant 21 : index
    %320 = memref.load %arg4[%c21_70] : memref<96xf32, #tpu.memory_space<smem>>
    %321 = vector.broadcast %320 : f32 to vector<8x128xf32>
    %322 = arith.mulf %321, %319 : vector<8x128xf32>
    %323 = arith.addf %284, %322 : vector<8x128xf32>
    %c22_71 = arith.constant 22 : index
    %324 = memref.load %arg4[%c22_71] : memref<96xf32, #tpu.memory_space<smem>>
    %325 = vector.broadcast %324 : f32 to vector<8x128xf32>
    %326 = arith.mulf %325, %319 : vector<8x128xf32>
    %327 = arith.addf %288, %326 : vector<8x128xf32>
    %c23_72 = arith.constant 23 : index
    %328 = memref.load %arg4[%c23_72] : memref<96xf32, #tpu.memory_space<smem>>
    %329 = vector.broadcast %328 : f32 to vector<8x128xf32>
    %330 = arith.mulf %329, %319 : vector<8x128xf32>
    %331 = arith.addf %292, %330 : vector<8x128xf32>
    %c24 = arith.constant 24 : index
    %332 = memref.load %arg2[%c24] : memref<96xf32, #tpu.memory_space<smem>>
    %333 = vector.broadcast %332 : f32 to vector<8x128xf32>
    %334 = arith.mulf %333, %20 : vector<8x128xf32>
    %c25 = arith.constant 25 : index
    %335 = memref.load %arg2[%c25] : memref<96xf32, #tpu.memory_space<smem>>
    %336 = vector.broadcast %335 : f32 to vector<8x128xf32>
    %337 = arith.mulf %336, %0 : vector<8x128xf32>
    %338 = arith.addf %334, %337 : vector<8x128xf32>
    %c26 = arith.constant 26 : index
    %339 = memref.load %arg2[%c26] : memref<96xf32, #tpu.memory_space<smem>>
    %340 = vector.broadcast %339 : f32 to vector<8x128xf32>
    %341 = arith.mulf %340, %22 : vector<8x128xf32>
    %342 = arith.addf %338, %341 : vector<8x128xf32>
    %c8_73 = arith.constant 8 : index
    %343 = memref.load %arg3[%c8_73] : memref<32xf32, #tpu.memory_space<smem>>
    %344 = vector.broadcast %343 : f32 to vector<8x128xf32>
    %345 = arith.addf %342, %344 : vector<8x128xf32>
    %cst_74 = arith.constant 5.000000e-01 : f32
    %346 = vector.broadcast %cst_74 : f32 to vector<8x128xf32>
    %347 = arith.mulf %346, %345 : vector<8x128xf32>
    %348 = arith.mulf %345, %345 : vector<8x128xf32>
    %349 = arith.mulf %348, %345 : vector<8x128xf32>
    %cst_75 = arith.constant 4.471500e-02 : f32
    %350 = vector.broadcast %cst_75 : f32 to vector<8x128xf32>
    %351 = arith.mulf %350, %349 : vector<8x128xf32>
    %352 = arith.addf %345, %351 : vector<8x128xf32>
    %cst_76 = arith.constant 0.797884583 : f32
    %353 = vector.broadcast %cst_76 : f32 to vector<8x128xf32>
    %354 = arith.mulf %353, %352 : vector<8x128xf32>
    %355 = math.tanh %354 : vector<8x128xf32>
    %cst_77 = arith.constant 1.000000e+00 : f32
    %356 = vector.broadcast %cst_77 : f32 to vector<8x128xf32>
    %357 = arith.addf %356, %355 : vector<8x128xf32>
    %358 = arith.mulf %347, %357 : vector<8x128xf32>
    %c24_78 = arith.constant 24 : index
    %359 = memref.load %arg4[%c24_78] : memref<96xf32, #tpu.memory_space<smem>>
    %360 = vector.broadcast %359 : f32 to vector<8x128xf32>
    %361 = arith.mulf %360, %358 : vector<8x128xf32>
    %362 = arith.addf %323, %361 : vector<8x128xf32>
    %c25_79 = arith.constant 25 : index
    %363 = memref.load %arg4[%c25_79] : memref<96xf32, #tpu.memory_space<smem>>
    %364 = vector.broadcast %363 : f32 to vector<8x128xf32>
    %365 = arith.mulf %364, %358 : vector<8x128xf32>
    %366 = arith.addf %327, %365 : vector<8x128xf32>
    %c26_80 = arith.constant 26 : index
    %367 = memref.load %arg4[%c26_80] : memref<96xf32, #tpu.memory_space<smem>>
    %368 = vector.broadcast %367 : f32 to vector<8x128xf32>
    %369 = arith.mulf %368, %358 : vector<8x128xf32>
    %370 = arith.addf %331, %369 : vector<8x128xf32>
    %c27 = arith.constant 27 : index
    %371 = memref.load %arg2[%c27] : memref<96xf32, #tpu.memory_space<smem>>
    %372 = vector.broadcast %371 : f32 to vector<8x128xf32>
    %373 = arith.mulf %372, %20 : vector<8x128xf32>
    %c28 = arith.constant 28 : index
    %374 = memref.load %arg2[%c28] : memref<96xf32, #tpu.memory_space<smem>>
    %375 = vector.broadcast %374 : f32 to vector<8x128xf32>
    %376 = arith.mulf %375, %0 : vector<8x128xf32>
    %377 = arith.addf %373, %376 : vector<8x128xf32>
    %c29 = arith.constant 29 : index
    %378 = memref.load %arg2[%c29] : memref<96xf32, #tpu.memory_space<smem>>
    %379 = vector.broadcast %378 : f32 to vector<8x128xf32>
    %380 = arith.mulf %379, %22 : vector<8x128xf32>
    %381 = arith.addf %377, %380 : vector<8x128xf32>
    %c9_81 = arith.constant 9 : index
    %382 = memref.load %arg3[%c9_81] : memref<32xf32, #tpu.memory_space<smem>>
    %383 = vector.broadcast %382 : f32 to vector<8x128xf32>
    %384 = arith.addf %381, %383 : vector<8x128xf32>
    %cst_82 = arith.constant 5.000000e-01 : f32
    %385 = vector.broadcast %cst_82 : f32 to vector<8x128xf32>
    %386 = arith.mulf %385, %384 : vector<8x128xf32>
    %387 = arith.mulf %384, %384 : vector<8x128xf32>
    %388 = arith.mulf %387, %384 : vector<8x128xf32>
    %cst_83 = arith.constant 4.471500e-02 : f32
    %389 = vector.broadcast %cst_83 : f32 to vector<8x128xf32>
    %390 = arith.mulf %389, %388 : vector<8x128xf32>
    %391 = arith.addf %384, %390 : vector<8x128xf32>
    %cst_84 = arith.constant 0.797884583 : f32
    %392 = vector.broadcast %cst_84 : f32 to vector<8x128xf32>
    %393 = arith.mulf %392, %391 : vector<8x128xf32>
    %394 = math.tanh %393 : vector<8x128xf32>
    %cst_85 = arith.constant 1.000000e+00 : f32
    %395 = vector.broadcast %cst_85 : f32 to vector<8x128xf32>
    %396 = arith.addf %395, %394 : vector<8x128xf32>
    %397 = arith.mulf %386, %396 : vector<8x128xf32>
    %c27_86 = arith.constant 27 : index
    %398 = memref.load %arg4[%c27_86] : memref<96xf32, #tpu.memory_space<smem>>
    %399 = vector.broadcast %398 : f32 to vector<8x128xf32>
    %400 = arith.mulf %399, %397 : vector<8x128xf32>
    %401 = arith.addf %362, %400 : vector<8x128xf32>
    %c28_87 = arith.constant 28 : index
    %402 = memref.load %arg4[%c28_87] : memref<96xf32, #tpu.memory_space<smem>>
    %403 = vector.broadcast %402 : f32 to vector<8x128xf32>
    %404 = arith.mulf %403, %397 : vector<8x128xf32>
    %405 = arith.addf %366, %404 : vector<8x128xf32>
    %c29_88 = arith.constant 29 : index
    %406 = memref.load %arg4[%c29_88] : memref<96xf32, #tpu.memory_space<smem>>
    %407 = vector.broadcast %406 : f32 to vector<8x128xf32>
    %408 = arith.mulf %407, %397 : vector<8x128xf32>
    %409 = arith.addf %370, %408 : vector<8x128xf32>
    %c30 = arith.constant 30 : index
    %410 = memref.load %arg2[%c30] : memref<96xf32, #tpu.memory_space<smem>>
    %411 = vector.broadcast %410 : f32 to vector<8x128xf32>
    %412 = arith.mulf %411, %20 : vector<8x128xf32>
    %c31 = arith.constant 31 : index
    %413 = memref.load %arg2[%c31] : memref<96xf32, #tpu.memory_space<smem>>
    %414 = vector.broadcast %413 : f32 to vector<8x128xf32>
    %415 = arith.mulf %414, %0 : vector<8x128xf32>
    %416 = arith.addf %412, %415 : vector<8x128xf32>
    %c32 = arith.constant 32 : index
    %417 = memref.load %arg2[%c32] : memref<96xf32, #tpu.memory_space<smem>>
    %418 = vector.broadcast %417 : f32 to vector<8x128xf32>
    %419 = arith.mulf %418, %22 : vector<8x128xf32>
    %420 = arith.addf %416, %419 : vector<8x128xf32>
    %c10_89 = arith.constant 10 : index
    %421 = memref.load %arg3[%c10_89] : memref<32xf32, #tpu.memory_space<smem>>
    %422 = vector.broadcast %421 : f32 to vector<8x128xf32>
    %423 = arith.addf %420, %422 : vector<8x128xf32>
    %cst_90 = arith.constant 5.000000e-01 : f32
    %424 = vector.broadcast %cst_90 : f32 to vector<8x128xf32>
    %425 = arith.mulf %424, %423 : vector<8x128xf32>
    %426 = arith.mulf %423, %423 : vector<8x128xf32>
    %427 = arith.mulf %426, %423 : vector<8x128xf32>
    %cst_91 = arith.constant 4.471500e-02 : f32
    %428 = vector.broadcast %cst_91 : f32 to vector<8x128xf32>
    %429 = arith.mulf %428, %427 : vector<8x128xf32>
    %430 = arith.addf %423, %429 : vector<8x128xf32>
    %cst_92 = arith.constant 0.797884583 : f32
    %431 = vector.broadcast %cst_92 : f32 to vector<8x128xf32>
    %432 = arith.mulf %431, %430 : vector<8x128xf32>
    %433 = math.tanh %432 : vector<8x128xf32>
    %cst_93 = arith.constant 1.000000e+00 : f32
    %434 = vector.broadcast %cst_93 : f32 to vector<8x128xf32>
    %435 = arith.addf %434, %433 : vector<8x128xf32>
    %436 = arith.mulf %425, %435 : vector<8x128xf32>
    %c30_94 = arith.constant 30 : index
    %437 = memref.load %arg4[%c30_94] : memref<96xf32, #tpu.memory_space<smem>>
    %438 = vector.broadcast %437 : f32 to vector<8x128xf32>
    %439 = arith.mulf %438, %436 : vector<8x128xf32>
    %440 = arith.addf %401, %439 : vector<8x128xf32>
    %c31_95 = arith.constant 31 : index
    %441 = memref.load %arg4[%c31_95] : memref<96xf32, #tpu.memory_space<smem>>
    %442 = vector.broadcast %441 : f32 to vector<8x128xf32>
    %443 = arith.mulf %442, %436 : vector<8x128xf32>
    %444 = arith.addf %405, %443 : vector<8x128xf32>
    %c32_96 = arith.constant 32 : index
    %445 = memref.load %arg4[%c32_96] : memref<96xf32, #tpu.memory_space<smem>>
    %446 = vector.broadcast %445 : f32 to vector<8x128xf32>
    %447 = arith.mulf %446, %436 : vector<8x128xf32>
    %448 = arith.addf %409, %447 : vector<8x128xf32>
    %c33 = arith.constant 33 : index
    %449 = memref.load %arg2[%c33] : memref<96xf32, #tpu.memory_space<smem>>
    %450 = vector.broadcast %449 : f32 to vector<8x128xf32>
    %451 = arith.mulf %450, %20 : vector<8x128xf32>
    %c34 = arith.constant 34 : index
    %452 = memref.load %arg2[%c34] : memref<96xf32, #tpu.memory_space<smem>>
    %453 = vector.broadcast %452 : f32 to vector<8x128xf32>
    %454 = arith.mulf %453, %0 : vector<8x128xf32>
    %455 = arith.addf %451, %454 : vector<8x128xf32>
    %c35 = arith.constant 35 : index
    %456 = memref.load %arg2[%c35] : memref<96xf32, #tpu.memory_space<smem>>
    %457 = vector.broadcast %456 : f32 to vector<8x128xf32>
    %458 = arith.mulf %457, %22 : vector<8x128xf32>
    %459 = arith.addf %455, %458 : vector<8x128xf32>
    %c11_97 = arith.constant 11 : index
    %460 = memref.load %arg3[%c11_97] : memref<32xf32, #tpu.memory_space<smem>>
    %461 = vector.broadcast %460 : f32 to vector<8x128xf32>
    %462 = arith.addf %459, %461 : vector<8x128xf32>
    %cst_98 = arith.constant 5.000000e-01 : f32
    %463 = vector.broadcast %cst_98 : f32 to vector<8x128xf32>
    %464 = arith.mulf %463, %462 : vector<8x128xf32>
    %465 = arith.mulf %462, %462 : vector<8x128xf32>
    %466 = arith.mulf %465, %462 : vector<8x128xf32>
    %cst_99 = arith.constant 4.471500e-02 : f32
    %467 = vector.broadcast %cst_99 : f32 to vector<8x128xf32>
    %468 = arith.mulf %467, %466 : vector<8x128xf32>
    %469 = arith.addf %462, %468 : vector<8x128xf32>
    %cst_100 = arith.constant 0.797884583 : f32
    %470 = vector.broadcast %cst_100 : f32 to vector<8x128xf32>
    %471 = arith.mulf %470, %469 : vector<8x128xf32>
    %472 = math.tanh %471 : vector<8x128xf32>
    %cst_101 = arith.constant 1.000000e+00 : f32
    %473 = vector.broadcast %cst_101 : f32 to vector<8x128xf32>
    %474 = arith.addf %473, %472 : vector<8x128xf32>
    %475 = arith.mulf %464, %474 : vector<8x128xf32>
    %c33_102 = arith.constant 33 : index
    %476 = memref.load %arg4[%c33_102] : memref<96xf32, #tpu.memory_space<smem>>
    %477 = vector.broadcast %476 : f32 to vector<8x128xf32>
    %478 = arith.mulf %477, %475 : vector<8x128xf32>
    %479 = arith.addf %440, %478 : vector<8x128xf32>
    %c34_103 = arith.constant 34 : index
    %480 = memref.load %arg4[%c34_103] : memref<96xf32, #tpu.memory_space<smem>>
    %481 = vector.broadcast %480 : f32 to vector<8x128xf32>
    %482 = arith.mulf %481, %475 : vector<8x128xf32>
    %483 = arith.addf %444, %482 : vector<8x128xf32>
    %c35_104 = arith.constant 35 : index
    %484 = memref.load %arg4[%c35_104] : memref<96xf32, #tpu.memory_space<smem>>
    %485 = vector.broadcast %484 : f32 to vector<8x128xf32>
    %486 = arith.mulf %485, %475 : vector<8x128xf32>
    %487 = arith.addf %448, %486 : vector<8x128xf32>
    %c36 = arith.constant 36 : index
    %488 = memref.load %arg2[%c36] : memref<96xf32, #tpu.memory_space<smem>>
    %489 = vector.broadcast %488 : f32 to vector<8x128xf32>
    %490 = arith.mulf %489, %20 : vector<8x128xf32>
    %c37 = arith.constant 37 : index
    %491 = memref.load %arg2[%c37] : memref<96xf32, #tpu.memory_space<smem>>
    %492 = vector.broadcast %491 : f32 to vector<8x128xf32>
    %493 = arith.mulf %492, %0 : vector<8x128xf32>
    %494 = arith.addf %490, %493 : vector<8x128xf32>
    %c38 = arith.constant 38 : index
    %495 = memref.load %arg2[%c38] : memref<96xf32, #tpu.memory_space<smem>>
    %496 = vector.broadcast %495 : f32 to vector<8x128xf32>
    %497 = arith.mulf %496, %22 : vector<8x128xf32>
    %498 = arith.addf %494, %497 : vector<8x128xf32>
    %c12_105 = arith.constant 12 : index
    %499 = memref.load %arg3[%c12_105] : memref<32xf32, #tpu.memory_space<smem>>
    %500 = vector.broadcast %499 : f32 to vector<8x128xf32>
    %501 = arith.addf %498, %500 : vector<8x128xf32>
    %cst_106 = arith.constant 5.000000e-01 : f32
    %502 = vector.broadcast %cst_106 : f32 to vector<8x128xf32>
    %503 = arith.mulf %502, %501 : vector<8x128xf32>
    %504 = arith.mulf %501, %501 : vector<8x128xf32>
    %505 = arith.mulf %504, %501 : vector<8x128xf32>
    %cst_107 = arith.constant 4.471500e-02 : f32
    %506 = vector.broadcast %cst_107 : f32 to vector<8x128xf32>
    %507 = arith.mulf %506, %505 : vector<8x128xf32>
    %508 = arith.addf %501, %507 : vector<8x128xf32>
    %cst_108 = arith.constant 0.797884583 : f32
    %509 = vector.broadcast %cst_108 : f32 to vector<8x128xf32>
    %510 = arith.mulf %509, %508 : vector<8x128xf32>
    %511 = math.tanh %510 : vector<8x128xf32>
    %cst_109 = arith.constant 1.000000e+00 : f32
    %512 = vector.broadcast %cst_109 : f32 to vector<8x128xf32>
    %513 = arith.addf %512, %511 : vector<8x128xf32>
    %514 = arith.mulf %503, %513 : vector<8x128xf32>
    %c36_110 = arith.constant 36 : index
    %515 = memref.load %arg4[%c36_110] : memref<96xf32, #tpu.memory_space<smem>>
    %516 = vector.broadcast %515 : f32 to vector<8x128xf32>
    %517 = arith.mulf %516, %514 : vector<8x128xf32>
    %518 = arith.addf %479, %517 : vector<8x128xf32>
    %c37_111 = arith.constant 37 : index
    %519 = memref.load %arg4[%c37_111] : memref<96xf32, #tpu.memory_space<smem>>
    %520 = vector.broadcast %519 : f32 to vector<8x128xf32>
    %521 = arith.mulf %520, %514 : vector<8x128xf32>
    %522 = arith.addf %483, %521 : vector<8x128xf32>
    %c38_112 = arith.constant 38 : index
    %523 = memref.load %arg4[%c38_112] : memref<96xf32, #tpu.memory_space<smem>>
    %524 = vector.broadcast %523 : f32 to vector<8x128xf32>
    %525 = arith.mulf %524, %514 : vector<8x128xf32>
    %526 = arith.addf %487, %525 : vector<8x128xf32>
    %c39 = arith.constant 39 : index
    %527 = memref.load %arg2[%c39] : memref<96xf32, #tpu.memory_space<smem>>
    %528 = vector.broadcast %527 : f32 to vector<8x128xf32>
    %529 = arith.mulf %528, %20 : vector<8x128xf32>
    %c40 = arith.constant 40 : index
    %530 = memref.load %arg2[%c40] : memref<96xf32, #tpu.memory_space<smem>>
    %531 = vector.broadcast %530 : f32 to vector<8x128xf32>
    %532 = arith.mulf %531, %0 : vector<8x128xf32>
    %533 = arith.addf %529, %532 : vector<8x128xf32>
    %c41 = arith.constant 41 : index
    %534 = memref.load %arg2[%c41] : memref<96xf32, #tpu.memory_space<smem>>
    %535 = vector.broadcast %534 : f32 to vector<8x128xf32>
    %536 = arith.mulf %535, %22 : vector<8x128xf32>
    %537 = arith.addf %533, %536 : vector<8x128xf32>
    %c13_113 = arith.constant 13 : index
    %538 = memref.load %arg3[%c13_113] : memref<32xf32, #tpu.memory_space<smem>>
    %539 = vector.broadcast %538 : f32 to vector<8x128xf32>
    %540 = arith.addf %537, %539 : vector<8x128xf32>
    %cst_114 = arith.constant 5.000000e-01 : f32
    %541 = vector.broadcast %cst_114 : f32 to vector<8x128xf32>
    %542 = arith.mulf %541, %540 : vector<8x128xf32>
    %543 = arith.mulf %540, %540 : vector<8x128xf32>
    %544 = arith.mulf %543, %540 : vector<8x128xf32>
    %cst_115 = arith.constant 4.471500e-02 : f32
    %545 = vector.broadcast %cst_115 : f32 to vector<8x128xf32>
    %546 = arith.mulf %545, %544 : vector<8x128xf32>
    %547 = arith.addf %540, %546 : vector<8x128xf32>
    %cst_116 = arith.constant 0.797884583 : f32
    %548 = vector.broadcast %cst_116 : f32 to vector<8x128xf32>
    %549 = arith.mulf %548, %547 : vector<8x128xf32>
    %550 = math.tanh %549 : vector<8x128xf32>
    %cst_117 = arith.constant 1.000000e+00 : f32
    %551 = vector.broadcast %cst_117 : f32 to vector<8x128xf32>
    %552 = arith.addf %551, %550 : vector<8x128xf32>
    %553 = arith.mulf %542, %552 : vector<8x128xf32>
    %c39_118 = arith.constant 39 : index
    %554 = memref.load %arg4[%c39_118] : memref<96xf32, #tpu.memory_space<smem>>
    %555 = vector.broadcast %554 : f32 to vector<8x128xf32>
    %556 = arith.mulf %555, %553 : vector<8x128xf32>
    %557 = arith.addf %518, %556 : vector<8x128xf32>
    %c40_119 = arith.constant 40 : index
    %558 = memref.load %arg4[%c40_119] : memref<96xf32, #tpu.memory_space<smem>>
    %559 = vector.broadcast %558 : f32 to vector<8x128xf32>
    %560 = arith.mulf %559, %553 : vector<8x128xf32>
    %561 = arith.addf %522, %560 : vector<8x128xf32>
    %c41_120 = arith.constant 41 : index
    %562 = memref.load %arg4[%c41_120] : memref<96xf32, #tpu.memory_space<smem>>
    %563 = vector.broadcast %562 : f32 to vector<8x128xf32>
    %564 = arith.mulf %563, %553 : vector<8x128xf32>
    %565 = arith.addf %526, %564 : vector<8x128xf32>
    %c42 = arith.constant 42 : index
    %566 = memref.load %arg2[%c42] : memref<96xf32, #tpu.memory_space<smem>>
    %567 = vector.broadcast %566 : f32 to vector<8x128xf32>
    %568 = arith.mulf %567, %20 : vector<8x128xf32>
    %c43 = arith.constant 43 : index
    %569 = memref.load %arg2[%c43] : memref<96xf32, #tpu.memory_space<smem>>
    %570 = vector.broadcast %569 : f32 to vector<8x128xf32>
    %571 = arith.mulf %570, %0 : vector<8x128xf32>
    %572 = arith.addf %568, %571 : vector<8x128xf32>
    %c44 = arith.constant 44 : index
    %573 = memref.load %arg2[%c44] : memref<96xf32, #tpu.memory_space<smem>>
    %574 = vector.broadcast %573 : f32 to vector<8x128xf32>
    %575 = arith.mulf %574, %22 : vector<8x128xf32>
    %576 = arith.addf %572, %575 : vector<8x128xf32>
    %c14_121 = arith.constant 14 : index
    %577 = memref.load %arg3[%c14_121] : memref<32xf32, #tpu.memory_space<smem>>
    %578 = vector.broadcast %577 : f32 to vector<8x128xf32>
    %579 = arith.addf %576, %578 : vector<8x128xf32>
    %cst_122 = arith.constant 5.000000e-01 : f32
    %580 = vector.broadcast %cst_122 : f32 to vector<8x128xf32>
    %581 = arith.mulf %580, %579 : vector<8x128xf32>
    %582 = arith.mulf %579, %579 : vector<8x128xf32>
    %583 = arith.mulf %582, %579 : vector<8x128xf32>
    %cst_123 = arith.constant 4.471500e-02 : f32
    %584 = vector.broadcast %cst_123 : f32 to vector<8x128xf32>
    %585 = arith.mulf %584, %583 : vector<8x128xf32>
    %586 = arith.addf %579, %585 : vector<8x128xf32>
    %cst_124 = arith.constant 0.797884583 : f32
    %587 = vector.broadcast %cst_124 : f32 to vector<8x128xf32>
    %588 = arith.mulf %587, %586 : vector<8x128xf32>
    %589 = math.tanh %588 : vector<8x128xf32>
    %cst_125 = arith.constant 1.000000e+00 : f32
    %590 = vector.broadcast %cst_125 : f32 to vector<8x128xf32>
    %591 = arith.addf %590, %589 : vector<8x128xf32>
    %592 = arith.mulf %581, %591 : vector<8x128xf32>
    %c42_126 = arith.constant 42 : index
    %593 = memref.load %arg4[%c42_126] : memref<96xf32, #tpu.memory_space<smem>>
    %594 = vector.broadcast %593 : f32 to vector<8x128xf32>
    %595 = arith.mulf %594, %592 : vector<8x128xf32>
    %596 = arith.addf %557, %595 : vector<8x128xf32>
    %c43_127 = arith.constant 43 : index
    %597 = memref.load %arg4[%c43_127] : memref<96xf32, #tpu.memory_space<smem>>
    %598 = vector.broadcast %597 : f32 to vector<8x128xf32>
    %599 = arith.mulf %598, %592 : vector<8x128xf32>
    %600 = arith.addf %561, %599 : vector<8x128xf32>
    %c44_128 = arith.constant 44 : index
    %601 = memref.load %arg4[%c44_128] : memref<96xf32, #tpu.memory_space<smem>>
    %602 = vector.broadcast %601 : f32 to vector<8x128xf32>
    %603 = arith.mulf %602, %592 : vector<8x128xf32>
    %604 = arith.addf %565, %603 : vector<8x128xf32>
    %c45 = arith.constant 45 : index
    %605 = memref.load %arg2[%c45] : memref<96xf32, #tpu.memory_space<smem>>
    %606 = vector.broadcast %605 : f32 to vector<8x128xf32>
    %607 = arith.mulf %606, %20 : vector<8x128xf32>
    %c46 = arith.constant 46 : index
    %608 = memref.load %arg2[%c46] : memref<96xf32, #tpu.memory_space<smem>>
    %609 = vector.broadcast %608 : f32 to vector<8x128xf32>
    %610 = arith.mulf %609, %0 : vector<8x128xf32>
    %611 = arith.addf %607, %610 : vector<8x128xf32>
    %c47 = arith.constant 47 : index
    %612 = memref.load %arg2[%c47] : memref<96xf32, #tpu.memory_space<smem>>
    %613 = vector.broadcast %612 : f32 to vector<8x128xf32>
    %614 = arith.mulf %613, %22 : vector<8x128xf32>
    %615 = arith.addf %611, %614 : vector<8x128xf32>
    %c15_129 = arith.constant 15 : index
    %616 = memref.load %arg3[%c15_129] : memref<32xf32, #tpu.memory_space<smem>>
    %617 = vector.broadcast %616 : f32 to vector<8x128xf32>
    %618 = arith.addf %615, %617 : vector<8x128xf32>
    %cst_130 = arith.constant 5.000000e-01 : f32
    %619 = vector.broadcast %cst_130 : f32 to vector<8x128xf32>
    %620 = arith.mulf %619, %618 : vector<8x128xf32>
    %621 = arith.mulf %618, %618 : vector<8x128xf32>
    %622 = arith.mulf %621, %618 : vector<8x128xf32>
    %cst_131 = arith.constant 4.471500e-02 : f32
    %623 = vector.broadcast %cst_131 : f32 to vector<8x128xf32>
    %624 = arith.mulf %623, %622 : vector<8x128xf32>
    %625 = arith.addf %618, %624 : vector<8x128xf32>
    %cst_132 = arith.constant 0.797884583 : f32
    %626 = vector.broadcast %cst_132 : f32 to vector<8x128xf32>
    %627 = arith.mulf %626, %625 : vector<8x128xf32>
    %628 = math.tanh %627 : vector<8x128xf32>
    %cst_133 = arith.constant 1.000000e+00 : f32
    %629 = vector.broadcast %cst_133 : f32 to vector<8x128xf32>
    %630 = arith.addf %629, %628 : vector<8x128xf32>
    %631 = arith.mulf %620, %630 : vector<8x128xf32>
    %c45_134 = arith.constant 45 : index
    %632 = memref.load %arg4[%c45_134] : memref<96xf32, #tpu.memory_space<smem>>
    %633 = vector.broadcast %632 : f32 to vector<8x128xf32>
    %634 = arith.mulf %633, %631 : vector<8x128xf32>
    %635 = arith.addf %596, %634 : vector<8x128xf32>
    %c46_135 = arith.constant 46 : index
    %636 = memref.load %arg4[%c46_135] : memref<96xf32, #tpu.memory_space<smem>>
    %637 = vector.broadcast %636 : f32 to vector<8x128xf32>
    %638 = arith.mulf %637, %631 : vector<8x128xf32>
    %639 = arith.addf %600, %638 : vector<8x128xf32>
    %c47_136 = arith.constant 47 : index
    %640 = memref.load %arg4[%c47_136] : memref<96xf32, #tpu.memory_space<smem>>
    %641 = vector.broadcast %640 : f32 to vector<8x128xf32>
    %642 = arith.mulf %641, %631 : vector<8x128xf32>
    %643 = arith.addf %604, %642 : vector<8x128xf32>
    %c48 = arith.constant 48 : index
    %644 = memref.load %arg2[%c48] : memref<96xf32, #tpu.memory_space<smem>>
    %645 = vector.broadcast %644 : f32 to vector<8x128xf32>
    %646 = arith.mulf %645, %20 : vector<8x128xf32>
    %c49 = arith.constant 49 : index
    %647 = memref.load %arg2[%c49] : memref<96xf32, #tpu.memory_space<smem>>
    %648 = vector.broadcast %647 : f32 to vector<8x128xf32>
    %649 = arith.mulf %648, %0 : vector<8x128xf32>
    %650 = arith.addf %646, %649 : vector<8x128xf32>
    %c50 = arith.constant 50 : index
    %651 = memref.load %arg2[%c50] : memref<96xf32, #tpu.memory_space<smem>>
    %652 = vector.broadcast %651 : f32 to vector<8x128xf32>
    %653 = arith.mulf %652, %22 : vector<8x128xf32>
    %654 = arith.addf %650, %653 : vector<8x128xf32>
    %c16_137 = arith.constant 16 : index
    %655 = memref.load %arg3[%c16_137] : memref<32xf32, #tpu.memory_space<smem>>
    %656 = vector.broadcast %655 : f32 to vector<8x128xf32>
    %657 = arith.addf %654, %656 : vector<8x128xf32>
    %cst_138 = arith.constant 5.000000e-01 : f32
    %658 = vector.broadcast %cst_138 : f32 to vector<8x128xf32>
    %659 = arith.mulf %658, %657 : vector<8x128xf32>
    %660 = arith.mulf %657, %657 : vector<8x128xf32>
    %661 = arith.mulf %660, %657 : vector<8x128xf32>
    %cst_139 = arith.constant 4.471500e-02 : f32
    %662 = vector.broadcast %cst_139 : f32 to vector<8x128xf32>
    %663 = arith.mulf %662, %661 : vector<8x128xf32>
    %664 = arith.addf %657, %663 : vector<8x128xf32>
    %cst_140 = arith.constant 0.797884583 : f32
    %665 = vector.broadcast %cst_140 : f32 to vector<8x128xf32>
    %666 = arith.mulf %665, %664 : vector<8x128xf32>
    %667 = math.tanh %666 : vector<8x128xf32>
    %cst_141 = arith.constant 1.000000e+00 : f32
    %668 = vector.broadcast %cst_141 : f32 to vector<8x128xf32>
    %669 = arith.addf %668, %667 : vector<8x128xf32>
    %670 = arith.mulf %659, %669 : vector<8x128xf32>
    %c48_142 = arith.constant 48 : index
    %671 = memref.load %arg4[%c48_142] : memref<96xf32, #tpu.memory_space<smem>>
    %672 = vector.broadcast %671 : f32 to vector<8x128xf32>
    %673 = arith.mulf %672, %670 : vector<8x128xf32>
    %674 = arith.addf %635, %673 : vector<8x128xf32>
    %c49_143 = arith.constant 49 : index
    %675 = memref.load %arg4[%c49_143] : memref<96xf32, #tpu.memory_space<smem>>
    %676 = vector.broadcast %675 : f32 to vector<8x128xf32>
    %677 = arith.mulf %676, %670 : vector<8x128xf32>
    %678 = arith.addf %639, %677 : vector<8x128xf32>
    %c50_144 = arith.constant 50 : index
    %679 = memref.load %arg4[%c50_144] : memref<96xf32, #tpu.memory_space<smem>>
    %680 = vector.broadcast %679 : f32 to vector<8x128xf32>
    %681 = arith.mulf %680, %670 : vector<8x128xf32>
    %682 = arith.addf %643, %681 : vector<8x128xf32>
    %c51 = arith.constant 51 : index
    %683 = memref.load %arg2[%c51] : memref<96xf32, #tpu.memory_space<smem>>
    %684 = vector.broadcast %683 : f32 to vector<8x128xf32>
    %685 = arith.mulf %684, %20 : vector<8x128xf32>
    %c52 = arith.constant 52 : index
    %686 = memref.load %arg2[%c52] : memref<96xf32, #tpu.memory_space<smem>>
    %687 = vector.broadcast %686 : f32 to vector<8x128xf32>
    %688 = arith.mulf %687, %0 : vector<8x128xf32>
    %689 = arith.addf %685, %688 : vector<8x128xf32>
    %c53 = arith.constant 53 : index
    %690 = memref.load %arg2[%c53] : memref<96xf32, #tpu.memory_space<smem>>
    %691 = vector.broadcast %690 : f32 to vector<8x128xf32>
    %692 = arith.mulf %691, %22 : vector<8x128xf32>
    %693 = arith.addf %689, %692 : vector<8x128xf32>
    %c17_145 = arith.constant 17 : index
    %694 = memref.load %arg3[%c17_145] : memref<32xf32, #tpu.memory_space<smem>>
    %695 = vector.broadcast %694 : f32 to vector<8x128xf32>
    %696 = arith.addf %693, %695 : vector<8x128xf32>
    %cst_146 = arith.constant 5.000000e-01 : f32
    %697 = vector.broadcast %cst_146 : f32 to vector<8x128xf32>
    %698 = arith.mulf %697, %696 : vector<8x128xf32>
    %699 = arith.mulf %696, %696 : vector<8x128xf32>
    %700 = arith.mulf %699, %696 : vector<8x128xf32>
    %cst_147 = arith.constant 4.471500e-02 : f32
    %701 = vector.broadcast %cst_147 : f32 to vector<8x128xf32>
    %702 = arith.mulf %701, %700 : vector<8x128xf32>
    %703 = arith.addf %696, %702 : vector<8x128xf32>
    %cst_148 = arith.constant 0.797884583 : f32
    %704 = vector.broadcast %cst_148 : f32 to vector<8x128xf32>
    %705 = arith.mulf %704, %703 : vector<8x128xf32>
    %706 = math.tanh %705 : vector<8x128xf32>
    %cst_149 = arith.constant 1.000000e+00 : f32
    %707 = vector.broadcast %cst_149 : f32 to vector<8x128xf32>
    %708 = arith.addf %707, %706 : vector<8x128xf32>
    %709 = arith.mulf %698, %708 : vector<8x128xf32>
    %c51_150 = arith.constant 51 : index
    %710 = memref.load %arg4[%c51_150] : memref<96xf32, #tpu.memory_space<smem>>
    %711 = vector.broadcast %710 : f32 to vector<8x128xf32>
    %712 = arith.mulf %711, %709 : vector<8x128xf32>
    %713 = arith.addf %674, %712 : vector<8x128xf32>
    %c52_151 = arith.constant 52 : index
    %714 = memref.load %arg4[%c52_151] : memref<96xf32, #tpu.memory_space<smem>>
    %715 = vector.broadcast %714 : f32 to vector<8x128xf32>
    %716 = arith.mulf %715, %709 : vector<8x128xf32>
    %717 = arith.addf %678, %716 : vector<8x128xf32>
    %c53_152 = arith.constant 53 : index
    %718 = memref.load %arg4[%c53_152] : memref<96xf32, #tpu.memory_space<smem>>
    %719 = vector.broadcast %718 : f32 to vector<8x128xf32>
    %720 = arith.mulf %719, %709 : vector<8x128xf32>
    %721 = arith.addf %682, %720 : vector<8x128xf32>
    %c54 = arith.constant 54 : index
    %722 = memref.load %arg2[%c54] : memref<96xf32, #tpu.memory_space<smem>>
    %723 = vector.broadcast %722 : f32 to vector<8x128xf32>
    %724 = arith.mulf %723, %20 : vector<8x128xf32>
    %c55 = arith.constant 55 : index
    %725 = memref.load %arg2[%c55] : memref<96xf32, #tpu.memory_space<smem>>
    %726 = vector.broadcast %725 : f32 to vector<8x128xf32>
    %727 = arith.mulf %726, %0 : vector<8x128xf32>
    %728 = arith.addf %724, %727 : vector<8x128xf32>
    %c56 = arith.constant 56 : index
    %729 = memref.load %arg2[%c56] : memref<96xf32, #tpu.memory_space<smem>>
    %730 = vector.broadcast %729 : f32 to vector<8x128xf32>
    %731 = arith.mulf %730, %22 : vector<8x128xf32>
    %732 = arith.addf %728, %731 : vector<8x128xf32>
    %c18_153 = arith.constant 18 : index
    %733 = memref.load %arg3[%c18_153] : memref<32xf32, #tpu.memory_space<smem>>
    %734 = vector.broadcast %733 : f32 to vector<8x128xf32>
    %735 = arith.addf %732, %734 : vector<8x128xf32>
    %cst_154 = arith.constant 5.000000e-01 : f32
    %736 = vector.broadcast %cst_154 : f32 to vector<8x128xf32>
    %737 = arith.mulf %736, %735 : vector<8x128xf32>
    %738 = arith.mulf %735, %735 : vector<8x128xf32>
    %739 = arith.mulf %738, %735 : vector<8x128xf32>
    %cst_155 = arith.constant 4.471500e-02 : f32
    %740 = vector.broadcast %cst_155 : f32 to vector<8x128xf32>
    %741 = arith.mulf %740, %739 : vector<8x128xf32>
    %742 = arith.addf %735, %741 : vector<8x128xf32>
    %cst_156 = arith.constant 0.797884583 : f32
    %743 = vector.broadcast %cst_156 : f32 to vector<8x128xf32>
    %744 = arith.mulf %743, %742 : vector<8x128xf32>
    %745 = math.tanh %744 : vector<8x128xf32>
    %cst_157 = arith.constant 1.000000e+00 : f32
    %746 = vector.broadcast %cst_157 : f32 to vector<8x128xf32>
    %747 = arith.addf %746, %745 : vector<8x128xf32>
    %748 = arith.mulf %737, %747 : vector<8x128xf32>
    %c54_158 = arith.constant 54 : index
    %749 = memref.load %arg4[%c54_158] : memref<96xf32, #tpu.memory_space<smem>>
    %750 = vector.broadcast %749 : f32 to vector<8x128xf32>
    %751 = arith.mulf %750, %748 : vector<8x128xf32>
    %752 = arith.addf %713, %751 : vector<8x128xf32>
    %c55_159 = arith.constant 55 : index
    %753 = memref.load %arg4[%c55_159] : memref<96xf32, #tpu.memory_space<smem>>
    %754 = vector.broadcast %753 : f32 to vector<8x128xf32>
    %755 = arith.mulf %754, %748 : vector<8x128xf32>
    %756 = arith.addf %717, %755 : vector<8x128xf32>
    %c56_160 = arith.constant 56 : index
    %757 = memref.load %arg4[%c56_160] : memref<96xf32, #tpu.memory_space<smem>>
    %758 = vector.broadcast %757 : f32 to vector<8x128xf32>
    %759 = arith.mulf %758, %748 : vector<8x128xf32>
    %760 = arith.addf %721, %759 : vector<8x128xf32>
    %c57 = arith.constant 57 : index
    %761 = memref.load %arg2[%c57] : memref<96xf32, #tpu.memory_space<smem>>
    %762 = vector.broadcast %761 : f32 to vector<8x128xf32>
    %763 = arith.mulf %762, %20 : vector<8x128xf32>
    %c58 = arith.constant 58 : index
    %764 = memref.load %arg2[%c58] : memref<96xf32, #tpu.memory_space<smem>>
    %765 = vector.broadcast %764 : f32 to vector<8x128xf32>
    %766 = arith.mulf %765, %0 : vector<8x128xf32>
    %767 = arith.addf %763, %766 : vector<8x128xf32>
    %c59 = arith.constant 59 : index
    %768 = memref.load %arg2[%c59] : memref<96xf32, #tpu.memory_space<smem>>
    %769 = vector.broadcast %768 : f32 to vector<8x128xf32>
    %770 = arith.mulf %769, %22 : vector<8x128xf32>
    %771 = arith.addf %767, %770 : vector<8x128xf32>
    %c19_161 = arith.constant 19 : index
    %772 = memref.load %arg3[%c19_161] : memref<32xf32, #tpu.memory_space<smem>>
    %773 = vector.broadcast %772 : f32 to vector<8x128xf32>
    %774 = arith.addf %771, %773 : vector<8x128xf32>
    %cst_162 = arith.constant 5.000000e-01 : f32
    %775 = vector.broadcast %cst_162 : f32 to vector<8x128xf32>
    %776 = arith.mulf %775, %774 : vector<8x128xf32>
    %777 = arith.mulf %774, %774 : vector<8x128xf32>
    %778 = arith.mulf %777, %774 : vector<8x128xf32>
    %cst_163 = arith.constant 4.471500e-02 : f32
    %779 = vector.broadcast %cst_163 : f32 to vector<8x128xf32>
    %780 = arith.mulf %779, %778 : vector<8x128xf32>
    %781 = arith.addf %774, %780 : vector<8x128xf32>
    %cst_164 = arith.constant 0.797884583 : f32
    %782 = vector.broadcast %cst_164 : f32 to vector<8x128xf32>
    %783 = arith.mulf %782, %781 : vector<8x128xf32>
    %784 = math.tanh %783 : vector<8x128xf32>
    %cst_165 = arith.constant 1.000000e+00 : f32
    %785 = vector.broadcast %cst_165 : f32 to vector<8x128xf32>
    %786 = arith.addf %785, %784 : vector<8x128xf32>
    %787 = arith.mulf %776, %786 : vector<8x128xf32>
    %c57_166 = arith.constant 57 : index
    %788 = memref.load %arg4[%c57_166] : memref<96xf32, #tpu.memory_space<smem>>
    %789 = vector.broadcast %788 : f32 to vector<8x128xf32>
    %790 = arith.mulf %789, %787 : vector<8x128xf32>
    %791 = arith.addf %752, %790 : vector<8x128xf32>
    %c58_167 = arith.constant 58 : index
    %792 = memref.load %arg4[%c58_167] : memref<96xf32, #tpu.memory_space<smem>>
    %793 = vector.broadcast %792 : f32 to vector<8x128xf32>
    %794 = arith.mulf %793, %787 : vector<8x128xf32>
    %795 = arith.addf %756, %794 : vector<8x128xf32>
    %c59_168 = arith.constant 59 : index
    %796 = memref.load %arg4[%c59_168] : memref<96xf32, #tpu.memory_space<smem>>
    %797 = vector.broadcast %796 : f32 to vector<8x128xf32>
    %798 = arith.mulf %797, %787 : vector<8x128xf32>
    %799 = arith.addf %760, %798 : vector<8x128xf32>
    %c60 = arith.constant 60 : index
    %800 = memref.load %arg2[%c60] : memref<96xf32, #tpu.memory_space<smem>>
    %801 = vector.broadcast %800 : f32 to vector<8x128xf32>
    %802 = arith.mulf %801, %20 : vector<8x128xf32>
    %c61 = arith.constant 61 : index
    %803 = memref.load %arg2[%c61] : memref<96xf32, #tpu.memory_space<smem>>
    %804 = vector.broadcast %803 : f32 to vector<8x128xf32>
    %805 = arith.mulf %804, %0 : vector<8x128xf32>
    %806 = arith.addf %802, %805 : vector<8x128xf32>
    %c62 = arith.constant 62 : index
    %807 = memref.load %arg2[%c62] : memref<96xf32, #tpu.memory_space<smem>>
    %808 = vector.broadcast %807 : f32 to vector<8x128xf32>
    %809 = arith.mulf %808, %22 : vector<8x128xf32>
    %810 = arith.addf %806, %809 : vector<8x128xf32>
    %c20_169 = arith.constant 20 : index
    %811 = memref.load %arg3[%c20_169] : memref<32xf32, #tpu.memory_space<smem>>
    %812 = vector.broadcast %811 : f32 to vector<8x128xf32>
    %813 = arith.addf %810, %812 : vector<8x128xf32>
    %cst_170 = arith.constant 5.000000e-01 : f32
    %814 = vector.broadcast %cst_170 : f32 to vector<8x128xf32>
    %815 = arith.mulf %814, %813 : vector<8x128xf32>
    %816 = arith.mulf %813, %813 : vector<8x128xf32>
    %817 = arith.mulf %816, %813 : vector<8x128xf32>
    %cst_171 = arith.constant 4.471500e-02 : f32
    %818 = vector.broadcast %cst_171 : f32 to vector<8x128xf32>
    %819 = arith.mulf %818, %817 : vector<8x128xf32>
    %820 = arith.addf %813, %819 : vector<8x128xf32>
    %cst_172 = arith.constant 0.797884583 : f32
    %821 = vector.broadcast %cst_172 : f32 to vector<8x128xf32>
    %822 = arith.mulf %821, %820 : vector<8x128xf32>
    %823 = math.tanh %822 : vector<8x128xf32>
    %cst_173 = arith.constant 1.000000e+00 : f32
    %824 = vector.broadcast %cst_173 : f32 to vector<8x128xf32>
    %825 = arith.addf %824, %823 : vector<8x128xf32>
    %826 = arith.mulf %815, %825 : vector<8x128xf32>
    %c60_174 = arith.constant 60 : index
    %827 = memref.load %arg4[%c60_174] : memref<96xf32, #tpu.memory_space<smem>>
    %828 = vector.broadcast %827 : f32 to vector<8x128xf32>
    %829 = arith.mulf %828, %826 : vector<8x128xf32>
    %830 = arith.addf %791, %829 : vector<8x128xf32>
    %c61_175 = arith.constant 61 : index
    %831 = memref.load %arg4[%c61_175] : memref<96xf32, #tpu.memory_space<smem>>
    %832 = vector.broadcast %831 : f32 to vector<8x128xf32>
    %833 = arith.mulf %832, %826 : vector<8x128xf32>
    %834 = arith.addf %795, %833 : vector<8x128xf32>
    %c62_176 = arith.constant 62 : index
    %835 = memref.load %arg4[%c62_176] : memref<96xf32, #tpu.memory_space<smem>>
    %836 = vector.broadcast %835 : f32 to vector<8x128xf32>
    %837 = arith.mulf %836, %826 : vector<8x128xf32>
    %838 = arith.addf %799, %837 : vector<8x128xf32>
    %c63 = arith.constant 63 : index
    %839 = memref.load %arg2[%c63] : memref<96xf32, #tpu.memory_space<smem>>
    %840 = vector.broadcast %839 : f32 to vector<8x128xf32>
    %841 = arith.mulf %840, %20 : vector<8x128xf32>
    %c64 = arith.constant 64 : index
    %842 = memref.load %arg2[%c64] : memref<96xf32, #tpu.memory_space<smem>>
    %843 = vector.broadcast %842 : f32 to vector<8x128xf32>
    %844 = arith.mulf %843, %0 : vector<8x128xf32>
    %845 = arith.addf %841, %844 : vector<8x128xf32>
    %c65 = arith.constant 65 : index
    %846 = memref.load %arg2[%c65] : memref<96xf32, #tpu.memory_space<smem>>
    %847 = vector.broadcast %846 : f32 to vector<8x128xf32>
    %848 = arith.mulf %847, %22 : vector<8x128xf32>
    %849 = arith.addf %845, %848 : vector<8x128xf32>
    %c21_177 = arith.constant 21 : index
    %850 = memref.load %arg3[%c21_177] : memref<32xf32, #tpu.memory_space<smem>>
    %851 = vector.broadcast %850 : f32 to vector<8x128xf32>
    %852 = arith.addf %849, %851 : vector<8x128xf32>
    %cst_178 = arith.constant 5.000000e-01 : f32
    %853 = vector.broadcast %cst_178 : f32 to vector<8x128xf32>
    %854 = arith.mulf %853, %852 : vector<8x128xf32>
    %855 = arith.mulf %852, %852 : vector<8x128xf32>
    %856 = arith.mulf %855, %852 : vector<8x128xf32>
    %cst_179 = arith.constant 4.471500e-02 : f32
    %857 = vector.broadcast %cst_179 : f32 to vector<8x128xf32>
    %858 = arith.mulf %857, %856 : vector<8x128xf32>
    %859 = arith.addf %852, %858 : vector<8x128xf32>
    %cst_180 = arith.constant 0.797884583 : f32
    %860 = vector.broadcast %cst_180 : f32 to vector<8x128xf32>
    %861 = arith.mulf %860, %859 : vector<8x128xf32>
    %862 = math.tanh %861 : vector<8x128xf32>
    %cst_181 = arith.constant 1.000000e+00 : f32
    %863 = vector.broadcast %cst_181 : f32 to vector<8x128xf32>
    %864 = arith.addf %863, %862 : vector<8x128xf32>
    %865 = arith.mulf %854, %864 : vector<8x128xf32>
    %c63_182 = arith.constant 63 : index
    %866 = memref.load %arg4[%c63_182] : memref<96xf32, #tpu.memory_space<smem>>
    %867 = vector.broadcast %866 : f32 to vector<8x128xf32>
    %868 = arith.mulf %867, %865 : vector<8x128xf32>
    %869 = arith.addf %830, %868 : vector<8x128xf32>
    %c64_183 = arith.constant 64 : index
    %870 = memref.load %arg4[%c64_183] : memref<96xf32, #tpu.memory_space<smem>>
    %871 = vector.broadcast %870 : f32 to vector<8x128xf32>
    %872 = arith.mulf %871, %865 : vector<8x128xf32>
    %873 = arith.addf %834, %872 : vector<8x128xf32>
    %c65_184 = arith.constant 65 : index
    %874 = memref.load %arg4[%c65_184] : memref<96xf32, #tpu.memory_space<smem>>
    %875 = vector.broadcast %874 : f32 to vector<8x128xf32>
    %876 = arith.mulf %875, %865 : vector<8x128xf32>
    %877 = arith.addf %838, %876 : vector<8x128xf32>
    %c66 = arith.constant 66 : index
    %878 = memref.load %arg2[%c66] : memref<96xf32, #tpu.memory_space<smem>>
    %879 = vector.broadcast %878 : f32 to vector<8x128xf32>
    %880 = arith.mulf %879, %20 : vector<8x128xf32>
    %c67 = arith.constant 67 : index
    %881 = memref.load %arg2[%c67] : memref<96xf32, #tpu.memory_space<smem>>
    %882 = vector.broadcast %881 : f32 to vector<8x128xf32>
    %883 = arith.mulf %882, %0 : vector<8x128xf32>
    %884 = arith.addf %880, %883 : vector<8x128xf32>
    %c68 = arith.constant 68 : index
    %885 = memref.load %arg2[%c68] : memref<96xf32, #tpu.memory_space<smem>>
    %886 = vector.broadcast %885 : f32 to vector<8x128xf32>
    %887 = arith.mulf %886, %22 : vector<8x128xf32>
    %888 = arith.addf %884, %887 : vector<8x128xf32>
    %c22_185 = arith.constant 22 : index
    %889 = memref.load %arg3[%c22_185] : memref<32xf32, #tpu.memory_space<smem>>
    %890 = vector.broadcast %889 : f32 to vector<8x128xf32>
    %891 = arith.addf %888, %890 : vector<8x128xf32>
    %cst_186 = arith.constant 5.000000e-01 : f32
    %892 = vector.broadcast %cst_186 : f32 to vector<8x128xf32>
    %893 = arith.mulf %892, %891 : vector<8x128xf32>
    %894 = arith.mulf %891, %891 : vector<8x128xf32>
    %895 = arith.mulf %894, %891 : vector<8x128xf32>
    %cst_187 = arith.constant 4.471500e-02 : f32
    %896 = vector.broadcast %cst_187 : f32 to vector<8x128xf32>
    %897 = arith.mulf %896, %895 : vector<8x128xf32>
    %898 = arith.addf %891, %897 : vector<8x128xf32>
    %cst_188 = arith.constant 0.797884583 : f32
    %899 = vector.broadcast %cst_188 : f32 to vector<8x128xf32>
    %900 = arith.mulf %899, %898 : vector<8x128xf32>
    %901 = math.tanh %900 : vector<8x128xf32>
    %cst_189 = arith.constant 1.000000e+00 : f32
    %902 = vector.broadcast %cst_189 : f32 to vector<8x128xf32>
    %903 = arith.addf %902, %901 : vector<8x128xf32>
    %904 = arith.mulf %893, %903 : vector<8x128xf32>
    %c66_190 = arith.constant 66 : index
    %905 = memref.load %arg4[%c66_190] : memref<96xf32, #tpu.memory_space<smem>>
    %906 = vector.broadcast %905 : f32 to vector<8x128xf32>
    %907 = arith.mulf %906, %904 : vector<8x128xf32>
    %908 = arith.addf %869, %907 : vector<8x128xf32>
    %c67_191 = arith.constant 67 : index
    %909 = memref.load %arg4[%c67_191] : memref<96xf32, #tpu.memory_space<smem>>
    %910 = vector.broadcast %909 : f32 to vector<8x128xf32>
    %911 = arith.mulf %910, %904 : vector<8x128xf32>
    %912 = arith.addf %873, %911 : vector<8x128xf32>
    %c68_192 = arith.constant 68 : index
    %913 = memref.load %arg4[%c68_192] : memref<96xf32, #tpu.memory_space<smem>>
    %914 = vector.broadcast %913 : f32 to vector<8x128xf32>
    %915 = arith.mulf %914, %904 : vector<8x128xf32>
    %916 = arith.addf %877, %915 : vector<8x128xf32>
    %c69 = arith.constant 69 : index
    %917 = memref.load %arg2[%c69] : memref<96xf32, #tpu.memory_space<smem>>
    %918 = vector.broadcast %917 : f32 to vector<8x128xf32>
    %919 = arith.mulf %918, %20 : vector<8x128xf32>
    %c70 = arith.constant 70 : index
    %920 = memref.load %arg2[%c70] : memref<96xf32, #tpu.memory_space<smem>>
    %921 = vector.broadcast %920 : f32 to vector<8x128xf32>
    %922 = arith.mulf %921, %0 : vector<8x128xf32>
    %923 = arith.addf %919, %922 : vector<8x128xf32>
    %c71 = arith.constant 71 : index
    %924 = memref.load %arg2[%c71] : memref<96xf32, #tpu.memory_space<smem>>
    %925 = vector.broadcast %924 : f32 to vector<8x128xf32>
    %926 = arith.mulf %925, %22 : vector<8x128xf32>
    %927 = arith.addf %923, %926 : vector<8x128xf32>
    %c23_193 = arith.constant 23 : index
    %928 = memref.load %arg3[%c23_193] : memref<32xf32, #tpu.memory_space<smem>>
    %929 = vector.broadcast %928 : f32 to vector<8x128xf32>
    %930 = arith.addf %927, %929 : vector<8x128xf32>
    %cst_194 = arith.constant 5.000000e-01 : f32
    %931 = vector.broadcast %cst_194 : f32 to vector<8x128xf32>
    %932 = arith.mulf %931, %930 : vector<8x128xf32>
    %933 = arith.mulf %930, %930 : vector<8x128xf32>
    %934 = arith.mulf %933, %930 : vector<8x128xf32>
    %cst_195 = arith.constant 4.471500e-02 : f32
    %935 = vector.broadcast %cst_195 : f32 to vector<8x128xf32>
    %936 = arith.mulf %935, %934 : vector<8x128xf32>
    %937 = arith.addf %930, %936 : vector<8x128xf32>
    %cst_196 = arith.constant 0.797884583 : f32
    %938 = vector.broadcast %cst_196 : f32 to vector<8x128xf32>
    %939 = arith.mulf %938, %937 : vector<8x128xf32>
    %940 = math.tanh %939 : vector<8x128xf32>
    %cst_197 = arith.constant 1.000000e+00 : f32
    %941 = vector.broadcast %cst_197 : f32 to vector<8x128xf32>
    %942 = arith.addf %941, %940 : vector<8x128xf32>
    %943 = arith.mulf %932, %942 : vector<8x128xf32>
    %c69_198 = arith.constant 69 : index
    %944 = memref.load %arg4[%c69_198] : memref<96xf32, #tpu.memory_space<smem>>
    %945 = vector.broadcast %944 : f32 to vector<8x128xf32>
    %946 = arith.mulf %945, %943 : vector<8x128xf32>
    %947 = arith.addf %908, %946 : vector<8x128xf32>
    %c70_199 = arith.constant 70 : index
    %948 = memref.load %arg4[%c70_199] : memref<96xf32, #tpu.memory_space<smem>>
    %949 = vector.broadcast %948 : f32 to vector<8x128xf32>
    %950 = arith.mulf %949, %943 : vector<8x128xf32>
    %951 = arith.addf %912, %950 : vector<8x128xf32>
    %c71_200 = arith.constant 71 : index
    %952 = memref.load %arg4[%c71_200] : memref<96xf32, #tpu.memory_space<smem>>
    %953 = vector.broadcast %952 : f32 to vector<8x128xf32>
    %954 = arith.mulf %953, %943 : vector<8x128xf32>
    %955 = arith.addf %916, %954 : vector<8x128xf32>
    %c72 = arith.constant 72 : index
    %956 = memref.load %arg2[%c72] : memref<96xf32, #tpu.memory_space<smem>>
    %957 = vector.broadcast %956 : f32 to vector<8x128xf32>
    %958 = arith.mulf %957, %20 : vector<8x128xf32>
    %c73 = arith.constant 73 : index
    %959 = memref.load %arg2[%c73] : memref<96xf32, #tpu.memory_space<smem>>
    %960 = vector.broadcast %959 : f32 to vector<8x128xf32>
    %961 = arith.mulf %960, %0 : vector<8x128xf32>
    %962 = arith.addf %958, %961 : vector<8x128xf32>
    %c74 = arith.constant 74 : index
    %963 = memref.load %arg2[%c74] : memref<96xf32, #tpu.memory_space<smem>>
    %964 = vector.broadcast %963 : f32 to vector<8x128xf32>
    %965 = arith.mulf %964, %22 : vector<8x128xf32>
    %966 = arith.addf %962, %965 : vector<8x128xf32>
    %c24_201 = arith.constant 24 : index
    %967 = memref.load %arg3[%c24_201] : memref<32xf32, #tpu.memory_space<smem>>
    %968 = vector.broadcast %967 : f32 to vector<8x128xf32>
    %969 = arith.addf %966, %968 : vector<8x128xf32>
    %cst_202 = arith.constant 5.000000e-01 : f32
    %970 = vector.broadcast %cst_202 : f32 to vector<8x128xf32>
    %971 = arith.mulf %970, %969 : vector<8x128xf32>
    %972 = arith.mulf %969, %969 : vector<8x128xf32>
    %973 = arith.mulf %972, %969 : vector<8x128xf32>
    %cst_203 = arith.constant 4.471500e-02 : f32
    %974 = vector.broadcast %cst_203 : f32 to vector<8x128xf32>
    %975 = arith.mulf %974, %973 : vector<8x128xf32>
    %976 = arith.addf %969, %975 : vector<8x128xf32>
    %cst_204 = arith.constant 0.797884583 : f32
    %977 = vector.broadcast %cst_204 : f32 to vector<8x128xf32>
    %978 = arith.mulf %977, %976 : vector<8x128xf32>
    %979 = math.tanh %978 : vector<8x128xf32>
    %cst_205 = arith.constant 1.000000e+00 : f32
    %980 = vector.broadcast %cst_205 : f32 to vector<8x128xf32>
    %981 = arith.addf %980, %979 : vector<8x128xf32>
    %982 = arith.mulf %971, %981 : vector<8x128xf32>
    %c72_206 = arith.constant 72 : index
    %983 = memref.load %arg4[%c72_206] : memref<96xf32, #tpu.memory_space<smem>>
    %984 = vector.broadcast %983 : f32 to vector<8x128xf32>
    %985 = arith.mulf %984, %982 : vector<8x128xf32>
    %986 = arith.addf %947, %985 : vector<8x128xf32>
    %c73_207 = arith.constant 73 : index
    %987 = memref.load %arg4[%c73_207] : memref<96xf32, #tpu.memory_space<smem>>
    %988 = vector.broadcast %987 : f32 to vector<8x128xf32>
    %989 = arith.mulf %988, %982 : vector<8x128xf32>
    %990 = arith.addf %951, %989 : vector<8x128xf32>
    %c74_208 = arith.constant 74 : index
    %991 = memref.load %arg4[%c74_208] : memref<96xf32, #tpu.memory_space<smem>>
    %992 = vector.broadcast %991 : f32 to vector<8x128xf32>
    %993 = arith.mulf %992, %982 : vector<8x128xf32>
    %994 = arith.addf %955, %993 : vector<8x128xf32>
    %c75 = arith.constant 75 : index
    %995 = memref.load %arg2[%c75] : memref<96xf32, #tpu.memory_space<smem>>
    %996 = vector.broadcast %995 : f32 to vector<8x128xf32>
    %997 = arith.mulf %996, %20 : vector<8x128xf32>
    %c76 = arith.constant 76 : index
    %998 = memref.load %arg2[%c76] : memref<96xf32, #tpu.memory_space<smem>>
    %999 = vector.broadcast %998 : f32 to vector<8x128xf32>
    %1000 = arith.mulf %999, %0 : vector<8x128xf32>
    %1001 = arith.addf %997, %1000 : vector<8x128xf32>
    %c77 = arith.constant 77 : index
    %1002 = memref.load %arg2[%c77] : memref<96xf32, #tpu.memory_space<smem>>
    %1003 = vector.broadcast %1002 : f32 to vector<8x128xf32>
    %1004 = arith.mulf %1003, %22 : vector<8x128xf32>
    %1005 = arith.addf %1001, %1004 : vector<8x128xf32>
    %c25_209 = arith.constant 25 : index
    %1006 = memref.load %arg3[%c25_209] : memref<32xf32, #tpu.memory_space<smem>>
    %1007 = vector.broadcast %1006 : f32 to vector<8x128xf32>
    %1008 = arith.addf %1005, %1007 : vector<8x128xf32>
    %cst_210 = arith.constant 5.000000e-01 : f32
    %1009 = vector.broadcast %cst_210 : f32 to vector<8x128xf32>
    %1010 = arith.mulf %1009, %1008 : vector<8x128xf32>
    %1011 = arith.mulf %1008, %1008 : vector<8x128xf32>
    %1012 = arith.mulf %1011, %1008 : vector<8x128xf32>
    %cst_211 = arith.constant 4.471500e-02 : f32
    %1013 = vector.broadcast %cst_211 : f32 to vector<8x128xf32>
    %1014 = arith.mulf %1013, %1012 : vector<8x128xf32>
    %1015 = arith.addf %1008, %1014 : vector<8x128xf32>
    %cst_212 = arith.constant 0.797884583 : f32
    %1016 = vector.broadcast %cst_212 : f32 to vector<8x128xf32>
    %1017 = arith.mulf %1016, %1015 : vector<8x128xf32>
    %1018 = math.tanh %1017 : vector<8x128xf32>
    %cst_213 = arith.constant 1.000000e+00 : f32
    %1019 = vector.broadcast %cst_213 : f32 to vector<8x128xf32>
    %1020 = arith.addf %1019, %1018 : vector<8x128xf32>
    %1021 = arith.mulf %1010, %1020 : vector<8x128xf32>
    %c75_214 = arith.constant 75 : index
    %1022 = memref.load %arg4[%c75_214] : memref<96xf32, #tpu.memory_space<smem>>
    %1023 = vector.broadcast %1022 : f32 to vector<8x128xf32>
    %1024 = arith.mulf %1023, %1021 : vector<8x128xf32>
    %1025 = arith.addf %986, %1024 : vector<8x128xf32>
    %c76_215 = arith.constant 76 : index
    %1026 = memref.load %arg4[%c76_215] : memref<96xf32, #tpu.memory_space<smem>>
    %1027 = vector.broadcast %1026 : f32 to vector<8x128xf32>
    %1028 = arith.mulf %1027, %1021 : vector<8x128xf32>
    %1029 = arith.addf %990, %1028 : vector<8x128xf32>
    %c77_216 = arith.constant 77 : index
    %1030 = memref.load %arg4[%c77_216] : memref<96xf32, #tpu.memory_space<smem>>
    %1031 = vector.broadcast %1030 : f32 to vector<8x128xf32>
    %1032 = arith.mulf %1031, %1021 : vector<8x128xf32>
    %1033 = arith.addf %994, %1032 : vector<8x128xf32>
    %c78 = arith.constant 78 : index
    %1034 = memref.load %arg2[%c78] : memref<96xf32, #tpu.memory_space<smem>>
    %1035 = vector.broadcast %1034 : f32 to vector<8x128xf32>
    %1036 = arith.mulf %1035, %20 : vector<8x128xf32>
    %c79 = arith.constant 79 : index
    %1037 = memref.load %arg2[%c79] : memref<96xf32, #tpu.memory_space<smem>>
    %1038 = vector.broadcast %1037 : f32 to vector<8x128xf32>
    %1039 = arith.mulf %1038, %0 : vector<8x128xf32>
    %1040 = arith.addf %1036, %1039 : vector<8x128xf32>
    %c80 = arith.constant 80 : index
    %1041 = memref.load %arg2[%c80] : memref<96xf32, #tpu.memory_space<smem>>
    %1042 = vector.broadcast %1041 : f32 to vector<8x128xf32>
    %1043 = arith.mulf %1042, %22 : vector<8x128xf32>
    %1044 = arith.addf %1040, %1043 : vector<8x128xf32>
    %c26_217 = arith.constant 26 : index
    %1045 = memref.load %arg3[%c26_217] : memref<32xf32, #tpu.memory_space<smem>>
    %1046 = vector.broadcast %1045 : f32 to vector<8x128xf32>
    %1047 = arith.addf %1044, %1046 : vector<8x128xf32>
    %cst_218 = arith.constant 5.000000e-01 : f32
    %1048 = vector.broadcast %cst_218 : f32 to vector<8x128xf32>
    %1049 = arith.mulf %1048, %1047 : vector<8x128xf32>
    %1050 = arith.mulf %1047, %1047 : vector<8x128xf32>
    %1051 = arith.mulf %1050, %1047 : vector<8x128xf32>
    %cst_219 = arith.constant 4.471500e-02 : f32
    %1052 = vector.broadcast %cst_219 : f32 to vector<8x128xf32>
    %1053 = arith.mulf %1052, %1051 : vector<8x128xf32>
    %1054 = arith.addf %1047, %1053 : vector<8x128xf32>
    %cst_220 = arith.constant 0.797884583 : f32
    %1055 = vector.broadcast %cst_220 : f32 to vector<8x128xf32>
    %1056 = arith.mulf %1055, %1054 : vector<8x128xf32>
    %1057 = math.tanh %1056 : vector<8x128xf32>
    %cst_221 = arith.constant 1.000000e+00 : f32
    %1058 = vector.broadcast %cst_221 : f32 to vector<8x128xf32>
    %1059 = arith.addf %1058, %1057 : vector<8x128xf32>
    %1060 = arith.mulf %1049, %1059 : vector<8x128xf32>
    %c78_222 = arith.constant 78 : index
    %1061 = memref.load %arg4[%c78_222] : memref<96xf32, #tpu.memory_space<smem>>
    %1062 = vector.broadcast %1061 : f32 to vector<8x128xf32>
    %1063 = arith.mulf %1062, %1060 : vector<8x128xf32>
    %1064 = arith.addf %1025, %1063 : vector<8x128xf32>
    %c79_223 = arith.constant 79 : index
    %1065 = memref.load %arg4[%c79_223] : memref<96xf32, #tpu.memory_space<smem>>
    %1066 = vector.broadcast %1065 : f32 to vector<8x128xf32>
    %1067 = arith.mulf %1066, %1060 : vector<8x128xf32>
    %1068 = arith.addf %1029, %1067 : vector<8x128xf32>
    %c80_224 = arith.constant 80 : index
    %1069 = memref.load %arg4[%c80_224] : memref<96xf32, #tpu.memory_space<smem>>
    %1070 = vector.broadcast %1069 : f32 to vector<8x128xf32>
    %1071 = arith.mulf %1070, %1060 : vector<8x128xf32>
    %1072 = arith.addf %1033, %1071 : vector<8x128xf32>
    %c81 = arith.constant 81 : index
    %1073 = memref.load %arg2[%c81] : memref<96xf32, #tpu.memory_space<smem>>
    %1074 = vector.broadcast %1073 : f32 to vector<8x128xf32>
    %1075 = arith.mulf %1074, %20 : vector<8x128xf32>
    %c82 = arith.constant 82 : index
    %1076 = memref.load %arg2[%c82] : memref<96xf32, #tpu.memory_space<smem>>
    %1077 = vector.broadcast %1076 : f32 to vector<8x128xf32>
    %1078 = arith.mulf %1077, %0 : vector<8x128xf32>
    %1079 = arith.addf %1075, %1078 : vector<8x128xf32>
    %c83 = arith.constant 83 : index
    %1080 = memref.load %arg2[%c83] : memref<96xf32, #tpu.memory_space<smem>>
    %1081 = vector.broadcast %1080 : f32 to vector<8x128xf32>
    %1082 = arith.mulf %1081, %22 : vector<8x128xf32>
    %1083 = arith.addf %1079, %1082 : vector<8x128xf32>
    %c27_225 = arith.constant 27 : index
    %1084 = memref.load %arg3[%c27_225] : memref<32xf32, #tpu.memory_space<smem>>
    %1085 = vector.broadcast %1084 : f32 to vector<8x128xf32>
    %1086 = arith.addf %1083, %1085 : vector<8x128xf32>
    %cst_226 = arith.constant 5.000000e-01 : f32
    %1087 = vector.broadcast %cst_226 : f32 to vector<8x128xf32>
    %1088 = arith.mulf %1087, %1086 : vector<8x128xf32>
    %1089 = arith.mulf %1086, %1086 : vector<8x128xf32>
    %1090 = arith.mulf %1089, %1086 : vector<8x128xf32>
    %cst_227 = arith.constant 4.471500e-02 : f32
    %1091 = vector.broadcast %cst_227 : f32 to vector<8x128xf32>
    %1092 = arith.mulf %1091, %1090 : vector<8x128xf32>
    %1093 = arith.addf %1086, %1092 : vector<8x128xf32>
    %cst_228 = arith.constant 0.797884583 : f32
    %1094 = vector.broadcast %cst_228 : f32 to vector<8x128xf32>
    %1095 = arith.mulf %1094, %1093 : vector<8x128xf32>
    %1096 = math.tanh %1095 : vector<8x128xf32>
    %cst_229 = arith.constant 1.000000e+00 : f32
    %1097 = vector.broadcast %cst_229 : f32 to vector<8x128xf32>
    %1098 = arith.addf %1097, %1096 : vector<8x128xf32>
    %1099 = arith.mulf %1088, %1098 : vector<8x128xf32>
    %c81_230 = arith.constant 81 : index
    %1100 = memref.load %arg4[%c81_230] : memref<96xf32, #tpu.memory_space<smem>>
    %1101 = vector.broadcast %1100 : f32 to vector<8x128xf32>
    %1102 = arith.mulf %1101, %1099 : vector<8x128xf32>
    %1103 = arith.addf %1064, %1102 : vector<8x128xf32>
    %c82_231 = arith.constant 82 : index
    %1104 = memref.load %arg4[%c82_231] : memref<96xf32, #tpu.memory_space<smem>>
    %1105 = vector.broadcast %1104 : f32 to vector<8x128xf32>
    %1106 = arith.mulf %1105, %1099 : vector<8x128xf32>
    %1107 = arith.addf %1068, %1106 : vector<8x128xf32>
    %c83_232 = arith.constant 83 : index
    %1108 = memref.load %arg4[%c83_232] : memref<96xf32, #tpu.memory_space<smem>>
    %1109 = vector.broadcast %1108 : f32 to vector<8x128xf32>
    %1110 = arith.mulf %1109, %1099 : vector<8x128xf32>
    %1111 = arith.addf %1072, %1110 : vector<8x128xf32>
    %c84 = arith.constant 84 : index
    %1112 = memref.load %arg2[%c84] : memref<96xf32, #tpu.memory_space<smem>>
    %1113 = vector.broadcast %1112 : f32 to vector<8x128xf32>
    %1114 = arith.mulf %1113, %20 : vector<8x128xf32>
    %c85 = arith.constant 85 : index
    %1115 = memref.load %arg2[%c85] : memref<96xf32, #tpu.memory_space<smem>>
    %1116 = vector.broadcast %1115 : f32 to vector<8x128xf32>
    %1117 = arith.mulf %1116, %0 : vector<8x128xf32>
    %1118 = arith.addf %1114, %1117 : vector<8x128xf32>
    %c86 = arith.constant 86 : index
    %1119 = memref.load %arg2[%c86] : memref<96xf32, #tpu.memory_space<smem>>
    %1120 = vector.broadcast %1119 : f32 to vector<8x128xf32>
    %1121 = arith.mulf %1120, %22 : vector<8x128xf32>
    %1122 = arith.addf %1118, %1121 : vector<8x128xf32>
    %c28_233 = arith.constant 28 : index
    %1123 = memref.load %arg3[%c28_233] : memref<32xf32, #tpu.memory_space<smem>>
    %1124 = vector.broadcast %1123 : f32 to vector<8x128xf32>
    %1125 = arith.addf %1122, %1124 : vector<8x128xf32>
    %cst_234 = arith.constant 5.000000e-01 : f32
    %1126 = vector.broadcast %cst_234 : f32 to vector<8x128xf32>
    %1127 = arith.mulf %1126, %1125 : vector<8x128xf32>
    %1128 = arith.mulf %1125, %1125 : vector<8x128xf32>
    %1129 = arith.mulf %1128, %1125 : vector<8x128xf32>
    %cst_235 = arith.constant 4.471500e-02 : f32
    %1130 = vector.broadcast %cst_235 : f32 to vector<8x128xf32>
    %1131 = arith.mulf %1130, %1129 : vector<8x128xf32>
    %1132 = arith.addf %1125, %1131 : vector<8x128xf32>
    %cst_236 = arith.constant 0.797884583 : f32
    %1133 = vector.broadcast %cst_236 : f32 to vector<8x128xf32>
    %1134 = arith.mulf %1133, %1132 : vector<8x128xf32>
    %1135 = math.tanh %1134 : vector<8x128xf32>
    %cst_237 = arith.constant 1.000000e+00 : f32
    %1136 = vector.broadcast %cst_237 : f32 to vector<8x128xf32>
    %1137 = arith.addf %1136, %1135 : vector<8x128xf32>
    %1138 = arith.mulf %1127, %1137 : vector<8x128xf32>
    %c84_238 = arith.constant 84 : index
    %1139 = memref.load %arg4[%c84_238] : memref<96xf32, #tpu.memory_space<smem>>
    %1140 = vector.broadcast %1139 : f32 to vector<8x128xf32>
    %1141 = arith.mulf %1140, %1138 : vector<8x128xf32>
    %1142 = arith.addf %1103, %1141 : vector<8x128xf32>
    %c85_239 = arith.constant 85 : index
    %1143 = memref.load %arg4[%c85_239] : memref<96xf32, #tpu.memory_space<smem>>
    %1144 = vector.broadcast %1143 : f32 to vector<8x128xf32>
    %1145 = arith.mulf %1144, %1138 : vector<8x128xf32>
    %1146 = arith.addf %1107, %1145 : vector<8x128xf32>
    %c86_240 = arith.constant 86 : index
    %1147 = memref.load %arg4[%c86_240] : memref<96xf32, #tpu.memory_space<smem>>
    %1148 = vector.broadcast %1147 : f32 to vector<8x128xf32>
    %1149 = arith.mulf %1148, %1138 : vector<8x128xf32>
    %1150 = arith.addf %1111, %1149 : vector<8x128xf32>
    %c87 = arith.constant 87 : index
    %1151 = memref.load %arg2[%c87] : memref<96xf32, #tpu.memory_space<smem>>
    %1152 = vector.broadcast %1151 : f32 to vector<8x128xf32>
    %1153 = arith.mulf %1152, %20 : vector<8x128xf32>
    %c88 = arith.constant 88 : index
    %1154 = memref.load %arg2[%c88] : memref<96xf32, #tpu.memory_space<smem>>
    %1155 = vector.broadcast %1154 : f32 to vector<8x128xf32>
    %1156 = arith.mulf %1155, %0 : vector<8x128xf32>
    %1157 = arith.addf %1153, %1156 : vector<8x128xf32>
    %c89 = arith.constant 89 : index
    %1158 = memref.load %arg2[%c89] : memref<96xf32, #tpu.memory_space<smem>>
    %1159 = vector.broadcast %1158 : f32 to vector<8x128xf32>
    %1160 = arith.mulf %1159, %22 : vector<8x128xf32>
    %1161 = arith.addf %1157, %1160 : vector<8x128xf32>
    %c29_241 = arith.constant 29 : index
    %1162 = memref.load %arg3[%c29_241] : memref<32xf32, #tpu.memory_space<smem>>
    %1163 = vector.broadcast %1162 : f32 to vector<8x128xf32>
    %1164 = arith.addf %1161, %1163 : vector<8x128xf32>
    %cst_242 = arith.constant 5.000000e-01 : f32
    %1165 = vector.broadcast %cst_242 : f32 to vector<8x128xf32>
    %1166 = arith.mulf %1165, %1164 : vector<8x128xf32>
    %1167 = arith.mulf %1164, %1164 : vector<8x128xf32>
    %1168 = arith.mulf %1167, %1164 : vector<8x128xf32>
    %cst_243 = arith.constant 4.471500e-02 : f32
    %1169 = vector.broadcast %cst_243 : f32 to vector<8x128xf32>
    %1170 = arith.mulf %1169, %1168 : vector<8x128xf32>
    %1171 = arith.addf %1164, %1170 : vector<8x128xf32>
    %cst_244 = arith.constant 0.797884583 : f32
    %1172 = vector.broadcast %cst_244 : f32 to vector<8x128xf32>
    %1173 = arith.mulf %1172, %1171 : vector<8x128xf32>
    %1174 = math.tanh %1173 : vector<8x128xf32>
    %cst_245 = arith.constant 1.000000e+00 : f32
    %1175 = vector.broadcast %cst_245 : f32 to vector<8x128xf32>
    %1176 = arith.addf %1175, %1174 : vector<8x128xf32>
    %1177 = arith.mulf %1166, %1176 : vector<8x128xf32>
    %c87_246 = arith.constant 87 : index
    %1178 = memref.load %arg4[%c87_246] : memref<96xf32, #tpu.memory_space<smem>>
    %1179 = vector.broadcast %1178 : f32 to vector<8x128xf32>
    %1180 = arith.mulf %1179, %1177 : vector<8x128xf32>
    %1181 = arith.addf %1142, %1180 : vector<8x128xf32>
    %c88_247 = arith.constant 88 : index
    %1182 = memref.load %arg4[%c88_247] : memref<96xf32, #tpu.memory_space<smem>>
    %1183 = vector.broadcast %1182 : f32 to vector<8x128xf32>
    %1184 = arith.mulf %1183, %1177 : vector<8x128xf32>
    %1185 = arith.addf %1146, %1184 : vector<8x128xf32>
    %c89_248 = arith.constant 89 : index
    %1186 = memref.load %arg4[%c89_248] : memref<96xf32, #tpu.memory_space<smem>>
    %1187 = vector.broadcast %1186 : f32 to vector<8x128xf32>
    %1188 = arith.mulf %1187, %1177 : vector<8x128xf32>
    %1189 = arith.addf %1150, %1188 : vector<8x128xf32>
    %c90 = arith.constant 90 : index
    %1190 = memref.load %arg2[%c90] : memref<96xf32, #tpu.memory_space<smem>>
    %1191 = vector.broadcast %1190 : f32 to vector<8x128xf32>
    %1192 = arith.mulf %1191, %20 : vector<8x128xf32>
    %c91 = arith.constant 91 : index
    %1193 = memref.load %arg2[%c91] : memref<96xf32, #tpu.memory_space<smem>>
    %1194 = vector.broadcast %1193 : f32 to vector<8x128xf32>
    %1195 = arith.mulf %1194, %0 : vector<8x128xf32>
    %1196 = arith.addf %1192, %1195 : vector<8x128xf32>
    %c92 = arith.constant 92 : index
    %1197 = memref.load %arg2[%c92] : memref<96xf32, #tpu.memory_space<smem>>
    %1198 = vector.broadcast %1197 : f32 to vector<8x128xf32>
    %1199 = arith.mulf %1198, %22 : vector<8x128xf32>
    %1200 = arith.addf %1196, %1199 : vector<8x128xf32>
    %c30_249 = arith.constant 30 : index
    %1201 = memref.load %arg3[%c30_249] : memref<32xf32, #tpu.memory_space<smem>>
    %1202 = vector.broadcast %1201 : f32 to vector<8x128xf32>
    %1203 = arith.addf %1200, %1202 : vector<8x128xf32>
    %cst_250 = arith.constant 5.000000e-01 : f32
    %1204 = vector.broadcast %cst_250 : f32 to vector<8x128xf32>
    %1205 = arith.mulf %1204, %1203 : vector<8x128xf32>
    %1206 = arith.mulf %1203, %1203 : vector<8x128xf32>
    %1207 = arith.mulf %1206, %1203 : vector<8x128xf32>
    %cst_251 = arith.constant 4.471500e-02 : f32
    %1208 = vector.broadcast %cst_251 : f32 to vector<8x128xf32>
    %1209 = arith.mulf %1208, %1207 : vector<8x128xf32>
    %1210 = arith.addf %1203, %1209 : vector<8x128xf32>
    %cst_252 = arith.constant 0.797884583 : f32
    %1211 = vector.broadcast %cst_252 : f32 to vector<8x128xf32>
    %1212 = arith.mulf %1211, %1210 : vector<8x128xf32>
    %1213 = math.tanh %1212 : vector<8x128xf32>
    %cst_253 = arith.constant 1.000000e+00 : f32
    %1214 = vector.broadcast %cst_253 : f32 to vector<8x128xf32>
    %1215 = arith.addf %1214, %1213 : vector<8x128xf32>
    %1216 = arith.mulf %1205, %1215 : vector<8x128xf32>
    %c90_254 = arith.constant 90 : index
    %1217 = memref.load %arg4[%c90_254] : memref<96xf32, #tpu.memory_space<smem>>
    %1218 = vector.broadcast %1217 : f32 to vector<8x128xf32>
    %1219 = arith.mulf %1218, %1216 : vector<8x128xf32>
    %1220 = arith.addf %1181, %1219 : vector<8x128xf32>
    %c91_255 = arith.constant 91 : index
    %1221 = memref.load %arg4[%c91_255] : memref<96xf32, #tpu.memory_space<smem>>
    %1222 = vector.broadcast %1221 : f32 to vector<8x128xf32>
    %1223 = arith.mulf %1222, %1216 : vector<8x128xf32>
    %1224 = arith.addf %1185, %1223 : vector<8x128xf32>
    %c92_256 = arith.constant 92 : index
    %1225 = memref.load %arg4[%c92_256] : memref<96xf32, #tpu.memory_space<smem>>
    %1226 = vector.broadcast %1225 : f32 to vector<8x128xf32>
    %1227 = arith.mulf %1226, %1216 : vector<8x128xf32>
    %1228 = arith.addf %1189, %1227 : vector<8x128xf32>
    %c93 = arith.constant 93 : index
    %1229 = memref.load %arg2[%c93] : memref<96xf32, #tpu.memory_space<smem>>
    %1230 = vector.broadcast %1229 : f32 to vector<8x128xf32>
    %1231 = arith.mulf %1230, %20 : vector<8x128xf32>
    %c94 = arith.constant 94 : index
    %1232 = memref.load %arg2[%c94] : memref<96xf32, #tpu.memory_space<smem>>
    %1233 = vector.broadcast %1232 : f32 to vector<8x128xf32>
    %1234 = arith.mulf %1233, %0 : vector<8x128xf32>
    %1235 = arith.addf %1231, %1234 : vector<8x128xf32>
    %c95 = arith.constant 95 : index
    %1236 = memref.load %arg2[%c95] : memref<96xf32, #tpu.memory_space<smem>>
    %1237 = vector.broadcast %1236 : f32 to vector<8x128xf32>
    %1238 = arith.mulf %1237, %22 : vector<8x128xf32>
    %1239 = arith.addf %1235, %1238 : vector<8x128xf32>
    %c31_257 = arith.constant 31 : index
    %1240 = memref.load %arg3[%c31_257] : memref<32xf32, #tpu.memory_space<smem>>
    %1241 = vector.broadcast %1240 : f32 to vector<8x128xf32>
    %1242 = arith.addf %1239, %1241 : vector<8x128xf32>
    %cst_258 = arith.constant 5.000000e-01 : f32
    %1243 = vector.broadcast %cst_258 : f32 to vector<8x128xf32>
    %1244 = arith.mulf %1243, %1242 : vector<8x128xf32>
    %1245 = arith.mulf %1242, %1242 : vector<8x128xf32>
    %1246 = arith.mulf %1245, %1242 : vector<8x128xf32>
    %cst_259 = arith.constant 4.471500e-02 : f32
    %1247 = vector.broadcast %cst_259 : f32 to vector<8x128xf32>
    %1248 = arith.mulf %1247, %1246 : vector<8x128xf32>
    %1249 = arith.addf %1242, %1248 : vector<8x128xf32>
    %cst_260 = arith.constant 0.797884583 : f32
    %1250 = vector.broadcast %cst_260 : f32 to vector<8x128xf32>
    %1251 = arith.mulf %1250, %1249 : vector<8x128xf32>
    %1252 = math.tanh %1251 : vector<8x128xf32>
    %cst_261 = arith.constant 1.000000e+00 : f32
    %1253 = vector.broadcast %cst_261 : f32 to vector<8x128xf32>
    %1254 = arith.addf %1253, %1252 : vector<8x128xf32>
    %1255 = arith.mulf %1244, %1254 : vector<8x128xf32>
    %c93_262 = arith.constant 93 : index
    %1256 = memref.load %arg4[%c93_262] : memref<96xf32, #tpu.memory_space<smem>>
    %1257 = vector.broadcast %1256 : f32 to vector<8x128xf32>
    %1258 = arith.mulf %1257, %1255 : vector<8x128xf32>
    %1259 = arith.addf %1220, %1258 : vector<8x128xf32>
    %c94_263 = arith.constant 94 : index
    %1260 = memref.load %arg4[%c94_263] : memref<96xf32, #tpu.memory_space<smem>>
    %1261 = vector.broadcast %1260 : f32 to vector<8x128xf32>
    %1262 = arith.mulf %1261, %1255 : vector<8x128xf32>
    %1263 = arith.addf %1224, %1262 : vector<8x128xf32>
    %c95_264 = arith.constant 95 : index
    %1264 = memref.load %arg4[%c95_264] : memref<96xf32, #tpu.memory_space<smem>>
    %1265 = vector.broadcast %1264 : f32 to vector<8x128xf32>
    %1266 = arith.mulf %1265, %1255 : vector<8x128xf32>
    %1267 = arith.addf %1228, %1266 : vector<8x128xf32>
    %c1_i32_265 = arith.constant 1 : i32
    %1268 = tpu.dynamic_rotate %1259 by %c1_i32_265 dim 0 : vector<8x128xf32>, i32 -> vector<8x128xf32>
    %1269 = arith.mulf %1268, %13 : vector<8x128xf32>
    %1270 = arith.addf %1263, %1269 : vector<8x128xf32>
    %c7_i32_266 = arith.constant 7 : i32
    %1271 = tpu.dynamic_rotate %1267 by %c7_i32_266 dim 0 : vector<8x128xf32>, i32 -> vector<8x128xf32>
    %1272 = arith.mulf %1271, %18 : vector<8x128xf32>
    %1273 = arith.addf %1270, %1272 : vector<8x128xf32>
    %c0_267 = arith.constant 0 : index
    %1274 = memref.load %arg5[%c0_267] : memref<1xf32, #tpu.memory_space<smem>>
    %1275 = vector.broadcast %1274 : f32 to vector<8x128xf32>
    %1276 = arith.addf %1273, %1275 : vector<8x128xf32>
    %cst_268 = arith.constant 5.000000e-01 : f32
    %1277 = vector.broadcast %cst_268 : f32 to vector<8x128xf32>
    %1278 = arith.mulf %1277, %1276 : vector<8x128xf32>
    %1279 = arith.mulf %1276, %1276 : vector<8x128xf32>
    %1280 = arith.mulf %1279, %1276 : vector<8x128xf32>
    %cst_269 = arith.constant 4.471500e-02 : f32
    %1281 = vector.broadcast %cst_269 : f32 to vector<8x128xf32>
    %1282 = arith.mulf %1281, %1280 : vector<8x128xf32>
    %1283 = arith.addf %1276, %1282 : vector<8x128xf32>
    %cst_270 = arith.constant 0.797884583 : f32
    %1284 = vector.broadcast %cst_270 : f32 to vector<8x128xf32>
    %1285 = arith.mulf %1284, %1283 : vector<8x128xf32>
    %1286 = math.tanh %1285 : vector<8x128xf32>
    %cst_271 = arith.constant 1.000000e+00 : f32
    %1287 = vector.broadcast %cst_271 : f32 to vector<8x128xf32>
    %1288 = arith.addf %1287, %1286 : vector<8x128xf32>
    %1289 = arith.mulf %1278, %1288 : vector<8x128xf32>
    %c0_272 = arith.constant 0 : index
    %c0_273 = arith.constant 0 : index
    %1290 = vector.load %arg7[%c0_272, %c0_273] : memref<8x128xf32, #tpu.memory_space<vmem>>, vector<8x128xf32>
    tpu.vector_store %arg7[%c0_272, %c0_273], %1289 {strides = array<i32>} : memref<8x128xf32, #tpu.memory_space<vmem>>, vector<8x128xf32>,
    return
  }
  func.func @transform_0(%arg0: i32, %arg1: i32) -> i32 {
    %c0_i32 = arith.constant 0 : i32
    %c0_i32_0 = arith.constant 0 : i32
    return %c0_i32 : i32
  }
  func.func @transform_1(%arg0: i32, %arg1: i32) -> i32 {
    %c0_i32 = arith.constant 0 : i32
    %c0_i32_0 = arith.constant 0 : i32
    return %c0_i32 : i32
  }
  func.func @transform_2(%arg0: i32, %arg1: i32) -> i32 {
    %c0_i32 = arith.constant 0 : i32
    %c0_i32_0 = arith.constant 0 : i32
    return %c0_i32 : i32
  }
  func.func @transform_3(%arg0: i32, %arg1: i32) -> i32 {
    %c0_i32 = arith.constant 0 : i32
    %c0_i32_0 = arith.constant 0 : i32
    return %c0_i32 : i32
  }
  func.func @transform_4(%arg0: i32, %arg1: i32) -> (i32, i32) {
    %c0_i32 = arith.constant 0 : i32
    return %arg0, %arg1 : i32, i32
  }
  func.func @transform_5(%arg0: i32, %arg1: i32) -> (i32, i32) {
    %c0_i32 = arith.constant 0 : i32
    return %arg0, %arg1 : i32, i32
  }
}

</mosaic_0001>

<bundles_post_ra>
// kernel: tpu_custom_call.1
= control target key start
LH: loop header
LB: loop body
LE: loop exit
PB: predicated region body
PF: predicated region fallthrough
CT: control target
= control target key end

     0   :  { %s3640_s0 = inlined_call_operand.vmem [shape: f32[96], index: 0, kind: input, shape index: {}]   ;;  %s3641_s1 = inlined_call_operand.vmem [shape: f32[32], index: 1, kind: input, shape index: {}]   ;;  %s3642_s2 = inlined_call_operand.vmem [shape: f32[96], index: 2, kind: input, shape index: {}]   ;;  %s3643_s3 = inlined_call_operand.<no memory space> [shape: f32[1], index: 3, kind: input, shape index: {}]   ;;  %s3644_s4 = inlined_call_operand.hbm [shape: f32[16,128], index: 4, kind: input, shape index: {}]   ;;  %s3645_s5 = inlined_call_operand.hbm [shape: f32[16,128], index: 5, kind: output, shape index: {}]  }
   0x1   :  { %3665 = sst [smem:[#allocation28_spill]] %s3640_s0 }
   0x2   :  { %3666 = sst [smem:[#allocation29_spill]] %s3641_s1 }
   0x3   :  { %3667 = sst [smem:[#allocation30_spill]] %s3642_s2 }
   0x4   :  { %3668 = sst [smem:[#allocation31_spill]] %s3644_s4 }
   0x5   :  { %3669 = sst [smem:[#allocation32_spill]] %s3645_s5 }
   0x6   :  { %10 = sst [smem:[#allocation2]] %s3643_s3 }
   0x7   :  { %11 = vsyncpa [#allocation6], 0 }
   0x8   :  { %12 = vsyncpa [#allocation8], 0 }
   0x9   :  { %13 = vsyncpa [#allocation4], 0 }
   0xa   :  { %15 = vsyncpa [#allocation4 + $0x1], 0 }
   0xb   :  { %16 = vsyncpa [#allocation5], 0 }
   0xc   :  { %18 = vsyncpa [#allocation5 + $0x1], 0  ;;  %s2183_s20 = smov 0   ;;  %s2185_s21 = smov 0  }
   0xd   :  { %s2187_s22 = smov 0   ;;  %s2189_s23 = smov 0  }
   0xe   :  { %s2191_s24 = smov 0   ;;  %s2193_s25 = smov 0  }
   0xf LB: > { %3670 = sst [smem:[#allocation16_spill]] %s2122_s20  ;;  %s1576_s3 = sadd.s32 4294967295, %s2142_s25   ;;  %s2142_s25 = sphi %s2193_s25, %s24_s25   ;;  %s2138_s24 = sphi %s2191_s24, %s3713_s24   ;;  %s2134_s23 = sphi %s2189_s23, %s3712_s23   ;;  %s2130_s22 = sphi %s2187_s22, %s3711_s22   ;;  %s2126_s21 = sphi %s2185_s21, %s3710_s21   ;;  %s2122_s20 = sphi %s2183_s20, %s3709_s20  }
  0x10   : > { %3671 = sst [smem:[#allocation17_spill]] %s2126_s21  ;;  %s1577_s26 = sadd.s32 4294967294, %s2142_s25  }
  0x11   : > { %3672 = sst [smem:[#allocation18_spill]] %s2130_s22  ;;  %p142_p0 = scmp.ne.s32.totalorder %s2126_s21, %s2122_s20 }
  0x12   : > { %3673 = sst [smem:[#allocation19_spill]] %s2134_s23  ;;  %p2217_p1 = scmp.eq.s32.totalorder %s1576_s3, 0 }
  0x13   : > { %3674 = sst [smem:[#allocation20_spill]] %s2138_s24  ;;  %p2221_p2 = scmp.eq.s32.totalorder %s1576_s3, 1 }
  0x14   : > { %3675 = sst [smem:[#allocation21_spill]] %s2142_s25  ;;  %p174_p3 = scmp.eq.s32.totalorder %s1577_s26, 1 }
  0x15   : > { %s3676_s27 = scalar_select %p2217_p1, 1, 0 }
  0x16   : > { %s3677_s28 = scalar_select %p2221_p2, 1, 0 }
  0x17   : > { %p2227_p4 = por %p2217_p1, %p142_p0  ;;  %p1578_p5 = scmp.ge.s32.totalorder %s2142_s25, 1 }
  0x18   : > { %p2232_p6 = por %p174_p3, %p142_p0  ;;  %p181_p7 = scmp.lt.s32.totalorder %s2142_s25, 3 }
  0x19   : > { %s3678_s29 = scalar_select %p2227_p4, 1, 0 }
  0x1a   : > { %s3679_s30 = scalar_select %p2232_p6, 1, 0 }
  0x1b   : > { %s3681_s1 = sld [smem:[#allocation29_spill]]  ;;  %p2240_p8 = pnand %p1578_p5, %p181_p7 }
  0x1c   : > { %3680 = sst [smem:[#allocation22_spill]] %s3679_s30  ;;  %s3683_s0 = sld [smem:[#allocation28_spill]] }
  0x1d   : > { %s3682_s9 = scalar_select %p2240_p8, 1, 0 }
  0x1e   : > { %p1832_p10 = pneg %p2240_p8  ;;  %s3685_s2 = sld [smem:[#allocation30_spill]] }
  0x20   : > { %p2252_p11 = pnand %p1832_p10, %p2217_p1 }
  0x21   : > { %s205_s8 = sshll.u32 %s3681_s1, 4  ;;  %s206_s8 = int_to_ptr.vmem [resolvable:$true] %s205_s8 }
  0x22   : > { %s194_s12 = sshll.u32 %s3683_s0, 4  ;;  %s1977_s17 = scalar_lea.vmem %s206_s8, 16  ;;  %s195_s12 = int_to_ptr.vmem [resolvable:$true] %s194_s12 }
  0x23   : > { %p1978_p12 = scmp.ne.s32.totalorder %s206_s8, %s1977_s17  ;;  %p1979_p13 = pneg %p2252_p11 }
  0x24   : > { %s216_s16 = sshll.u32 %s3685_s2, 4  ;;  %p1985_p5 = scmp.lt.s32.totalorder %s206_s8, %s206_s8  ;;  %s2259_s16 = int_to_ptr.vmem [resolvable:$true] %s216_s16 }
  0x25   : > { %p1980_p0 = pnand %p1979_p13, %p1978_p12  ;;  %p1986_p7 = scmp.lt.s32.totalorder %s1977_s17, %s1977_s17 }
  0x27   : > { %p1981_p3 = pneg %p1980_p0  ;;  %p1987_p10 = por %p1986_p7, %p1985_p5 }
  0x29   : > { %p1988_p9 = pnand %p1987_p10, %p1981_p3 }
  0x2b   : > { %1991 = shalt.err (!%p1988_p9)
}
  0x2c   : > { %s2144_s18 = smov [#allocation7]   ;;  %s1992_s19 = scalar_lea.vmem %s195_s12, 16 }
  0x2d   : > { %1838 = dma.vmem_to_smem (!%p2252_p11), %s206_s8, 16, %s2144_s18, [#allocation8]  }
  0x2e   : > { %p1993_p6 = scmp.ne.s32.totalorder %s195_s12, %s1992_s19  ;;  %p2000_p8 = scmp.lt.s32.totalorder %s195_s12, %s195_s12 }
  0x2f   : > { %p2001_p2 = scmp.lt.s32.totalorder %s1992_s19, %s1992_s19 }
  0x30   : > { %p1995_p4 = pnand %p1993_p6, %p1979_p13 }
  0x31   : > { %p2002_p12 = por %p2001_p2, %p2000_p8 }
  0x32   : > { %p1996_p1 = pneg %p1995_p4 }
  0x34   : > { %p2003_p0 = pnand %p2002_p12, %p1996_p1 }
  0x36   : > { %2006 = shalt.err (!%p2003_p0)
}
  0x37   : > { %s2145_s3 = smov [#allocation3]   ;;  %s2007_s26 = scalar_lea.vmem %s2259_s16, 16 }
  0x38   : > { %1835 = dma.vmem_to_smem (!%p2252_p11), %s195_s12, 16, %s2145_s3, [#allocation6]  }
  0x39   : > { %p2008_p9 = scmp.ne.s32.totalorder %s2259_s16, %s2007_s26  ;;  %p2015_p4 = scmp.lt.s32.totalorder %s2259_s16, %s2259_s16 }
  0x3a   : > { %p2016_p5 = scmp.lt.s32.totalorder %s2007_s26, %s2007_s26 }
  0x3b   : > { %p2010_p3 = pnand %p2008_p9, %p1979_p13 }
  0x3c   : > { %p2017_p2 = por %p2016_p5, %p2015_p4 }
  0x3d   : > { %p2011_p6 = pneg %p2010_p3 }
  0x3f   : > { %p2018_p1 = pnand %p2017_p2, %p2011_p6 }
  0x41   : > { %2021 = shalt.err (!%p2018_p1)
}
  0x42   : > { %s2146_s6 = smov [#allocation9]   ;;  %s129_s7 = sadd.s32 1, %s2130_s22 }
  0x43   : > { %1841 = dma.vmem_to_smem (!%p2252_p11), %s2259_s16, 16, %s2146_s6, [#allocation8]  }
  0x44   : > { %s36_s8 = sadd.s32 1, %s2138_s24  ;;  %p136_p8 = scmp.ne.s32.totalorder %s2130_s22, %s2126_s21 }
  0x45   : > { %p38_p13 = scmp.ge.s32.totalorder %s36_s8, 2  ;;  %p137_p7 = scmp.eq.s32.totalorder %s2142_s25, 0 }
  0x46   : > { %p3686_p10 = scmp.ne.s32.totalorder %s3677_s28, 0  ;;  %p1853_p0 = scmp.lt.s32.totalorder %s2142_s25, 2 }
  0x47   : > { %s3715_s8 = smov (%p38_p13, %s36_s8), 0  ;;  %p138_p9 = por %p137_p7, %p136_p8 }
  0x48   : > { %p2290_p12 = por %p3686_p10, %p136_p8  ;;  %3689 = sst [smem:[#allocation24_spill]] %s3715_s8 }
  0x49   : > { %s230_s11 = sand.u32 1, %s2130_s22   ;;  %s124_s12 = ssub.s32 %s2138_s24, %s3715_s8 }
  0x4a   : > { %s3687_s10 = scalar_select %p2290_p12, 1, 0 }
  0x4b   : > { %p127_p3 = scmp.eq.s32.totalorder %s124_s12, 0  ;;  %s1583_s13 = sshll.u32 %s230_s11, 3 }
  0x4c   : > { %3688 = sst [smem:[#allocation23_spill]] %s3687_s10  ;;  %s1584_s14 = sshll.u32 %s2138_s24, 7 }
  0x4d   : > { %s2302_s15 = scalar_select %p127_p3, %s2130_s22, %s129_s7  }
  0x4e   : > { %s3691_s4 = sld [smem:[#allocation31_spill]]  ;;  %s234_s18 = scalar_lea.vmem [#allocation10], %s1583_s13 }
  0x4f   : > { %3690 = sst [smem:[#allocation25_spill]] %s2302_s15  ;;  %s242_s19 = sshll.u32 %s234_s18, 4  ;;  %s2309_s19 = int_to_ptr.vmem [resolvable:$true] %s242_s19 }
  0x50   : > { %p2313_p11 = pnand %p1853_p0, %p138_p9  ;;  %s231_s26 = scalar_lea.sflag [#allocation4], %s230_s11 }
  0x52   : > { %p2024_p4 = pneg %p2313_p11 }
  0x54   : > { %s2307_s28 = scalar_lea.hbm %s3691_s4, %s1584_s14  ;;  %s2027_s13 = scalar_lea.hbm %s3691_s4, 256 }
  0x55   : > { %s2022_s6 = scalar_lea.hbm %s2307_s28, 128  ;;  %p2028_p1 = scmp.lt.u32.totalorder %s2307_s28, %s3691_s4 }
  0x56   : > { %p2023_p6 = scmp.ne.s32.totalorder %s2307_s28, %s2022_s6  ;;  %p2029_p8 = scmp.lt.u32.totalorder %s2027_s13, %s2022_s6 }
  0x57   : > { %p2031_p7 = scmp.lt.u32.totalorder %s2022_s6, %s2307_s28 }
  0x58   : > { %p2025_p5 = pnand %p2024_p4, %p2023_p6  ;;  %p2030_p13 = por %p2029_p8, %p2028_p1 }
  0x5a   : > { %p2026_p2 = pneg %p2025_p5  ;;  %p2032_p10 = por %p2031_p7, %p2030_p13 }
  0x5c   : > { %p2033_p0 = pnand %p2032_p10, %p2026_p2 }
  0x5e   : > { %2036 = shalt.err (!%p2033_p0)
}
  0x5f   : > { %s2037_s11 = scalar_lea.vmem %s2309_s19, 128  ;;  %s2147_s17 = smov [#allocation10]  }
  0x60   : > { %p2038_p9 = scmp.ne.s32.totalorder %s2309_s19, %s2037_s11  ;;  %s2042_s18 = sshll.u32 %s2147_s17, 4  ;;  %s2043_s18 = int_to_ptr.vmem [resolvable:$false] %s2042_s18 }
  0x61   : > { %s2044_s7 = scalar_lea.vmem %s2043_s18, 256  ;;  %p2045_p5 = scmp.lt.s32.totalorder %s2309_s19, %s2043_s18 }
  0x62   : > { %p2040_p3 = pnand %p2038_p9, %p2024_p4  ;;  %p2046_p1 = scmp.lt.s32.totalorder %s2044_s7, %s2037_s11 }
  0x64   : > { %p2041_p6 = pneg %p2040_p3  ;;  %p2047_p8 = por %p2046_p1, %p2045_p5 }
  0x66   : > { %p2048_p13 = pnand %p2047_p8, %p2041_p6 }
  0x68   : > { %2051 = shalt.err (!%p2048_p13)
}
  0x69   : > { %1845 = dma.hbm_to_vmem [thread:$0]  (!%p2313_p11), %s2307_s28, 128, %s2309_s19, %s231_s26  }
  0x6a   : > { %p3693_p2 = scmp.ne.s32.totalorder %s3682_s9, 0 }
  0x6c   : > { %251 = sbr.rel (%p3693_p2) target bundleno = 421 (0x1a5), region = 40 }
  0x73   : > { %p3694_p4 = scmp.ne.s32.totalorder %s3676_s27, 0 }
  0x75   : > { %2105 = dma.done.wait (%p3694_p4), [#allocation6], 16  }
  0x76   : > { %2107 = vsyncadd (%p3694_p4), [#allocation6], 4294967280 }
  0x77   : > { %2109 = dma.done.wait (%p3694_p4), [#allocation8], 32  }
  0x78   : > { %2111 = vsyncadd (%p3694_p4), [#allocation8], 4294967264  ;;  %s2353_s3 = sand.u32 1, %s2126_s21   ;;  %p3697_p11 = scmp.ne.s32.totalorder %s3678_s29, 0 }
  0x79   : > { %3695 = sst [smem:[#allocation26_spill]] %s2353_s3  ;;  %s3650_s9 = sshll.u32 %s2353_s3, 3 }
  0x7a   : > { %s266_s28 = scalar_lea.sflag [#allocation4], %s2353_s3  ;;  %s2359_s19 = scalar_lea.vmem [#allocation10], %s3650_s9 }
  0x7b   : > { %3696 = sst [smem:[#allocation27_spill]] %s2359_s19 }
  0x7c   : > { %2113 = dma.done.wait (%p3697_p11), %s266_s28, 128  }
  0x7d   : > { %2115 = vsyncadd (%p3697_p11), %s266_s28, 4294967168 }
  0x7e   : > { %274 = sfence }
  0x7f   : > { %v298_v0 = vlaneseq  ;;  %s1591_s27 = sld [smem:[#allocation3 + $0x1]]  ;;  %s2365_s26 = sld [smem:[#allocation3 + $0x4]]  ;;  %v2382_v5 = vld [vmem:[%s2359_s19] sm:$0xff]  ;;  %v2148_v17 = vmov 0.0  }
  0x80   : > { %s2367_s6 = sld [smem:[#allocation3]]  ;;  %s2369_s12 = sld [smem:[#allocation3 + $0x2]]  ;;  %v310_v9 = vrot.slane %v2382_v5, 7  ;;  %v312_v10 = vrot.slane %v2382_v5, 1 }
  0x81   : > { %v299_v1 = vshrl.u32 %v298_v0, 7  ;;  %s2371_s13 = sld [smem:[#allocation3 + $0x3]]  ;;  %s2373_s14 = sld [smem:[#allocation3 + $0x5]] }
  0x82   : > { %s2375_s29 = sld [smem:[#allocation3 + $0x6]]  ;;  %s2377_s16 = sld [smem:[#allocation3 + $0x7]] }
  0x83   : > { %v300_v2 = vcvt.s32.f32 %v299_v1  ;;  %s2379_s11 = sld [smem:[#allocation3 + $0x8]]  ;;  %s2384_s17 = sld [smem:[#allocation3 + $0x9]] }
  0x84   : > { %s2386_s18 = sld [smem:[#allocation3 + $0xa]]  ;;  %s2390_s7 = sld [smem:[#allocation7]] }
  0x85   : > { %v302_v3 = vmul.f32 0.125, %v300_v2  ;;  %v318_v7 = vstv %s1591_s27  ;;  %v350_v11 = vstv %s2365_s26  ;;  %s2393_s28 = sld [smem:[#allocation3 + $0xb]]  ;;  %s2398_s27 = sld [smem:[#allocation7 + $0x1]] }
  0x86   : > { %v315_v12 = vstv %s2367_s6  ;;  %v319_v13 = vmul.f32 %v318_v7, %v2382_v5  ;;  %v322_v14 = vstv %s2369_s12  ;;  %s2402_s9 = sld [smem:[#allocation7 + $0x2]]  ;;  %s2404_s26 = sld [smem:[#allocation7 + $0x3]]  ;;  %v351_v20 = vmul.f32 %v350_v11, %v2382_v5 }
  0x87   : > { %v303_v4 = vfloor.f32 %v302_v3  ;;  %v347_v15 = vstv %s2371_s13  ;;  %v354_v21 = vstv %s2373_s14  ;;  %s2412_s6 = sld [smem:[#allocation3 + $0xc]]  ;;  %s2414_s12 = sld [smem:[#allocation3 + $0xd]] }
  0x88   : > { %v385_v16 = vstv %s2377_s16  ;;  %v382_v24 = vstv %s2375_s29  ;;  %s2427_s13 = sld [smem:[#allocation3 + $0xe]]  ;;  %s2445_s14 = sld [smem:[#allocation3 + $0xf]] }
  0x89   : > { %v304_v6 = vmul.f32 8.0, %v303_v4  ;;  %v389_v25 = vstv %s2379_s11  ;;  %v386_v26 = vmul.f32 %v385_v16, %v2382_v5  ;;  %v417_v27 = vstv %s2384_s17  ;;  %s2447_s29 = sld [smem:[#allocation3 + $0x10]]  ;;  %s2455_s16 = sld [smem:[#allocation7 + $0x4]] }
  0x8a   : > { %v420_v28 = vstv %s2386_s18  ;;  %v326_v38 = vstv %s2390_s7  ;;  %s2473_s11 = sld [smem:[#allocation7 + $0x5]]  ;;  %s2475_s17 = sld [smem:[#allocation3 + $0x12]] }
  0x8b   : > { %v305_v8 = vsub.f32 %v300_v2, %v304_v6  ;;  %v421_v36 = vmul.f32 %v420_v28, %v2382_v5  ;;  %v424_v40 = vstv %s2393_s28  ;;  %v358_v41 = vstv %s2398_s27  ;;  %s2477_s18 = sld [smem:[#allocation3 + $0x13]]  ;;  %s2485_s7 = sld [smem:[#allocation3 + $0x14]] }
  0x8c   : > { %v393_v47 = vstv %s2402_s9  ;;  %v428_v48 = vstv %s2404_s26  ;;  %s1625_s9 = sld [smem:[#allocation3 + $0x11]]  ;;  %s2489_s28 = sld [smem:[#allocation3 + $0x15]] }
  0x8d   : > { %vm306_vm0 = vcmp.ge.f32.partialorder %v305_v8, 1.0  ;;  %vm308_vm1 = vcmp.le.f32.partialorder %v305_v8, 6.0  ;;  %v452_v51 = vstv %s2412_s6  ;;  %v455_v52 = vstv %s2414_s12  ;;  %s2494_s27 = sld [smem:[#allocation3 + $0x16]]  ;;  %s2497_s26 = sld [smem:[#allocation3 + $0x17]] }
  0x8e   : > { %v2406_v18 = vsel %vm306_vm0, 1.0, %v2148_v17  ;;  %v2408_v19 = vsel %vm308_vm1, 1.0, %v2148_v17  ;;  %v456_v56 = vmul.f32 %v455_v52, %v2382_v5  ;;  %v459_v59 = vstv %s2427_s13  ;;  %s2499_s6 = sld [smem:[#allocation9]]  ;;  %s2504_s12 = sld [smem:[#allocation7 + $0x6]] }
  0x8f   : > { %v2417_v22 = vmul.f32 %v310_v9, %v2406_v18  ;;  %v2420_v23 = vmul.f32 %v312_v10, %v2408_v19  ;;  %v487_v8 = vstv %s2445_s14  ;;  %v490_v9 = vstv %s2447_s29  ;;  %s2506_s13 = sld [smem:[#allocation9 + $0x1]]  ;;  %s2508_s14 = sld [smem:[#allocation9 + $0x2]] }
  0x90   : > { %s2515_s29 = sld [smem:[#allocation9 + $0x3]]  ;;  %s2533_s0 = sld [smem:[#allocation9 + $0x9]] }
  0x91   : > { %v316_v29 = vmul.f32 %v315_v12, %v2417_v22  ;;  %v323_v30 = vmul.f32 %v322_v14, %v2420_v23  ;;  %v348_v31 = vmul.f32 %v347_v15, %v2417_v22  ;;  %v355_v32 = vmul.f32 %v354_v21, %v2420_v23  ;;  %s2541_s1 = sld [smem:[#allocation3 + $0x18]]  ;;  %s2545_s2 = sld [smem:[#allocation9 + $0xb]] }
  0x92   : > { %v383_v33 = vmul.f32 %v382_v24, %v2417_v22  ;;  %v390_v34 = vmul.f32 %v389_v25, %v2420_v23  ;;  %v418_v35 = vmul.f32 %v417_v27, %v2417_v22  ;;  %v425_v44 = vmul.f32 %v424_v40, %v2420_v23  ;;  %s2552_s4 = sld [smem:[#allocation9 + $0xc]]  ;;  %s2557_s8 = sld [smem:[#allocation9 + $0xd]] }
  0x93   : > { %v320_v37 = vadd.f32 %v319_v13, %v316_v29  ;;  %v352_v39 = vadd.f32 %v351_v20, %v348_v31  ;;  %v453_v55 = vmul.f32 %v452_v51, %v2417_v22  ;;  %v460_v3 = vmul.f32 %v459_v59, %v2420_v23  ;;  %s2561_s24 = sld [smem:[#allocation9 + $0xe]]  ;;  %s2570_s15 = sld [smem:[#allocation9 + $0x11]] }
  0x94   : > { %v387_v42 = vadd.f32 %v386_v26, %v383_v33  ;;  %v422_v43 = vadd.f32 %v421_v36, %v418_v35  ;;  %v463_v12 = vstv %s2455_s16  ;;  %v488_v13 = vmul.f32 %v487_v8, %v2417_v22  ;;  %s2517_s16 = sld [smem:[#allocation9 + $0x4]]  ;;  %s2578_s22 = sld [smem:[#allocation9 + $0x12]] }
  0x95   : > { %v324_v45 = vadd.f32 %v323_v30, %v320_v37  ;;  %v356_v46 = vadd.f32 %v355_v32, %v352_v39  ;;  %v457_v2 = vadd.f32 %v456_v56, %v453_v55  ;;  %v491_v15 = vmul.f32 %v490_v9, %v2382_v5  ;;  %s2580_s21 = sld [smem:[#allocation3 + $0x1a]]  ;;  %s2586_s25 = sld [smem:[#allocation9 + $0x13]] }
  0x96   : > { %v391_v49 = vadd.f32 %v390_v34, %v387_v42  ;;  %v426_v50 = vadd.f32 %v425_v44, %v422_v43  ;;  %v494_v16 = vstv %s1625_s9  ;;  %v498_v29 = vstv %s2473_s11  ;;  %s2521_s9 = sld [smem:[#allocation9 + $0x5]]  ;;  %s2523_s11 = sld [smem:[#allocation9 + $0x6]] }
  0x97   : > { %v2449_v53 = vadd.f32 %v326_v38, %v324_v45  ;;  %v2451_v54 = vadd.f32 %v358_v41, %v356_v46  ;;  %v461_v7 = vadd.f32 %v460_v3, %v457_v2  ;;  %v492_v21 = vadd.f32 %v491_v15, %v488_v13  ;;  %s2589_s30 = sld [smem:[#allocation9 + $0x14]]  ;;  %s2597_s20 = sld [smem:[#allocation9 + $0x15]] }
  0x98   : > { %v2457_v57 = vadd.f32 %v393_v47, %v391_v49  ;;  %v2459_v58 = vadd.f32 %v428_v48, %v426_v50  ;;  %v495_v24 = vmul.f32 %v494_v16, %v2420_v23  ;;  %v522_v30 = vstv %s2475_s17  ;;  %s2528_s17 = sld [smem:[#allocation9 + $0x7]]  ;;  %s2599_s5 = sld [smem:[#allocation9 + $0x16]] }
  0x99   : > { %v329_v60 = vmul.f32 %v2449_v53, %v2449_v53  ;;  %v361_v61 = vmul.f32 %v2451_v54, %v2451_v54  ;;  %v2491_v20 = vadd.f32 %v463_v12, %v461_v7  ;;  %v525_v31 = vstv %s2477_s18  ;;  %s2530_s18 = sld [smem:[#allocation9 + $0x8]]  ;;  %s2634_s3 = sld [smem:[#allocation3 + $0x1e]] }
  0x9a   : > { %v396_v62 = vmul.f32 %v2457_v57, %v2457_v57  ;;  %v431_v63 = vmul.f32 %v2459_v58, %v2459_v58  ;;  %v496_v28 = vadd.f32 %v495_v24, %v492_v21  ;;  %v523_v34 = vmul.f32 %v522_v30, %v2417_v22  ;;  %s2622_s10 = sld [smem:[#allocation7 + $0x8]]  ;;  %s2636_s23 = sld [smem:[#allocation3 + $0x1f]] }
  0x9b   : > { %v330_v0 = vmul.f32 %v329_v60, %v2449_v53  ;;  %v362_v1 = vmul.f32 %v361_v61, %v2451_v54  ;;  %v466_v33 = vmul.f32 %v2491_v20, %v2491_v20  ;;  %v526_v35 = vmul.f32 %v525_v31, %v2382_v5  ;;  %s2650_s19 = sld [smem:[#allocation3 + $0x20]] }
  0x9c   : > { %v397_v6 = vmul.f32 %v396_v62, %v2457_v57  ;;  %v432_v11 = vmul.f32 %v431_v63, %v2459_v58  ;;  %v529_v38 = vstv %s2485_s7  ;;  %v2525_v39 = vadd.f32 %v498_v29, %v496_v28  ;;  %s2535_s7 = sld [smem:[#allocation9 + $0xa]] }
  0x9d   : > { %v331_v4 = vmul.f32 0.044715, %v330_v0  ;;  %v363_v10 = vmul.f32 0.044715, %v362_v1  ;;  %v527_v40 = vadd.f32 %v526_v35, %v523_v34  ;;  %v530_v41 = vmul.f32 %v529_v38, %v2420_v23 }
  0x9e   : > { %v398_v17 = vmul.f32 0.044715, %v397_v6  ;;  %v433_v26 = vmul.f32 0.044715, %v432_v11  ;;  %v557_v42 = vstv %s2489_s28  ;;  %v467_v44 = vmul.f32 %v466_v33, %v2491_v20  ;;  %s2543_s28 = sld [smem:[#allocation3 + $0x19]] }
  0x9f   : > { %v332_v14 = vadd.f32 %v331_v4, %v2449_v53  ;;  %v364_v25 = vadd.f32 %v363_v10, %v2451_v54  ;;  %v560_v45 = vstv %s2494_s27  ;;  %v558_v47 = vmul.f32 %v557_v42, %v2417_v22  ;;  %s2550_s27 = sld [smem:[#allocation7 + $0x7]] }
  0xa0   : > { %v399_v32 = vadd.f32 %v398_v17, %v2457_v57  ;;  %v434_v37 = vadd.f32 %v433_v26, %v2459_v58  ;;  %v561_v48 = vmul.f32 %v560_v45, %v2382_v5  ;;  %v501_v49 = vmul.f32 %v2525_v39, %v2525_v39 }
  0xa1   : > { %v333_v27 = vmul.f32 0.7978846, %v332_v14  ;;  %v365_v36 = vmul.f32 0.7978846, %v364_v25  ;;  %v531_v50 = vadd.f32 %v530_v41, %v527_v40  ;;  %v564_v51 = vstv %s2497_s26  ;;  %s2563_s26 = sld [smem:[#allocation9 + $0xf]] }
  0xa2   : > { %v400_v43 = vmul.f32 0.7978846, %v399_v32  ;;  %v435_v46 = vmul.f32 0.7978846, %v434_v37  ;;  %v533_v52 = vstv %s2504_s12  ;;  %v338_v55 = vstv %s2499_s6  ;;  %s2568_s12 = sld [smem:[#allocation9 + $0x10]]  ;;  %s2663_s6 = sld [smem:[#allocation7 + $0xa]] }
  0xa3   : > { %1910 = vtanh.f32 %v333_v27  ;;  %v341_v56 = vstv %s2506_s13  ;;  %v468_v59 = vmul.f32 0.044715, %v467_v44  ;;  %v344_v60 = vstv %s2508_s14  ;;  %s2673_s13 = sld [smem:[#allocation3 + $0x22]]  ;;  %s2682_s14 = sld [smem:[#allocation9 + $0x17]] }
  0xa4   : > { %1912 = vtanh.f32 %v365_v36  ;;  %v370_v61 = vstv %s2515_s29  ;;  %v562_v62 = vadd.f32 %v561_v48, %v558_v47  ;;  %v565_v63 = vmul.f32 %v564_v51, %v2420_v23  ;;  %s2711_s29 = sld [smem:[#allocation3 + $0x26]] }
  0xa5   : > { %1914 = vtanh.f32 %v400_v43  ;;  %v374_v0 = vstv %s2517_s16  ;;  %v502_v1 = vmul.f32 %v501_v49, %v2525_v39  ;;  %v2572_v2 = vadd.f32 %v533_v52, %v531_v50  ;;  %s2719_s16 = sld [smem:[#allocation7 + $0xb]] }
  0xa6   : > { %1916 = vtanh.f32 %v435_v46  ;;  %v378_v3 = vstv %s2521_s9  ;;  %v405_v4 = vstv %s2523_s11  ;;  %v409_v6 = vstv %s2528_s17  ;;  %s2726_s9 = sld [smem:[#allocation9 + $0x19]]  ;;  %s2735_s11 = sld [smem:[#allocation9 + $0x1a]] }
  0xa7   : > { %v413_v7 = vstv %s2530_s18  ;;  %v328_v9 = vmul.f32 0.5, %v2449_v53  ;;  %v440_v10 = vstv %s2533_s0  ;;  %v444_v11 = vstv %s2535_s7  ;;  %s2716_s0 = sld [smem:[#allocation9 + $0x18]]  ;;  %s2745_s17 = sld [smem:[#allocation7 + $0xc]] }
  0xa8   : > { %v469_v12 = vadd.f32 %v468_v59, %v2491_v20  ;;  %v360_v13 = vmul.f32 0.5, %v2451_v54  ;;  %v566_v14 = vadd.f32 %v565_v63, %v562_v62  ;;  %v592_v15 = vstv %s2541_s1  ;;  %s2606_s1 = sld [smem:[#allocation3 + $0x1b]]  ;;  %s2747_s18 = sld [smem:[#allocation3 + $0x27]] }
  0xa9   : > { %v595_v16 = vstv %s2543_s28  ;;  %v448_v17 = vstv %s2545_s2  ;;  %v503_v21 = vmul.f32 0.044715, %v502_v1  ;;  %v536_v53 = vmul.f32 %v2572_v2, %v2572_v2  ;;  %s2611_s28 = sld [smem:[#allocation3 + $0x1c]]  ;;  %s2737_s2 = sld [smem:[#allocation9 + $0x1b]] }
  0xaa   : > { %v568_v24 = vstv %s2550_s27  ;;  %v395_v54 = vmul.f32 0.5, %v2457_v57  ;;  %v2603_v26 = vmul.f32 0.5, %v2459_v58  ;;  %v475_v27 = vstv %s2552_s4  ;;  %s2613_s27 = sld [smem:[#allocation3 + $0x1d]]  ;;  %s2753_s4 = sld [smem:[#allocation3 + $0x28]] }
  0xab   : > { %v470_v29 = vmul.f32 0.7978846, %v469_v12  ;;  %v479_v30 = vstv %s2557_s8  ;;  %v593_v31 = vmul.f32 %v592_v15, %v2417_v22  ;;  %v596_v32 = vmul.f32 %v595_v16, %v2382_v5  ;;  %s2755_s8 = sld [smem:[#allocation3 + $0x29]]  ;;  %s2778_s7 = sld [smem:[#allocation7 + $0xd]] }
  0xac   : > { %v2616_v57 = vmul.f32 0.5, %v2491_v20  ;;  %v483_v58 = vstv %s2561_s24  ;;  %v510_v33 = vstv %s2563_s26  ;;  %v2620_v34 = vadd.f32 %v568_v24, %v566_v14  ;;  %s2764_s24 = sld [smem:[#allocation9 + $0x1c]]  ;;  %s2791_s26 = sld [smem:[#allocation9 + $0x1d]] }
  0xad   : > { %v1911_v8 = vpop.eup %1910  ;;  %v504_v36 = vadd.f32 %v503_v21, %v2525_v39  ;;  %v514_v37 = vstv %s2568_s12  ;;  %v518_v38 = vstv %s2570_s15  ;;  %v537_v40 = vmul.f32 %v536_v53, %v2572_v2  ;;  %s2796_s12 = sld [smem:[#allocation9 + $0x1e]]  ;;  %s2801_s15 = sld [smem:[#allocation9 + $0x1f]] }
  0xae   : > { %v335_v25 = vadd.f32 1.0, %v1911_v8  ;;  %v1913_v28 = vpop.eup %1912  ;;  %v545_v43 = vstv %s2578_s22  ;;  %v599_v20 = vstv %s2580_s21  ;;  %1918 = vtanh.f32 %v470_v29  ;;  %s2642_s21 = sld [smem:[#allocation7 + $0x9]]  ;;  %s2836_s22 = sld [smem:[#allocation3 + $0x2d]] }
  0xaf   : > { %v1915_v35 = vpop.eup %1914  ;;  %v367_v42 = vadd.f32 1.0, %v1913_v28  ;;  %v2631_v45 = vmul.f32 0.5, %v2525_v39  ;;  %v549_v46 = vstv %s2586_s25  ;;  %v597_v47 = vadd.f32 %v596_v32, %v593_v31  ;;  %s2838_s25 = sld [smem:[#allocation3 + $0x2e]] }
  0xb0   : > { %v336_v41 = vmul.f32 %v335_v25, %v328_v9  ;;  %v1917_v44 = vpop.eup %1916  ;;  %v402_v48 = vadd.f32 1.0, %v1915_v35  ;;  %v553_v49 = vstv %s2589_s30  ;;  %v571_v50 = vmul.f32 %v2620_v34, %v2620_v34  ;;  %s2853_s30 = sld [smem:[#allocation9 + $0x24]] }
  0xb1   : > { %v600_v51 = vmul.f32 %v599_v20, %v2420_v23  ;;  %v505_v39 = vmul.f32 0.7978846, %v504_v36  ;;  %v538_v52 = vmul.f32 0.044715, %v537_v40  ;;  %v580_v59 = vstv %s2597_s20  ;;  %s2873_s20 = sld [smem:[#allocation7 + $0xf]] }
  0xb2   : > { %v584_v62 = vstv %s2599_s5  ;;  %v339_v63 = vmul.f32 %v338_v55, %v336_v41  ;;  %v342_v1 = vmul.f32 %v341_v56, %v336_v41  ;;  %v368_v8 = vmul.f32 %v367_v42, %v360_v13  ;;  %s2880_s5 = sld [smem:[#allocation3 + $0x32]] }
  0xb3   : > { %v437_v9 = vadd.f32 1.0, %v1917_v44  ;;  %v601_v12 = vadd.f32 %v600_v51, %v597_v47  ;;  %v627_v14 = vstv %s2606_s1  ;;  %v630_v15 = vstv %s2611_s28  ;;  %s2780_s1 = sld [smem:[#allocation3 + $0x2a]]  ;;  %s2787_s28 = sld [smem:[#allocation3 + $0x2b]] }
  0xb4   : > { %v634_v16 = vstv %s2613_s27  ;;  %v403_v21 = vmul.f32 %v402_v48, %v395_v54  ;;  %v572_v53 = vmul.f32 %v571_v50, %v2620_v34  ;;  %v603_v24 = vstv %s2622_s10  ;;  %s2671_s10 = sld [smem:[#allocation3 + $0x21]]  ;;  %s2789_s27 = sld [smem:[#allocation3 + $0x2c]] }
  0xb5   : > { %v628_v55 = vmul.f32 %v627_v14, %v2417_v22  ;;  %v345_v56 = vmul.f32 %v344_v60, %v336_v41  ;;  %v539_v13 = vadd.f32 %v538_v52, %v2572_v2  ;;  %v631_v25 = vmul.f32 %v630_v15, %v2382_v5 }
  0xb6   : > { %v635_v28 = vmul.f32 %v634_v16, %v2420_v23  ;;  %v371_v54 = vmul.f32 %v370_v61, %v368_v8  ;;  %v375_v29 = vmul.f32 %v374_v0, %v368_v8  ;;  %v379_v31 = vmul.f32 %v378_v3, %v368_v8 }
  0xb7   : > { %1920 = vtanh.f32 %v505_v39  ;;  %v2675_v60 = vadd.f32 %v603_v24, %v601_v12  ;;  %v632_v32 = vadd.f32 %v631_v25, %v628_v55  ;;  %v662_v35 = vstv %s2634_s3  ;;  %s2704_s3 = sld [smem:[#allocation3 + $0x24]] }
  0xb8   : > { %v665_v36 = vstv %s2636_s23  ;;  %v406_v40 = vmul.f32 %v405_v4, %v403_v21  ;;  %v438_v61 = vmul.f32 %v437_v9, %v2603_v26  ;;  %v573_v41 = vmul.f32 0.044715, %v572_v53  ;;  %v1919_v3 = vpop.eup %1918  ;;  %s2695_s23 = sld [smem:[#allocation3 + $0x23]] }
  0xb9   : > { %v638_v0 = vstv %s2642_s21  ;;  %v540_v42 = vmul.f32 0.7978846, %v539_v13  ;;  %v636_v20 = vadd.f32 %v635_v28, %v632_v32  ;;  %v663_v44 = vmul.f32 %v662_v35, %v2417_v22  ;;  %s2803_s21 = sld [smem:[#allocation9 + $0x20]] }
  0xba   : > { %v666_v47 = vmul.f32 %v665_v36, %v2382_v5  ;;  %v372_v48 = vadd.f32 %v371_v54, %v339_v63  ;;  %v376_v50 = vadd.f32 %v375_v29, %v342_v1  ;;  %v410_v51 = vmul.f32 %v409_v6, %v403_v21 }
  0xbb   : > { %v669_v4 = vstv %s2650_s19  ;;  %v606_v26 = vmul.f32 %v2675_v60, %v2675_v60  ;;  %v2692_v39 = vadd.f32 %v638_v0, %v636_v20  ;;  %v380_v9 = vadd.f32 %v379_v31, %v345_v56  ;;  %s2709_s19 = sld [smem:[#allocation3 + $0x25]] }
  0xbc   : > { %v667_v52 = vadd.f32 %v666_v47, %v663_v44  ;;  %v670_v8 = vmul.f32 %v669_v4, %v2420_v23  ;;  %v414_v63 = vmul.f32 %v413_v7, %v403_v21  ;;  %v472_v1 = vadd.f32 1.0, %v1919_v3 }
  0xbd   : > { %v574_v6 = vadd.f32 %v573_v41, %v2620_v34  ;;  %v441_v12 = vmul.f32 %v440_v10, %v438_v61  ;;  %1922 = vtanh.f32 %v540_v42  ;;  %v641_v14 = vmul.f32 %v2692_v39, %v2692_v39 }
  0xbe   : > { %v671_v15 = vadd.f32 %v670_v8, %v667_v52  ;;  %v407_v16 = vadd.f32 %v406_v40, %v372_v48  ;;  %v673_v53 = vstv %s2663_s6  ;;  %v697_v24 = vstv %s2671_s10  ;;  %s2819_s6 = sld [smem:[#allocation9 + $0x21]]  ;;  %s2821_s10 = sld [smem:[#allocation7 + $0xe]] }
  0xbf   : > { %v700_v55 = vstv %s2673_s13  ;;  %v411_v7 = vadd.f32 %v410_v51, %v376_v50  ;;  %v445_v10 = vmul.f32 %v444_v11, %v438_v61  ;;  %v607_v21 = vmul.f32 %v606_v26, %v2675_v60  ;;  %s2823_s13 = sld [smem:[#allocation9 + $0x22]] }
  0xc0   : > { %v698_v56 = vmul.f32 %v697_v24, %v2417_v22  ;;  %v473_v25 = vmul.f32 %v472_v1, %v2616_v57  ;;  %v575_v28 = vmul.f32 0.7978846, %v574_v6  ;;  %v588_v54 = vstv %s2682_s14  ;;  %s2883_s14 = sld [smem:[#allocation9 + $0x26]] }
  0xc1   : > { %v1921_v13 = vpop.eup %1920  ;;  %v701_v29 = vmul.f32 %v700_v55, %v2382_v5  ;;  %v415_v31 = vadd.f32 %v414_v63, %v380_v9  ;;  %v449_v11 = vmul.f32 %v448_v17, %v438_v61  ;;  %v642_v32 = vmul.f32 %v641_v14, %v2692_v39 }
  0xc2   : > { %v2729_v35 = vadd.f32 %v673_v53, %v671_v15  ;;  %v442_v36 = vadd.f32 %v441_v12, %v407_v16  ;;  %v535_v40 = vmul.f32 0.5, %v2572_v2  ;;  %v2733_v57 = vmul.f32 0.5, %v2620_v34 }
  0xc3   : > { %v702_v41 = vadd.f32 %v701_v29, %v698_v56  ;;  %v446_v0 = vadd.f32 %v445_v10, %v411_v7  ;;  %v507_v3 = vadd.f32 1.0, %v1921_v13  ;;  %v608_v42 = vmul.f32 0.044715, %v607_v21 }
  0xc4   : > { %v704_v17 = vstv %s2695_s23  ;;  %v476_v61 = vmul.f32 %v475_v27, %v473_v25  ;;  %v480_v2 = vmul.f32 %v479_v30, %v473_v25  ;;  %1924 = vtanh.f32 %v575_v28  ;;  %s2825_s23 = sld [smem:[#allocation9 + $0x23]] }
  0xc5   : > { %v705_v34 = vmul.f32 %v704_v17, %v2420_v23  ;;  %v450_v20 = vadd.f32 %v449_v11, %v415_v31  ;;  %v484_v44 = vmul.f32 %v483_v58, %v473_v25  ;;  %v643_v47 = vmul.f32 0.044715, %v642_v32 }
  0xc6   : > { %v676_v48 = vmul.f32 %v2729_v35, %v2729_v35  ;;  %v732_v30 = vstv %s2704_s3  ;;  %v735_v50 = vstv %s2709_s19  ;;  %v739_v51 = vstv %s2711_s29  ;;  %s2855_s3 = sld [smem:[#allocation3 + $0x2f]]  ;;  %s2857_s19 = sld [smem:[#allocation9 + $0x25]] }
  0xc7   : > { %v706_v27 = vadd.f32 %v705_v34, %v702_v41  ;;  %v1923_v4 = vpop.eup %1922  ;;  %v508_v26 = vmul.f32 %v507_v3, %v2631_v45  ;;  %v609_v52 = vadd.f32 %v608_v42, %v2675_v60  ;;  %v615_v58 = vstv %s2716_s0  ;;  %s2865_s29 = sld [smem:[#allocation3 + $0x30]]  ;;  %s2941_s0 = sld [smem:[#allocation7 + $0x11]] }
  0xc8   : > { %v708_v8 = vstv %s2719_s16  ;;  %v477_v9 = vadd.f32 %v476_v61, %v442_v36  ;;  %v481_v63 = vadd.f32 %v480_v2, %v446_v0  ;;  %v733_v1 = vmul.f32 %v732_v30, %v2417_v22  ;;  %s2867_s16 = sld [smem:[#allocation3 + $0x31]] }
  0xc9   : > { %v736_v6 = vmul.f32 %v735_v50, %v2382_v5  ;;  %v485_v12 = vadd.f32 %v484_v44, %v450_v20  ;;  %v619_v14 = vstv %s2726_s9  ;;  %v677_v45 = vmul.f32 %v676_v48, %v2729_v35  ;;  %s2943_s9 = sld [smem:[#allocation3 + $0x36]] }
  0xca   : > { %v740_v15 = vmul.f32 %v739_v51, %v2420_v23  ;;  %v542_v16 = vadd.f32 1.0, %v1923_v4  ;;  %v644_v53 = vadd.f32 %v643_v47, %v2692_v39  ;;  %v2772_v24 = vadd.f32 %v708_v8, %v706_v27 }
  0xcb   : > { %v737_v55 = vadd.f32 %v736_v6, %v733_v1  ;;  %v511_v7 = vmul.f32 %v510_v33, %v508_v26  ;;  %v610_v10 = vmul.f32 0.7978846, %v609_v52  ;;  %v623_v21 = vstv %s2735_s11  ;;  %s2967_s11 = sld [smem:[#allocation9 + $0x2b]] }
  0xcc   : > { %v650_v56 = vstv %s2737_s2  ;;  %v515_v13 = vmul.f32 %v514_v37, %v508_v26  ;;  %v519_v25 = vmul.f32 %v518_v38, %v508_v26  ;;  %v743_v29 = vstv %s2745_s17  ;;  %s2893_s17 = sld [smem:[#allocation9 + $0x27]]  ;;  %s2969_s2 = sld [smem:[#allocation9 + $0x2c]] }
  0xcd   : > { %v741_v28 = vadd.f32 %v740_v15, %v737_v55  ;;  %v678_v33 = vmul.f32 0.044715, %v677_v45  ;;  %v767_v31 = vstv %s2747_s18  ;;  %v770_v11 = vstv %s2753_s4  ;;  %s2895_s18 = sld [smem:[#allocation9 + $0x28]] }
  0xce   : > { %v774_v32 = vstv %s2755_s8  ;;  %v1925_v36 = vpop.eup %1924  ;;  %v543_v41 = vmul.f32 %v542_v16, %v535_v40  ;;  %v645_v0 = vmul.f32 0.7978846, %v644_v53  ;;  %v711_v37 = vmul.f32 %v2772_v24, %v2772_v24  ;;  %s2904_s4 = sld [smem:[#allocation7 + $0x10]]  ;;  %s2908_s8 = sld [smem:[#allocation3 + $0x33]] }
  0xcf   : > { %v768_v38 = vmul.f32 %v767_v31, %v2417_v22  ;;  %1926 = vtanh.f32 %v610_v10  ;;  %v2805_v3 = vadd.f32 %v743_v29, %v741_v28  ;;  %v771_v42 = vmul.f32 %v770_v11, %v2382_v5 }
  0xd0   : > { %v775_v40 = vmul.f32 %v774_v32, %v2420_v23  ;;  %v512_v17 = vadd.f32 %v511_v7, %v477_v9  ;;  %v516_v61 = vadd.f32 %v515_v13, %v481_v63  ;;  %v2810_v2 = vmul.f32 0.5, %v2675_v60 }
  0xd1   : > { %v654_v34 = vstv %s2764_s24  ;;  %v520_v20 = vadd.f32 %v519_v25, %v485_v12  ;;  %v577_v44 = vadd.f32 1.0, %v1925_v36  ;;  %v679_v47 = vadd.f32 %v678_v33, %v2729_v35  ;;  %s2984_s24 = sld [smem:[#allocation9 + $0x2d]] }
  0xd2   : > { %v772_v48 = vadd.f32 %v771_v42, %v768_v38  ;;  %v546_v27 = vmul.f32 %v545_v43, %v543_v41  ;;  %v550_v30 = vmul.f32 %v549_v46, %v543_v41  ;;  %1928 = vtanh.f32 %v645_v0 }
  0xd3   : > { %v712_v50 = vmul.f32 %v711_v37, %v2772_v24  ;;  %v746_v60 = vmul.f32 %v2805_v3, %v2805_v3  ;;  %v778_v43 = vstv %s2778_s7  ;;  %v802_v4 = vstv %s2780_s1  ;;  %s2917_s7 = sld [smem:[#allocation3 + $0x34]]  ;;  %s2919_s1 = sld [smem:[#allocation9 + $0x29]] }
  0xd4   : > { %v776_v51 = vadd.f32 %v775_v40, %v772_v48  ;;  %v554_v46 = vmul.f32 %v553_v49, %v543_v41  ;;  %v803_v26 = vmul.f32 %v802_v4, %v2417_v22  ;;  %v805_v52 = vstv %s2787_s28  ;;  %s2929_s28 = sld [smem:[#allocation3 + $0x35]] }
  0xd5   : > { %v809_v8 = vstv %s2789_s27  ;;  %v578_v9 = vmul.f32 %v577_v44, %v2733_v57  ;;  %v658_v63 = vstv %s2791_s26  ;;  %v680_v1 = vmul.f32 0.7978846, %v679_v47  ;;  %s2948_s27 = sld [smem:[#allocation3 + $0x37]]  ;;  %s2993_s26 = sld [smem:[#allocation3 + $0x39]] }
  0xd6   : > { %v806_v6 = vmul.f32 %v805_v52, %v2382_v5  ;;  %v685_v12 = vstv %s2796_s12  ;;  %v713_v45 = vmul.f32 0.044715, %v712_v50  ;;  %v2844_v49 = vadd.f32 %v778_v43, %v776_v51  ;;  %s3008_s12 = sld [smem:[#allocation9 + $0x2e]] }
  0xd7   : > { %v810_v15 = vmul.f32 %v809_v8, %v2420_v23  ;;  %v2848_v16 = vmul.f32 0.5, %v2692_v39  ;;  %v689_v53 = vstv %s2801_s15  ;;  %v693_v55 = vstv %s2803_s21  ;;  %s3010_s15 = sld [smem:[#allocation9 + $0x2f]]  ;;  %s3019_s21 = sld [smem:[#allocation9 + $0x30]] }
  0xd8   : > { %v747_v57 = vmul.f32 %v746_v60, %v2805_v3  ;;  %v547_v7 = vadd.f32 %v546_v27, %v512_v17  ;;  %v551_v10 = vadd.f32 %v550_v30, %v516_v61  ;;  %v555_v13 = vadd.f32 %v554_v46, %v520_v20 }
  0xd9   : > { %v807_v25 = vadd.f32 %v806_v6, %v803_v26  ;;  %v1927_v28 = vpop.eup %1926  ;;  %v581_v39 = vmul.f32 %v580_v59, %v578_v9  ;;  %v585_v29 = vmul.f32 %v584_v62, %v578_v9  ;;  %v589_v33 = vmul.f32 %v588_v54, %v578_v9 }
  0xda   : > { %1930 = vtanh.f32 %v680_v1  ;;  %v714_v31 = vadd.f32 %v713_v45, %v2772_v24  ;;  %v781_v11 = vmul.f32 %v2844_v49, %v2844_v49  ;;  %v813_v36 = vstv %s2821_s10  ;;  %s3698_s10 = sld [smem:[#allocation27_spill]] }
  0xdb   : > { %v811_v32 = vadd.f32 %v810_v15, %v807_v25  ;;  %v2876_v59 = vmul.f32 0.5, %v2729_v35  ;;  %v720_v62 = vstv %s2819_s6  ;;  %v724_v54 = vstv %s2823_s13  ;;  %s3065_s6 = sld [smem:[#allocation9 + $0x33]]  ;;  %s3067_s13 = sld [smem:[#allocation9 + $0x34]] }
  0xdc   : > { %v748_v41 = vmul.f32 0.044715, %v747_v57  ;;  %v1929_v0 = vpop.eup %1928  ;;  %v612_v37 = vadd.f32 1.0, %v1927_v28  ;;  %v728_v38 = vstv %s2825_s23  ;;  %v837_v42 = vstv %s2836_s22  ;;  %s2950_s22 = sld [smem:[#allocation3 + $0x38]]  ;;  %s3071_s23 = sld [smem:[#allocation7 + $0x14]] }
  0xdd   : > { %v840_v40 = vstv %s2838_s25  ;;  %v582_v17 = vadd.f32 %v581_v39, %v547_v7  ;;  %v586_v61 = vadd.f32 %v585_v29, %v551_v10  ;;  %v2887_v20 = vadd.f32 %v813_v36, %v811_v32  ;;  %s2956_s25 = sld [smem:[#allocation9 + $0x2a]] }
  0xde   : > { %v838_v35 = vmul.f32 %v837_v42, %v2417_v22  ;;  %v2890_v44 = vadd.f32 %v589_v33, %v555_v13  ;;  %v715_v47 = vmul.f32 0.7978846, %v714_v31  ;;  %v782_v48 = vmul.f32 %v781_v11, %v2844_v49 }
  0xdf   : > { %v841_v27 = vmul.f32 %v840_v40, %v2382_v5  ;;  %v2899_v30 = vmul.f32 0.5, %v2772_v24  ;;  %v749_v50 = vadd.f32 %v748_v41, %v2805_v3  ;;  %v755_v60 = vstv %s2853_s30  ;;  %s3079_s30 = sld [smem:[#allocation3 + $0x3f]] }
  0xe0   : > { %v844_v51 = vstv %s2855_s3  ;;  %v613_v43 = vmul.f32 %v612_v37, %v2810_v2  ;;  %v647_v4 = vadd.f32 1.0, %v1929_v0  ;;  %v759_v46 = vstv %s2857_s19  ;;  %s2986_s3 = sld [smem:[#allocation7 + $0x12]]  ;;  %s3099_s19 = sld [smem:[#allocation3 + $0x41]] }
  0xe1   : > { %v842_v26 = vadd.f32 %v841_v27, %v838_v35  ;;  %v816_v24 = vmul.f32 %v2887_v20, %v2887_v20  ;;  %v845_v52 = vmul.f32 %v844_v51, %v2420_v23  ;;  %v872_v8 = vstv %s2865_s29  ;;  %s2995_s29 = sld [smem:[#allocation3 + $0x3a]] }
  0xe2   : > { %v875_v9 = vstv %s2867_s16  ;;  %1932 = vtanh.f32 %v715_v47  ;;  %v783_v1 = vmul.f32 0.044715, %v782_v48  ;;  %v848_v6 = vstv %s2873_s20  ;;  %s3000_s16 = sld [smem:[#allocation3 + $0x3b]] }
  0xe3   : > { %v873_v2 = vmul.f32 %v872_v8, %v2417_v22  ;;  %v750_v15 = vmul.f32 0.7978846, %v749_v50  ;;  %v846_v57 = vadd.f32 %v845_v52, %v842_v26  ;;  %v876_v7 = vmul.f32 %v875_v9, %v2382_v5  ;;  %s3029_s20 = sld [smem:[#allocation7 + $0x13]] }
  0xe4   : > { %v1931_v45 = vpop.eup %1930  ;;  %v879_v10 = vstv %s2880_s5  ;;  %v616_v13 = vmul.f32 %v615_v58, %v613_v43  ;;  %v620_v25 = vmul.f32 %v619_v14, %v613_v43  ;;  %v648_v28 = vmul.f32 %v647_v4, %v2848_v16  ;;  %s3031_s5 = sld [smem:[#allocation3 + $0x3c]] }
  0xe5   : > { %v763_v39 = vstv %s2883_s14  ;;  %v817_v29 = vmul.f32 %v816_v24, %v2887_v20  ;;  %v2932_v33 = vadd.f32 %v848_v6, %v846_v57  ;;  %v877_v31 = vadd.f32 %v876_v7, %v873_v2  ;;  %s3107_s14 = sld [smem:[#allocation9 + $0x36]] }
  0xe6   : > { %v880_v5 = vmul.f32 %v879_v10, %v2420_v23  ;;  %v682_v11 = vadd.f32 1.0, %v1931_v45  ;;  %v784_v58 = vadd.f32 %v783_v1, %v2844_v49  ;;  %v790_v14 = vstv %s2893_s17  ;;  %s3123_s17 = sld [smem:[#allocation3 + $0x43]] }
  0xe7   : > { %v794_v32 = vstv %s2895_s18  ;;  %1934 = vtanh.f32 %v750_v15  ;;  %v851_v16 = vmul.f32 %v2932_v33, %v2932_v33  ;;  %v883_v41 = vstv %s2904_s4  ;;  %s3035_s4 = sld [smem:[#allocation3 + $0x3d]]  ;;  %s3128_s18 = sld [smem:[#allocation3 + $0x44]] }
  0xe8   : > { %v881_v36 = vadd.f32 %v880_v5, %v877_v31  ;;  %v617_v0 = vadd.f32 %v616_v13, %v582_v17  ;;  %v621_v37 = vadd.f32 %v620_v25, %v586_v61  ;;  %v624_v42 = vmul.f32 %v623_v21, %v613_v43 }
  0xe9   : > { %v907_v40 = vstv %s2908_s8  ;;  %v651_v35 = vmul.f32 %v650_v56, %v648_v28  ;;  %v655_v47 = vmul.f32 %v654_v34, %v648_v28  ;;  %v818_v48 = vmul.f32 0.044715, %v817_v29  ;;  %v2973_v34 = vld [vmem:[%s3698_s10] sm:$0xff]  ;;  %s3040_s8 = sld [smem:[#allocation3 + $0x3e]]  ;;  %s3115_s10 = sld [smem:[#allocation9 + $0x37]] }
  0xea   : > { %v908_v17 = vmul.f32 %v907_v40, %v2417_v22  ;;  %v683_v61 = vmul.f32 %v682_v11, %v2876_v59  ;;  %v785_v21 = vmul.f32 0.7978846, %v784_v58  ;;  %v2960_v27 = vadd.f32 %v883_v41, %v881_v36 }
  0xeb   : > { %v910_v50 = vstv %s2917_s7  ;;  %v2964_v51 = vmul.f32 0.5, %v2805_v3  ;;  %v798_v43 = vstv %s2919_s1  ;;  %v852_v56 = vmul.f32 %v851_v16, %v2932_v33  ;;  %s3047_s7 = sld [smem:[#allocation9 + $0x31]]  ;;  %s3133_s1 = sld [smem:[#allocation7 + $0x15]] }
  0xec   : > { %v911_v4 = vmul.f32 %v2973_v34, %v910_v50  ;;  %v1933_v59 = vpop.eup %1932  ;;  %v625_v26 = vadd.f32 %v624_v42, %v2890_v44  ;;  %v659_v24 = vmul.f32 %v658_v63, %v648_v28  ;;  %v2980_v3 = vmul.f32 0.5, %v2844_v49 }
  0xed   : > { %v914_v52 = vstv %s2929_s28  ;;  %v652_v8 = vadd.f32 %v651_v35, %v617_v0  ;;  %v656_v9 = vadd.f32 %v655_v47, %v621_v37  ;;  %v819_v1 = vadd.f32 %v818_v48, %v2887_v20  ;;  %s3049_s28 = sld [smem:[#allocation9 + $0x32]] }
  0xee   : > { %v912_v6 = vadd.f32 %v911_v4, %v908_v17  ;;  %v686_v44 = vmul.f32 %v685_v12, %v683_v61  ;;  %1936 = vtanh.f32 %v785_v21  ;;  %v886_v63 = vmul.f32 %v2960_v27, %v2960_v27 }
  0xef   : > { %v915_v49 = vmul.f32 %v914_v52, %v2420_v23  ;;  %v690_v2 = vmul.f32 %v689_v53, %v683_v61  ;;  %v717_v45 = vadd.f32 1.0, %v1933_v59  ;;  %v853_v15 = vmul.f32 0.044715, %v852_v56 }
  0xf0   : > { %v918_v57 = vstv %s2941_s0  ;;  %v942_v7 = vstv %s2943_s9  ;;  %v945_v10 = vstv %s2948_s27  ;;  %v949_v13 = vstv %s2950_s22  ;;  %s3081_s0 = sld [smem:[#allocation3 + $0x40]]  ;;  %s3084_s9 = sld [smem:[#allocation9 + $0x35]] }
  0xf1   : > { %v916_v12 = vadd.f32 %v915_v49, %v912_v6  ;;  %v1935_v25 = vpop.eup %1934  ;;  %v660_v28 = vadd.f32 %v659_v24, %v625_v26  ;;  %v694_v29 = vmul.f32 %v693_v55, %v683_v61  ;;  %v820_v31 = vmul.f32 0.7978846, %v819_v1  ;;  %s3109_s27 = sld [smem:[#allocation3 + $0x42]]  ;;  %s3117_s22 = sld [smem:[#allocation9 + $0x38]] }
  0xf2   : > { %v825_v5 = vstv %s2956_s25  ;;  %v887_v53 = vmul.f32 %v886_v63, %v2960_v27  ;;  %v943_v58 = vmul.f32 %v942_v7, %v2417_v22  ;;  %v946_v16 = vmul.f32 %v2973_v34, %v945_v10  ;;  %s3172_s25 = sld [smem:[#allocation9 + $0x3b]] }
  0xf3   : > { %v3013_v11 = vadd.f32 %v918_v57, %v916_v12  ;;  %v687_v36 = vadd.f32 %v686_v44, %v652_v8  ;;  %v829_v41 = vstv %s2967_s11  ;;  %v833_v0 = vstv %s2969_s2  ;;  %s3185_s11 = sld [smem:[#allocation7 + $0x17]]  ;;  %s3187_s2 = sld [smem:[#allocation3 + $0x48]] }
  0xf4   : > { %v950_v55 = vmul.f32 %v949_v13, %v2420_v23  ;;  %v691_v37 = vadd.f32 %v690_v2, %v656_v9  ;;  %v718_v42 = vmul.f32 %v717_v45, %v2899_v30  ;;  %v752_v40 = vadd.f32 1.0, %v1935_v25 }
  0xf5   : > { %v854_v35 = vadd.f32 %v853_v15, %v2932_v33  ;;  %v695_v47 = vadd.f32 %v694_v29, %v660_v28  ;;  %v3025_v48 = vmul.f32 0.5, %v2887_v20  ;;  %v921_v17 = vmul.f32 %v3013_v11, %v3013_v11 }
  0xf6   : > { %v947_v61 = vadd.f32 %v946_v16, %v943_v58  ;;  %1938 = vtanh.f32 %v820_v31  ;;  %v860_v30 = vstv %s2984_s24  ;;  %v888_v21 = vmul.f32 0.044715, %v887_v53  ;;  %s3210_s24 = sld [smem:[#allocation9 + $0x3e]] }
  0xf7   : > { %v953_v50 = vstv %s2986_s3  ;;  %v977_v20 = vstv %s2993_s26  ;;  %v980_v4 = vstv %s2995_s29  ;;  %v984_v59 = vstv %s3000_s16  ;;  %s3140_s3 = sld [smem:[#allocation9 + $0x39]]  ;;  %s3142_s26 = sld [smem:[#allocation9 + $0x3a]] }
  0xf8   : > { %v951_v56 = vadd.f32 %v950_v55, %v947_v61  ;;  %v1937_v26 = vpop.eup %1936  ;;  %v721_v24 = vmul.f32 %v720_v62, %v718_v42  ;;  %v725_v52 = vmul.f32 %v724_v54, %v718_v42  ;;  %v753_v8 = vmul.f32 %v752_v40, %v2964_v51  ;;  %s3149_s29 = sld [smem:[#allocation3 + $0x45]]  ;;  %s3157_s16 = sld [smem:[#allocation3 + $0x46]] }
  0xf9   : > { %v855_v9 = vmul.f32 0.7978846, %v854_v35  ;;  %v922_v1 = vmul.f32 %v921_v17, %v3013_v11  ;;  %v978_v6 = vmul.f32 %v977_v20, %v2417_v22  ;;  %v981_v44 = vmul.f32 %v2973_v34, %v980_v4 }
  0xfa   : > { %v985_v63 = vmul.f32 %v984_v59, %v2420_v23  ;;  %v729_v62 = vmul.f32 %v728_v38, %v718_v42  ;;  %v864_v54 = vstv %s3008_s12  ;;  %v868_v51 = vstv %s3010_s15  ;;  %s3223_s12 = sld [smem:[#allocation7 + $0x18]]  ;;  %s3229_s15 = sld [smem:[#allocation9 + $0x3f]] }
  0xfb   : > { %v3059_v49 = vadd.f32 %v953_v50, %v951_v56  ;;  %v787_v2 = vadd.f32 1.0, %v1937_v26  ;;  %v889_v45 = vadd.f32 %v888_v21, %v2960_v27  ;;  %v895_v15 = vstv %s3019_s21  ;;  %s3240_s21 = sld [smem:[#allocation9 + $0x41]] }
  0xfc   : > { %v982_v57 = vadd.f32 %v981_v44, %v978_v6  ;;  %v722_v12 = vadd.f32 %v721_v24, %v687_v36  ;;  %v726_v7 = vadd.f32 %v725_v52, %v691_v37  ;;  %v756_v10 = vmul.f32 %v755_v60, %v753_v8 }
  0xfd   : > { %1940 = vtanh.f32 %v855_v9  ;;  %v923_v38 = vmul.f32 0.044715, %v922_v1  ;;  %v988_v25 = vstv %s3029_s20  ;;  %v1012_v28 = vstv %s3031_s5  ;;  %s3159_s20 = sld [smem:[#allocation3 + $0x47]]  ;;  %s3165_s5 = sld [smem:[#allocation7 + $0x16]] }
  0xfe   : > { %v986_v13 = vadd.f32 %v985_v63, %v982_v57  ;;  %v760_v29 = vmul.f32 %v759_v46, %v753_v8  ;;  %v956_v31 = vmul.f32 %v3059_v49, %v3059_v49  ;;  %v1013_v60 = vmul.f32 %v1012_v28, %v2417_v22 }
  0xff   : > { %v1015_v53 = vstv %s3035_s4  ;;  %v788_v58 = vmul.f32 %v787_v2, %v2980_v3  ;;  %v890_v16 = vmul.f32 0.7978846, %v889_v45  ;;  %v1019_v46 = vstv %s3040_s8  ;;  %s3195_s4 = sld [smem:[#allocation3 + $0x49]]  ;;  %s3197_s8 = sld [smem:[#allocation3 + $0x4a]] }
 0x100   : > { %v1016_v36 = vmul.f32 %v2973_v34, %v1015_v53  ;;  %v1939_v55 = vpop.eup %1938  ;;  %v730_v37 = vadd.f32 %v729_v62, %v695_v47  ;;  %v764_v42 = vmul.f32 %v763_v39, %v753_v8  ;;  %v3091_v40 = vmul.f32 0.5, %v2932_v33 }
 0x101   : > { %v3093_v35 = vadd.f32 %v988_v25, %v986_v13  ;;  %v899_v17 = vstv %s3047_s7  ;;  %v903_v61 = vstv %s3049_s28  ;;  %v924_v3 = vadd.f32 %v923_v38, %v3013_v11  ;;  %s3250_s7 = sld [smem:[#allocation3 + $0x4c]]  ;;  %s3258_s28 = sld [smem:[#allocation3 + $0x4d]] }
 0x102   : > { %v1020_v21 = vmul.f32 %v1019_v46, %v2420_v23  ;;  %v757_v50 = vadd.f32 %v756_v10, %v722_v12  ;;  %v3102_v47 = vmul.f32 0.5, %v2960_v27  ;;  %v957_v39 = vmul.f32 %v956_v31, %v3059_v49 }
 0x103   : > { %v1017_v33 = vadd.f32 %v1016_v36, %v1013_v60  ;;  %v761_v56 = vadd.f32 %v760_v29, %v726_v7  ;;  %v791_v20 = vmul.f32 %v790_v14, %v788_v58  ;;  %v822_v4 = vadd.f32 1.0, %v1939_v55 }
 0x104   : > { %1942 = vtanh.f32 %v890_v16  ;;  %v765_v59 = vadd.f32 %v764_v42, %v730_v37  ;;  %v795_v27 = vmul.f32 %v794_v32, %v788_v58  ;;  %v799_v26 = vmul.f32 %v798_v43, %v788_v58 }
 0x105   : > { %v991_v14 = vmul.f32 %v3093_v35, %v3093_v35  ;;  %v925_v24 = vmul.f32 0.7978846, %v924_v3  ;;  %v930_v52 = vstv %s3065_s6  ;;  %v934_v8 = vstv %s3067_s13  ;;  %s3282_s6 = sld [smem:[#allocation3 + $0x4f]]  ;;  %s3289_s13 = sld [smem:[#allocation3 + $0x50]] }
 0x106   : > { %v1021_v9 = vadd.f32 %v1020_v21, %v1017_v33  ;;  %v958_v6 = vmul.f32 0.044715, %v957_v39  ;;  %v1023_v44 = vstv %s3071_s23  ;;  %v1047_v32 = vstv %s3079_s30  ;;  %s3199_s23 = sld [smem:[#allocation9 + $0x3c]]  ;;  %s3201_s30 = sld [smem:[#allocation9 + $0x3d]] }
 0x107   : > { %v1941_v1 = vpop.eup %1940  ;;  %v1050_v63 = vstv %s3081_s0  ;;  %v792_v43 = vadd.f32 %v791_v20, %v757_v50  ;;  %v823_v62 = vmul.f32 %v822_v4, %v3025_v48  ;;  %v938_v2 = vstv %s3084_s9  ;;  %s3234_s0 = sld [smem:[#allocation9 + $0x40]]  ;;  %s3292_s9 = sld [smem:[#allocation9 + $0x43]] }
 0x108   : > { %v1048_v45 = vmul.f32 %v1047_v32, %v2417_v22  ;;  %v796_v57 = vadd.f32 %v795_v27, %v761_v56  ;;  %v800_v12 = vadd.f32 %v799_v26, %v765_v59  ;;  %v992_v7 = vmul.f32 %v991_v14, %v3093_v35 }
 0x109   : > { %v1051_v10 = vmul.f32 %v2973_v34, %v1050_v63  ;;  %v857_v38 = vadd.f32 1.0, %v1941_v1  ;;  %v3138_v13 = vmul.f32 0.5, %v3013_v11  ;;  %v3144_v48 = vadd.f32 %v1023_v44, %v1021_v9 }
 0x10a   : > { %v1054_v25 = vstv %s3099_s19  ;;  %1944 = vtanh.f32 %v925_v24  ;;  %v959_v28 = vadd.f32 %v958_v6, %v3059_v49  ;;  %v826_v11 = vmul.f32 %v825_v5, %v823_v62  ;;  %s3237_s19 = sld [smem:[#allocation3 + $0x4b]] }
 0x10b   : > { %v1052_v29 = vadd.f32 %v1051_v10, %v1048_v45  ;;  %v1055_v31 = vmul.f32 %v1054_v25, %v2420_v23  ;;  %v830_v60 = vmul.f32 %v829_v41, %v823_v62  ;;  %v965_v53 = vstv %s3107_s14  ;;  %s3328_s14 = sld [smem:[#allocation9 + $0x45]] }
 0x10c   : > { %v1082_v58 = vstv %s3109_s27  ;;  %v834_v16 = vmul.f32 %v833_v0, %v823_v62  ;;  %v969_v36 = vstv %s3115_s10  ;;  %v973_v46 = vstv %s3117_s22  ;;  %s3263_s27 = sld [smem:[#allocation9 + $0x42]]  ;;  %s3336_s10 = sld [smem:[#allocation9 + $0x46]] }
 0x10d   : > { %v993_v55 = vmul.f32 0.044715, %v992_v7  ;;  %v858_v5 = vmul.f32 %v857_v38, %v3091_v40  ;;  %v1026_v41 = vmul.f32 %v3144_v48, %v3144_v48  ;;  %v1083_v42 = vmul.f32 %v1082_v58, %v2417_v22  ;;  %s3338_s22 = sld [smem:[#allocation9 + $0x47]] }
 0x10e   : > { %v1943_v37 = vpop.eup %1942  ;;  %v1085_v3 = vstv %s3123_s17  ;;  %v960_v21 = vmul.f32 0.7978846, %v959_v28  ;;  %v1056_v0 = vadd.f32 %v1055_v31, %v1052_v29  ;;  %v1089_v39 = vstv %s3128_s18  ;;  %s3269_s17 = sld [smem:[#allocation7 + $0x19]]  ;;  %s3271_s18 = sld [smem:[#allocation3 + $0x4e]] }
 0x10f   : > { %v1086_v50 = vmul.f32 %v2973_v34, %v1085_v3  ;;  %v827_v33 = vadd.f32 %v826_v11, %v792_v43  ;;  %v831_v56 = vadd.f32 %v830_v60, %v796_v57  ;;  %v1058_v40 = vstv %s3133_s1  ;;  %s3294_s1 = sld [smem:[#allocation9 + $0x44]] }
 0x110   : > { %v1090_v20 = vmul.f32 %v1089_v39, %v2420_v23  ;;  %v835_v4 = vadd.f32 %v834_v16, %v800_v12  ;;  %v892_v59 = vadd.f32 1.0, %v1943_v37  ;;  %v3179_v27 = vmul.f32 0.5, %v3059_v49 }
 0x111   : > { %v994_v26 = vadd.f32 %v993_v55, %v3093_v35  ;;  %v1000_v14 = vstv %s3140_s3  ;;  %v1004_v24 = vstv %s3142_s26  ;;  %v1027_v9 = vmul.f32 %v1026_v41, %v3144_v48  ;;  %s3359_s3 = sld [smem:[#allocation3 + $0x55]]  ;;  %s3376_s26 = sld [smem:[#allocation3 + $0x56]] }
 0x112   : > { %v1087_v1 = vadd.f32 %v1086_v50, %v1083_v42  ;;  %v861_v6 = vmul.f32 %v860_v30, %v858_v5  ;;  %v865_v49 = vmul.f32 %v864_v54, %v858_v5  ;;  %1946 = vtanh.f32 %v960_v21 }
 0x113   : > { %v3193_v44 = vadd.f32 %v1058_v40, %v1056_v0  ;;  %v1117_v63 = vstv %s3149_s29  ;;  %v1120_v43 = vstv %s3157_s16  ;;  %v1124_v62 = vstv %s3159_s20  ;;  %s3305_s29 = sld [smem:[#allocation7 + $0x1a]]  ;;  %s3309_s16 = sld [smem:[#allocation3 + $0x51]] }
 0x114   : > { %v1091_v32 = vadd.f32 %v1090_v20, %v1087_v1  ;;  %v1945_v30 = vpop.eup %1944  ;;  %v869_v45 = vmul.f32 %v868_v51, %v858_v5  ;;  %v893_v54 = vmul.f32 %v892_v59, %v3102_v47  ;;  %v995_v57 = vmul.f32 0.7978846, %v994_v26  ;;  %s3316_s20 = sld [smem:[#allocation3 + $0x52]] }
 0x115   : > { %v1093_v12 = vstv %s3165_s5  ;;  %v1028_v7 = vmul.f32 0.044715, %v1027_v9  ;;  %v1118_v10 = vmul.f32 %v1117_v63, %v2417_v22  ;;  %v1121_v38 = vmul.f32 %v2973_v34, %v1120_v43  ;;  %s3318_s5 = sld [smem:[#allocation3 + $0x53]] }
 0x116   : > { %v1125_v25 = vmul.f32 %v1124_v62, %v2420_v23  ;;  %v862_v28 = vadd.f32 %v861_v6, %v827_v33  ;;  %v3216_v29 = vmul.f32 0.5, %v3093_v35  ;;  %v1008_v51 = vstv %s3172_s25  ;;  %s3387_s25 = sld [smem:[#allocation7 + $0x1c]] }
 0x117   : > { %v1061_v47 = vmul.f32 %v3193_v44, %v3193_v44  ;;  %v866_v31 = vadd.f32 %v865_v49, %v831_v56  ;;  %v927_v11 = vadd.f32 1.0, %v1945_v30  ;;  %v3221_v60 = vadd.f32 %v1093_v12, %v1091_v32 }
 0x118   : > { %v1122_v58 = vadd.f32 %v1121_v38, %v1118_v10  ;;  %v870_v16 = vadd.f32 %v869_v45, %v835_v4  ;;  %v896_v55 = vmul.f32 %v895_v15, %v893_v54  ;;  %v900_v35 = vmul.f32 %v899_v17, %v893_v54 }
 0x119   : > { %1948 = vtanh.f32 %v995_v57  ;;  %v904_v37 = vmul.f32 %v903_v61, %v893_v54  ;;  %v1029_v5 = vadd.f32 %v1028_v7, %v3144_v48  ;;  %v1128_v42 = vstv %s3185_s11  ;;  %s3344_s11 = sld [smem:[#allocation7 + $0x1b]] }
 0x11a   : > { %v1126_v41 = vadd.f32 %v1125_v25, %v1122_v58  ;;  %v1062_v3 = vmul.f32 %v1061_v47, %v3193_v44  ;;  %v1152_v15 = vstv %s3187_s2  ;;  %v1155_v17 = vstv %s3195_s4  ;;  %s3350_s2 = sld [smem:[#allocation3 + $0x54]]  ;;  %s3364_s4 = sld [smem:[#allocation9 + $0x48]] }
 0x11b   : > { %v1159_v21 = vstv %s3197_s8  ;;  %v928_v0 = vmul.f32 %v927_v11, %v3138_v13  ;;  %v1035_v50 = vstv %s3199_s23  ;;  %v1039_v61 = vstv %s3201_s30  ;;  %s3366_s8 = sld [smem:[#allocation9 + $0x49]]  ;;  %s3424_s30 = sld [smem:[#allocation7 + $0x1d]] }
 0x11c   : > { %v1096_v39 = vmul.f32 %v3221_v60, %v3221_v60  ;;  %v1947_v33 = vpop.eup %1946  ;;  %v3252_v56 = vadd.f32 %v1128_v42, %v1126_v41  ;;  %v1153_v40 = vmul.f32 %v1152_v15, %v2417_v22  ;;  %v1156_v20 = vmul.f32 %v2973_v34, %v1155_v17  ;;  %s3413_s23 = sld [smem:[#allocation3 + $0x59]] }
 0x11d   : > { %v1160_v4 = vmul.f32 %v1159_v21, %v2420_v23  ;;  %v897_v59 = vadd.f32 %v896_v55, %v862_v28  ;;  %v901_v13 = vadd.f32 %v900_v35, %v866_v31  ;;  %v1030_v26 = vmul.f32 0.7978846, %v1029_v5 }
 0x11e   : > { %v1043_v9 = vstv %s3210_s24  ;;  %v905_v1 = vadd.f32 %v904_v37, %v870_v16  ;;  %v3261_v6 = vmul.f32 0.5, %v3144_v48  ;;  %v1063_v49 = vmul.f32 0.044715, %v1062_v3  ;;  %s3426_s24 = sld [smem:[#allocation3 + $0x5a]] }
 0x11f   : > { %v1157_v32 = vadd.f32 %v1156_v20, %v1153_v40  ;;  %v931_v63 = vmul.f32 %v930_v52, %v928_v0  ;;  %v962_v43 = vadd.f32 1.0, %v1947_v33  ;;  %v1097_v62 = vmul.f32 %v1096_v39, %v3221_v60 }
 0x120   : > { %v1163_v30 = vstv %s3223_s12  ;;  %v935_v48 = vmul.f32 %v934_v8, %v928_v0  ;;  %v939_v45 = vmul.f32 %v938_v2, %v928_v0  ;;  %v1131_v54 = vmul.f32 %v3252_v56, %v3252_v56  ;;  %s3382_s12 = sld [smem:[#allocation9 + $0x4a]] }
 0x121   : > { %v1161_v57 = vadd.f32 %v1160_v4, %v1157_v32  ;;  %1950 = vtanh.f32 %v1030_v26  ;;  %v1070_v52 = vstv %s3229_s15  ;;  %v1074_v12 = vstv %s3234_s0  ;;  %s3456_s15 = sld [smem:[#allocation3 + $0x5d]]  ;;  %s3460_s0 = sld [smem:[#allocation7 + $0x1e]] }
 0x122   : > { %v1187_v7 = vstv %s3237_s19  ;;  %v1064_v38 = vadd.f32 %v1063_v49, %v3193_v44  ;;  %v1078_v25 = vstv %s3240_s21  ;;  %v932_v2 = vadd.f32 %v931_v63, %v897_v59  ;;  %s3392_s19 = sld [smem:[#allocation3 + $0x57]]  ;;  %s3465_s21 = sld [smem:[#allocation3 + $0x5e]] }
 0x123   : > { %v1949_v10 = vpop.eup %1948  ;;  %v3286_v28 = vadd.f32 %v1163_v30, %v1161_v57  ;;  %v1188_v8 = vmul.f32 %v1187_v7, %v2417_v22  ;;  %v963_v47 = vmul.f32 %v962_v43, %v3179_v27  ;;  %v1098_v31 = vmul.f32 0.044715, %v1097_v62 }
 0x124   : > { %v1190_v11 = vstv %s3250_s7  ;;  %v936_v58 = vadd.f32 %v935_v48, %v901_v13  ;;  %v940_v16 = vadd.f32 %v939_v45, %v905_v1  ;;  %v1132_v55 = vmul.f32 %v1131_v54, %v3252_v56  ;;  %s3394_s7 = sld [smem:[#allocation3 + $0x58]] }
 0x125   : > { %v1191_v35 = vmul.f32 %v2973_v34, %v1190_v11  ;;  %v997_v37 = vadd.f32 1.0, %v1949_v10  ;;  %v3300_v5 = vmul.f32 0.5, %v3193_v44  ;;  %v1166_v27 = vmul.f32 %v3286_v28, %v3286_v28 }
 0x126   : > { %v1194_v41 = vstv %s3258_s28  ;;  %v1065_v42 = vmul.f32 0.7978846, %v1064_v38  ;;  %v1105_v3 = vstv %s3263_s27  ;;  %v966_v21 = vmul.f32 %v965_v53, %v963_v47  ;;  %s3403_s28 = sld [smem:[#allocation9 + $0x4b]]  ;;  %s3481_s27 = sld [smem:[#allocation9 + $0x4d]] }
 0x127   : > { %v1192_v15 = vadd.f32 %v1191_v35, %v1188_v8  ;;  %v1195_v17 = vmul.f32 %v1194_v41, %v2420_v23  ;;  %v1099_v44 = vadd.f32 %v1098_v31, %v3221_v60  ;;  %v1198_v0 = vstv %s3269_s17  ;;  %s3407_s17 = sld [smem:[#allocation9 + $0x4c]] }
 0x128   : > { %v1222_v39 = vstv %s3271_s18  ;;  %v970_v33 = vmul.f32 %v969_v36, %v963_v47  ;;  %v1133_v40 = vmul.f32 0.044715, %v1132_v55  ;;  %v974_v59 = vmul.f32 %v973_v46, %v963_v47  ;;  %s3428_s18 = sld [smem:[#allocation3 + $0x5b]] }
 0x129   : > { %v1196_v20 = vadd.f32 %v1195_v17, %v1192_v15  ;;  %v1223_v4 = vmul.f32 %v1222_v39, %v2417_v22  ;;  %v998_v53 = vmul.f32 %v997_v37, %v3216_v29  ;;  %v1167_v13 = vmul.f32 %v1166_v27, %v3286_v28 }
 0x12a   : > { %v1225_v26 = vstv %s3282_s6  ;;  %1952 = vtanh.f32 %v1065_v42  ;;  %v1229_v36 = vstv %s3289_s13  ;;  %v1100_v63 = vmul.f32 0.7978846, %v1099_v44  ;;  %s3436_s6 = sld [smem:[#allocation3 + $0x5c]]  ;;  %s3476_s13 = sld [smem:[#allocation3 + $0x5f]] }
 0x12b   : > { %v3330_v1 = vadd.f32 %v1198_v0, %v1196_v20  ;;  %v1226_v49 = vmul.f32 %v2973_v34, %v1225_v26  ;;  %v1951_v32 = vpop.eup %1950  ;;  %v1109_v43 = vstv %s3292_s9  ;;  %v1113_v62 = vstv %s3294_s1  ;;  %s3490_s9 = sld [smem:[#allocation7 + $0x1f]]  ;;  %s3495_s1 = sld [smem:[#allocation9 + $0x4e]] }
 0x12c   : > { %v1230_v46 = vmul.f32 %v1229_v36, %v2420_v23  ;;  %v967_v29 = vadd.f32 %v966_v21, %v932_v2  ;;  %v1134_v30 = vadd.f32 %v1133_v40, %v3252_v56  ;;  %v971_v54 = vadd.f32 %v970_v33, %v936_v58 }
 0x12d   : > { %v1201_v48 = vmul.f32 %v3330_v1, %v3330_v1  ;;  %v1227_v45 = vadd.f32 %v1226_v49, %v1223_v4  ;;  %v975_v57 = vadd.f32 %v974_v59, %v940_v16  ;;  %v1168_v7 = vmul.f32 0.044715, %v1167_v13 }
 0x12e   : > { %v1233_v10 = vstv %s3305_s29  ;;  %v1001_v38 = vmul.f32 %v1000_v14, %v998_v53  ;;  %v1032_v8 = vadd.f32 1.0, %v1951_v32  ;;  %1954 = vtanh.f32 %v1100_v63  ;;  %s3504_s29 = sld [smem:[#allocation9 + $0x4f]] }
 0x12f   : > { %v1202_v2 = vmul.f32 %v1201_v48, %v3330_v1  ;;  %v1231_v47 = vadd.f32 %v1230_v46, %v1227_v45  ;;  %v1257_v31 = vstv %s3309_s16  ;;  %v1260_v11 = vstv %s3316_s20  ;;  %s3506_s16 = sld [smem:[#allocation9 + $0x50]]  ;;  %s3521_s20 = sld [smem:[#allocation9 + $0x51]] }
 0x130   : > { %v1264_v55 = vstv %s3318_s5  ;;  %v1135_v35 = vmul.f32 0.7978846, %v1134_v30  ;;  %v1258_v58 = vmul.f32 %v1257_v31, %v2417_v22  ;;  %v1261_v14 = vmul.f32 %v2973_v34, %v1260_v11  ;;  %s3526_s5 = sld [smem:[#allocation9 + $0x53]] }
 0x131   : > { %v3355_v37 = vadd.f32 %v1233_v10, %v1231_v47  ;;  %v1005_v16 = vmul.f32 %v1004_v24, %v998_v53  ;;  %v1169_v27 = vadd.f32 %v1168_v7, %v3286_v28  ;;  %v1203_v41 = vmul.f32 0.044715, %v1202_v2 }
 0x132   : > { %v1265_v42 = vmul.f32 %v1264_v55, %v2420_v23  ;;  %v1009_v15 = vmul.f32 %v1008_v51, %v998_v53  ;;  %v3372_v17 = vmul.f32 0.5, %v3221_v60  ;;  %v1262_v44 = vadd.f32 %v1261_v14, %v1258_v58 }
 0x133   : > { %v1236_v21 = vmul.f32 %v3355_v37, %v3355_v37  ;;  %v1033_v24 = vmul.f32 %v1032_v8, %v3261_v6  ;;  %v1140_v0 = vstv %s3328_s14  ;;  %v1144_v39 = vstv %s3336_s10  ;;  %s3532_s14 = sld [smem:[#allocation9 + $0x52]]  ;;  %s3534_s10 = sld [smem:[#allocation9 + $0x54]] }
 0x134   : > { %v1148_v33 = vstv %s3338_s22  ;;  %v1953_v40 = vpop.eup %1952  ;;  %1956 = vtanh.f32 %v1135_v35  ;;  %v1266_v60 = vadd.f32 %v1265_v42, %v1262_v44  ;;  %v1268_v20 = vstv %s3344_s11  ;;  %s3541_s22 = sld [smem:[#allocation9 + $0x56]]  ;;  %s3549_s11 = sld [smem:[#allocation9 + $0x55]] }
 0x135   : > { %v1237_v51 = vmul.f32 %v1236_v21, %v3355_v37  ;;  %v1002_v4 = vadd.f32 %v1001_v38, %v967_v29  ;;  %v1006_v59 = vadd.f32 %v1005_v16, %v971_v54  ;;  %v1170_v53 = vmul.f32 0.7978846, %v1169_v27 }
 0x136   : > { %v1204_v6 = vadd.f32 %v1203_v41, %v3330_v1  ;;  %v1010_v13 = vadd.f32 %v1009_v15, %v975_v57  ;;  %v3389_v49 = vadd.f32 %v1268_v20, %v1266_v60  ;;  %v1292_v36 = vstv %s3350_s2  ;;  %s3554_s2 = sld [smem:[#allocation9 + $0x57]] }
 0x137   : > { %v1238_v26 = vmul.f32 0.044715, %v1237_v51  ;;  %v1036_v32 = vmul.f32 %v1035_v50, %v1033_v24  ;;  %v1040_v63 = vmul.f32 %v1039_v61, %v1033_v24  ;;  %v1067_v46 = vadd.f32 1.0, %v1953_v40 }
 0x138   : > { %v3401_v29 = vmul.f32 0.5, %v3252_v56  ;;  %v1044_v30 = vmul.f32 %v1043_v9, %v1033_v24  ;;  %v1271_v48 = vmul.f32 %v3389_v49, %v3389_v49  ;;  %v1293_v45 = vmul.f32 %v1292_v36, %v2417_v22  ;;  %v1955_v61 = vpop.eup %1954 }
 0x139   : > { %v1295_v50 = vstv %s3359_s3  ;;  %1958 = vtanh.f32 %v1170_v53  ;;  %v1175_v56 = vstv %s3364_s4  ;;  %v1179_v54 = vstv %s3366_s8  ;;  %s3556_s3 = sld [smem:[#allocation9 + $0x59]]  ;;  %s3560_s4 = sld [smem:[#allocation9 + $0x58]] }
 0x13a   : > { %v1205_v57 = vmul.f32 0.7978846, %v1204_v6  ;;  %v1239_v7 = vadd.f32 %v1238_v26, %v3355_v37  ;;  %v1272_v9 = vmul.f32 %v1271_v48, %v3389_v49  ;;  %v1296_v10 = vmul.f32 %v2973_v34, %v1295_v50  ;;  %s3565_s8 = sld [smem:[#allocation9 + $0x5a]] }
 0x13b   : > { %v1299_v38 = vstv %s3376_s26  ;;  %v1037_v8 = vadd.f32 %v1036_v32, %v1002_v4  ;;  %v1068_v2 = vmul.f32 %v1067_v46, %v3300_v5  ;;  %v1183_v47 = vstv %s3382_s12  ;;  %s3567_s26 = sld [smem:[#allocation9 + $0x5c]]  ;;  %s3570_s12 = sld [smem:[#allocation9 + $0x5b]] }
 0x13c   : > { %v1300_v31 = vmul.f32 %v1299_v38, %v2420_v23  ;;  %v1041_v11 = vadd.f32 %v1040_v63, %v1006_v59  ;;  %v1045_v55 = vadd.f32 %v1044_v30, %v1010_v13  ;;  %v1273_v35 = vmul.f32 0.044715, %v1272_v9 }
 0x13d   : > { %v1297_v58 = vadd.f32 %v1296_v10, %v1293_v45  ;;  %v1102_v14 = vadd.f32 1.0, %v1955_v61  ;;  %v3431_v5 = vmul.f32 0.5, %v3286_v28  ;;  %1960 = vtanh.f32 %v1205_v57 }
 0x13e   : > { %v1303_v16 = vstv %s3387_s25  ;;  %v1957_v27 = vpop.eup %1956  ;;  %v1240_v41 = vmul.f32 0.7978846, %v1239_v7  ;;  %v1327_v15 = vstv %s3392_s19  ;;  %v1330_v21 = vstv %s3394_s7  ;;  %s3575_s25 = sld [smem:[#allocation9 + $0x5d]]  ;;  %s1810_s19 = sld [smem:[#allocation9 + $0x5e]] }
 0x13f   : > { %v1301_v42 = vadd.f32 %v1300_v31, %v1297_v58  ;;  %v1071_v44 = vmul.f32 %v1070_v52, %v1068_v2  ;;  %v1210_v24 = vstv %s3403_s28  ;;  %v1274_v40 = vadd.f32 %v1273_v35, %v3389_v49  ;;  %s1811_s7 = sld [smem:[#allocation9 + $0x5f]]  ;;  %s1437_s28 = sld [smem:[#allocation2]] }
 0x140   : > { %v1328_v28 = vmul.f32 %v1327_v15, %v2417_v22  ;;  %v1214_v51 = vstv %s3407_s17  ;;  %v1331_v20 = vmul.f32 %v2973_v34, %v1330_v21  ;;  %v1334_v4 = vstv %s3413_s23  ;;  %s3699_s17 = sld [smem:[#allocation19_spill]]  ;;  %s3700_s23 = sld [smem:[#allocation26_spill]] }
 0x141   : > { %v3444_v60 = vadd.f32 %v1303_v16, %v1301_v42  ;;  %v1075_v59 = vmul.f32 %v1074_v12, %v1068_v2  ;;  %v1103_v53 = vmul.f32 %v1102_v14, %v3372_v17  ;;  %v1137_v6 = vadd.f32 1.0, %v1957_v27 }
 0x142   : > { %v1335_v52 = vmul.f32 %v1334_v4, %v2420_v23  ;;  %v1079_v13 = vmul.f32 %v1078_v25, %v1068_v2  ;;  %1962 = vtanh.f32 %v1240_v41  ;;  %v1332_v36 = vadd.f32 %v1331_v20, %v1328_v28 }
 0x143   : > { %v1306_v26 = vmul.f32 %v3444_v60, %v3444_v60  ;;  %v1959_v32 = vpop.eup %1958  ;;  %v1072_v63 = vadd.f32 %v1071_v44, %v1037_v8  ;;  %v1275_v12 = vmul.f32 0.7978846, %v1274_v40  ;;  %v1338_v17 = vstv %s3424_s30 }
 0x144   : > { %v1362_v46 = vstv %s3426_s24  ;;  %v1336_v25 = vadd.f32 %v1335_v52, %v1332_v36  ;;  %v1365_v45 = vstv %s3428_s18  ;;  %v1076_v50 = vadd.f32 %v1075_v59, %v1041_v11 }
 0x145   : > { %v1307_v30 = vmul.f32 %v1306_v26, %v3444_v60  ;;  %v1363_v48 = vmul.f32 %v1362_v46, %v2417_v22  ;;  %v1106_v61 = vmul.f32 %v1105_v3, %v1103_v53  ;;  %v1138_v57 = vmul.f32 %v1137_v6, %v3401_v29 }
 0x146   : > { %v1366_v7 = vmul.f32 %v2973_v34, %v1365_v45  ;;  %v1110_v9 = vmul.f32 %v1109_v43, %v1103_v53  ;;  %v3473_v38 = vadd.f32 %v1338_v17, %v1336_v25  ;;  %v1369_v8 = vstv %s3436_s6  ;;  %s1813_s24 = sshll.u32 %s3699_s17, 7  ;;  %s3702_s18 = sshll.u32 %s3700_s23, 3 }
 0x147   : > { %v1308_v10 = vmul.f32 0.044715, %v1307_v30  ;;  %v1961_v2 = vpop.eup %1960  ;;  %v1080_v31 = vadd.f32 %v1079_v13, %v1045_v55  ;;  %v1172_v35 = vadd.f32 1.0, %v1959_v32  ;;  %v1200_v11 = vmul.f32 0.5, %v3330_v1  ;;  %s296_s6 = scalar_lea.vmem [#allocation11], %s3702_s18 }
 0x148   : > { %1964 = vtanh.f32 %v1275_v12  ;;  %v1114_v3 = vmul.f32 %v1113_v62, %v1103_v53  ;;  %v1341_v29 = vmul.f32 %v3473_v38, %v3473_v38  ;;  %v1367_v58 = vadd.f32 %v1366_v7, %v1363_v48 }
 0x149   : > { %v1309_v43 = vadd.f32 %v1308_v10, %v3444_v60  ;;  %v1107_v14 = vadd.f32 %v1106_v61, %v1072_v63  ;;  %v1141_v16 = vmul.f32 %v1140_v0, %v1138_v57  ;;  %v1235_v55 = vmul.f32 0.5, %v3355_v37 }
 0x14a   : > { %v1370_v1 = vmul.f32 %v1369_v8, %v2420_v23  ;;  %v1111_v62 = vadd.f32 %v1110_v9, %v1076_v50  ;;  %v1342_v41 = vmul.f32 %v1341_v29, %v3473_v38  ;;  %v1397_v42 = vstv %s3456_s15  ;;  %s1465_s15 = sshll.u32 %s296_s6, 4  ;;  %s3593_s15 = int_to_ptr.vmem [resolvable:$true] %s1465_s15 }
 0x14b   : > { %v1310_v27 = vmul.f32 0.7978846, %v1309_v43  ;;  %v1173_v15 = vmul.f32 %v1172_v35, %v3431_v5  ;;  %v1207_v21 = vadd.f32 1.0, %v1961_v2  ;;  %v1373_v37 = vstv %s3460_s0 }
 0x14c   : > { %v1371_v0 = vadd.f32 %v1370_v1, %v1367_v58  ;;  %v1963_v44 = vpop.eup %1962  ;;  %v1343_v40 = vmul.f32 0.044715, %v1342_v41  ;;  %v1398_v28 = vmul.f32 %v1397_v42, %v2417_v22  ;;  %v1400_v20 = vstv %s3465_s21 }
 0x14d   : > { %1966 = vtanh.f32 %v1310_v27  ;;  %v1115_v4 = vadd.f32 %v1114_v3, %v1080_v31  ;;  %v1142_v59 = vadd.f32 %v1141_v16, %v1107_v14  ;;  %v1145_v53 = vmul.f32 %v1144_v39, %v1138_v57 }
 0x14e   : > { %v1149_v5 = vmul.f32 %v1148_v33, %v1138_v57  ;;  %v1344_v6 = vadd.f32 %v1343_v40, %v3473_v38  ;;  %v3509_v52 = vadd.f32 %v1373_v37, %v1371_v0  ;;  %v1401_v22 = vmul.f32 %v2973_v34, %v1400_v20 }
 0x14f   : > { %v1404_v13 = vstv %s3476_s13  ;;  %v1176_v26 = vmul.f32 %v1175_v56, %v1173_v15  ;;  %v1208_v36 = vmul.f32 %v1207_v21, %v1200_v11  ;;  %v1242_v39 = vadd.f32 1.0, %v1963_v44  ;;  %s3703_s13 = sld [smem:[#allocation32_spill]] }
 0x150   : > { %v1405_v33 = vmul.f32 %v1404_v13, %v2420_v23  ;;  %v1218_v32 = vstv %s3481_s27  ;;  %v1345_v63 = vmul.f32 0.7978846, %v1344_v6  ;;  %v1376_v12 = vmul.f32 %v3509_v52, %v3509_v52 }
 0x151   : > { %v1402_v17 = vadd.f32 %v1401_v22, %v1398_v28  ;;  %v1146_v30 = vadd.f32 %v1145_v53, %v1111_v62  ;;  %v1150_v25 = vadd.f32 %v1149_v5, %v1115_v4  ;;  %v1184_v34 = vmul.f32 %v1183_v47, %v1173_v15 }
 0x152   : > { %v1965_v46 = vpop.eup %1964  ;;  %v1408_v56 = vstv %s3490_s9  ;;  %v1180_v48 = vmul.f32 %v1179_v54, %v1173_v15  ;;  %1968 = vtanh.f32 %v1345_v63  ;;  %v1377_v23 = vmul.f32 %v1376_v12, %v3509_v52  ;;  %s1451_s9 = scalar_lea.sflag [#allocation5], %s3700_s23 }
 0x153   : > { %v1406_v45 = vadd.f32 %v1405_v33, %v1402_v17  ;;  %v1177_v50 = vadd.f32 %v1176_v26, %v1142_v59  ;;  %v1211_v61 = vmul.f32 %v1210_v24, %v1208_v36  ;;  %v1243_v57 = vmul.f32 %v1242_v39, %v1235_v55 }
 0x154   : > { %v1245_v7 = vstv %s3495_s1  ;;  %v1270_v54 = vmul.f32 0.5, %v3389_v49  ;;  %v1277_v47 = vadd.f32 1.0, %v1965_v46  ;;  %v1378_v9 = vmul.f32 0.044715, %v1377_v23  ;;  %s2052_s1 = scalar_lea.vmem %s3593_s15, 128 }
 0x155   : > { %v3537_v10 = vadd.f32 %v1408_v56, %v1406_v45  ;;  %v1185_v8 = vadd.f32 %v1184_v34, %v1150_v25  ;;  %v1219_v2 = vmul.f32 %v1218_v32, %v1208_v36  ;;  %v1249_v31 = vstv %s3504_s29  ;;  %s3591_s27 = scalar_lea.hbm %s3703_s13, %s1813_s24  ;;  %p2053_p7 = scmp.ne.s32.totalorder %s3593_s15, %s2052_s1 }
 0x156   : > { %v1181_v11 = vadd.f32 %v1180_v48, %v1146_v30  ;;  %v1253_v24 = vstv %s3506_s16  ;;  %v1379_v3 = vadd.f32 %v1378_v9, %v3509_v52  ;;  %v1212_v49 = vadd.f32 %v1211_v61, %v1177_v50  ;;  %s2149_s29 = smov [#allocation11]  }
 0x157   : > { %v1967_v35 = vpop.eup %1966  ;;  %v1411_v43 = vmul.f32 %v3537_v10, %v3537_v10  ;;  %v1215_v29 = vmul.f32 %v1214_v51, %v1208_v36  ;;  %v1246_v58 = vmul.f32 %v1245_v7, %v1243_v57  ;;  %v1305_v14 = vmul.f32 0.5, %v3444_v60  ;;  %p2054_p10 = pnand %p2053_p7, %p2290_p12  ;;  %s2056_s16 = sshll.u32 %s2149_s29, 4  ;;  %s2057_s16 = int_to_ptr.vmem [resolvable:$false] %s2056_s16 }
 0x158   : > { %v1278_v16 = vmul.f32 %v1277_v47, %v1270_v54  ;;  %v1312_v55 = vadd.f32 1.0, %v1967_v35  ;;  %v1380_v1 = vmul.f32 0.7978846, %v1379_v3  ;;  %v1220_v27 = vadd.f32 %v1219_v2, %v1185_v8  ;;  %p2059_p9 = scmp.lt.s32.totalorder %s3593_s15, %s2057_s16 }
 0x159   : > { %v1412_v62 = vmul.f32 %v1411_v43, %v3537_v10  ;;  %v1254_v41 = vmul.f32 %v1253_v24, %v1243_v57  ;;  %v1280_v42 = vstv %s3521_s20  ;;  %v1288_v15 = vstv %s3526_s5  ;;  %p2055_p0 = pneg %p2054_p10  ;;  %s2058_s20 = scalar_lea.vmem %s2057_s16, 256 }
 0x15a   : > { %1970 = vtanh.f32 %v1380_v1  ;;  %v1216_v60 = vadd.f32 %v1215_v29, %v1181_v11  ;;  %v1250_v21 = vmul.f32 %v1249_v31, %v1243_v57  ;;  %v1284_v0 = vstv %s3532_s14  ;;  %p2060_p3 = scmp.lt.s32.totalorder %s2058_s20, %s2052_s1 }
 0x15b   : > { %v1413_v51 = vmul.f32 0.044715, %v1412_v62  ;;  %v1315_v37 = vstv %s3534_s10  ;;  %v1247_v40 = vadd.f32 %v1246_v58, %v1212_v49  ;;  %v1281_v28 = vmul.f32 %v1280_v42, %v1278_v16 }
 0x15c   : > { %v1969_v44 = vpop.eup %1968  ;;  %v1313_v20 = vmul.f32 %v1312_v55, %v1305_v14  ;;  %v1255_v59 = vadd.f32 %v1254_v41, %v1220_v27  ;;  %v1289_v53 = vmul.f32 %v1288_v15, %v1278_v16  ;;  %v1340_v5 = vmul.f32 0.5, %v3473_v38  ;;  %p2061_p6 = por %p2060_p3, %p2059_p9 }
 0x15d   : > { %v1414_v4 = vadd.f32 %v1413_v51, %v3537_v10  ;;  %v1347_v6 = vadd.f32 1.0, %v1969_v44  ;;  %v1323_v22 = vstv %s3541_s22  ;;  %v1251_v26 = vadd.f32 %v1250_v21, %v1216_v60 }
 0x15e   : > { %v1285_v36 = vmul.f32 %v1284_v0, %v1278_v16  ;;  %v1282_v39 = vadd.f32 %v1281_v28, %v1247_v40  ;;  %v1316_v33 = vmul.f32 %v1315_v37, %v1313_v20  ;;  %v1319_v32 = vstv %s3549_s11  ;;  %p2062_p5 = pnand %p2061_p6, %p2055_p0 }
 0x15f   : > { %v1415_v13 = vmul.f32 0.7978846, %v1414_v4  ;;  %v1290_v63 = vadd.f32 %v1289_v53, %v1255_v59  ;;  %v1324_v38 = vmul.f32 %v1323_v22, %v1313_v20  ;;  %v1348_v12 = vmul.f32 %v1347_v6, %v1340_v5 }
 0x160   : > { %v1350_v17 = vstv %s3554_s2  ;;  %v1358_v46 = vstv %s3556_s3  ;;  %v1286_v30 = vadd.f32 %v1285_v36, %v1251_v26  ;;  %v1320_v25 = vmul.f32 %v1319_v32, %v1313_v20 }
 0x161   : > { %1972 = vtanh.f32 %v1415_v13  ;;  %v1375_v34 = vmul.f32 0.5, %v3509_v52  ;;  %v1317_v48 = vadd.f32 %v1316_v33, %v1282_v39  ;;  %v1354_v23 = vstv %s3560_s4 }
 0x162   : > { %v1325_v45 = vadd.f32 %v1324_v38, %v1290_v63  ;;  %v1351_v50 = vmul.f32 %v1350_v17, %v1348_v12  ;;  %v1359_v61 = vmul.f32 %v1358_v46, %v1348_v12  ;;  %v1385_v7 = vstv %s3565_s8 }
 0x163   : > { %v1393_v54 = vstv %s3567_s26  ;;  %v1321_v47 = vadd.f32 %v1320_v25, %v1286_v30  ;;  %v1355_v9 = vmul.f32 %v1354_v23, %v1348_v12  ;;  %v1389_v2 = vstv %s3570_s12 }
 0x164   : > { %v1971_v56 = vpop.eup %1970  ;;  %v1410_v52 = vmul.f32 0.5, %v3537_v10  ;;  %v1352_v31 = vadd.f32 %v1351_v50, %v1317_v48  ;;  %v1360_v35 = vadd.f32 %v1359_v61, %v1325_v45  ;;  %v1420_v58 = vstv %s3575_s25 }
 0x165   : > { %v1382_v57 = vadd.f32 1.0, %v1971_v56  ;;  %v1356_v43 = vadd.f32 %v1355_v9, %v1321_v47  ;;  %v1424_v14 = vstv %s1810_s19  ;;  %v1428_v16 = vstv %s1811_s7 }
 0x166   : > { %v1438_v28 = vstv %s1437_s28 }
 0x167   : > { %v1383_v8 = vmul.f32 %v1382_v57, %v1375_v34 }
 0x169   : > { %v1386_v11 = vmul.f32 %v1385_v7, %v1383_v8  ;;  %v1394_v24 = vmul.f32 %v1393_v54, %v1383_v8  ;;  %v1390_v49 = vmul.f32 %v1389_v2, %v1383_v8 }
 0x16b   : > { %v1973_v3 = vpop.eup %1972  ;;  %v1387_v55 = vadd.f32 %v1386_v11, %v1352_v31  ;;  %v1395_v1 = vadd.f32 %v1394_v24, %v1360_v35  ;;  %v1391_v27 = vadd.f32 %v1390_v49, %v1356_v43 }
 0x16c   : > { %v1417_v29 = vadd.f32 1.0, %v1973_v3 }
 0x16e   : > { %v1418_v62 = vmul.f32 %v1417_v29, %v1410_v52 }
 0x170   : > { %v1421_v41 = vmul.f32 %v1420_v58, %v1418_v62  ;;  %v1425_v42 = vmul.f32 %v1424_v14, %v1418_v62  ;;  %v1429_v15 = vmul.f32 %v1428_v16, %v1418_v62 }
 0x172   : > { %v1422_v10 = vadd.f32 %v1421_v41, %v1387_v55  ;;  %v1430_v51 = vadd.f32 %v1429_v15, %v1395_v1  ;;  %v1426_v60 = vadd.f32 %v1425_v42, %v1391_v27 }
 0x174   : > { %v1431_v21 = vrot.slane %v1422_v10, 7  ;;  %v1434_v0 = vrot.slane %v1430_v51, 1 }
 0x176   : > { %v1432_v37 = vmul.f32 %v1431_v21, %v2406_v18  ;;  %v1435_v44 = vmul.f32 %v1434_v0, %v2408_v19 }
 0x178   : > { %v1433_v40 = vadd.f32 %v1432_v37, %v1426_v60 }
 0x17a   : > { %v1436_v20 = vadd.f32 %v1435_v44, %v1433_v40 }
 0x17c   : > { %v1439_v4 = vadd.f32 %v1438_v28, %v1436_v20 }
 0x17e   : > { %v1441_v59 = vmul.f32 %v1439_v4, %v1439_v4  ;;  %v1440_v13 = vmul.f32 0.5, %v1439_v4 }
 0x180   : > { %v1442_v53 = vmul.f32 %v1441_v59, %v1439_v4 }
 0x182   : > { %v1443_v5 = vmul.f32 0.044715, %v1442_v53 }
 0x184   : > { %v1444_v6 = vadd.f32 %v1443_v5, %v1439_v4 }
 0x186   : > { %v1445_v22 = vmul.f32 0.7978846, %v1444_v6 }
 0x188   : > { %1974 = vtanh.f32 %v1445_v22 }
 0x192   : > { %v1975_v26 = vpop.eup %1974 }
 0x193   : > { %v1447_v18 = vadd.f32 1.0, %v1975_v26 }
 0x195   : > { %v1448_v19 = vmul.f32 %v1447_v18, %v1440_v13 }
 0x197   : > { %1449 = vst [vmem:[%s296_s6] sm:$0xff] %v1448_v19 }
 0x198   : > { %2065 = shalt.err (!%p2062_p5)
}
 0x199   : > { %s2066_s5 = scalar_lea.hbm %s3591_s27, 128  ;;  %s2070_s22 = scalar_lea.hbm %s3703_s13, 256 }
 0x19a   : > { %p2067_p1 = scmp.ne.s32.totalorder %s3591_s27, %s2066_s5  ;;  %p2071_p2 = scmp.lt.u32.totalorder %s3591_s27, %s3703_s13 }
 0x19b   : > { %p2072_p4 = scmp.lt.u32.totalorder %s2070_s22, %s2066_s5  ;;  %p2074_p7 = scmp.lt.u32.totalorder %s2066_s5, %s3591_s27 }
 0x19c   : > { %p2068_p8 = pnand %p2067_p1, %p2290_p12 }
 0x19d   : > { %p2073_p11 = por %p2072_p4, %p2071_p2 }
 0x19e   : > { %p2069_p13 = pneg %p2068_p8 }
 0x19f   : > { %p2075_p10 = por %p2074_p7, %p2073_p11 }
 0x1a1   : > { %p2076_p0 = pnand %p2075_p10, %p2069_p13 }
 0x1a3   : > { %2079 = shalt.err (!%p2076_p0)
}
 0x1a4   : > { %1830 = dma.vmem_to_hbm [thread:$0]  (%p2290_p12), %s3593_s15, 128, %s3591_s27, %s1451_s9  }
 0x1a5 PF: > { %s3704_s3 = sld [smem:[#allocation16_spill]]  ;;  %s3705_s4 = sld [smem:[#allocation22_spill]] }
 0x1a6   : > { %s3706_s8 = sld [smem:[#allocation21_spill]] }
 0x1ab   : > { %s1477_s26 = sand.u32 1, %s3704_s3   ;;  %p3707_p9 = scmp.ne.s32.totalorder %s3705_s4, 0 }
 0x1ac   : > { %p3708_p3 = scmp.ge.s32.totalorder %s3706_s8, 2  ;;  %s1478_s12 = scalar_lea.sflag [#allocation5], %s1477_s26 }
 0x1ae   : > { %p1847_p6 = pnand %p3708_p3, %p3707_p9 }
 0x1b0   : > { %2117 = dma.done.wait (!%p1847_p6), %s1478_s12, 128  }
 0x1b1   : > { %2119 = vsyncadd (!%p1847_p6), %s1478_s12, 4294967168  ;;  %s24_s25 = sadd.s32 1, %s3706_s8   ;;  %s3709_s20 = sld [smem:[#allocation17_spill]] }
 0x1b2   : > { %p21_p5 = scmp.ge.s32.totalorder %s24_s25, 4   ;;  %s3710_s21 = sld [smem:[#allocation18_spill]] }
 0x1b3   : > { %s3711_s22 = sld [smem:[#allocation25_spill]]  ;;  %s3712_s23 = sld [smem:[#allocation20_spill]] }
 0x1b4   : > { %s3713_s24 = sld [smem:[#allocation24_spill]]  ;;  %23 = sbr.rel (!%p21_p5) target bundleno = 15 (0xf), region = 98 }
 0x1bb   :  { %1483 = vsyncpa [#allocation4], 1 }
 0x1bc   :  { %1485 = vsyncpa [#allocation4 + $0x1], 1 }
 0x1bd   :  { %1486 = vsyncpa [#allocation5], 1 }
 0x1be   :  { %1488 = vsyncpa [#allocation5 + $0x1], 1 }
 0x1bf   :  { %1489 = vsyncpa [#allocation6], 1 }
 0x1c0   :  { %1491 = vsyncpa [#allocation6 + $0x1], 1 }
 0x1c1   :  { %1492 = vsyncpa [#allocation8], 1 }

</bundles_post_ra>
